<compile_context>
chip_gen: v7x
topology: tpu7x:2x2x1
jax: 0.10.0
libtpu: 0.0.40
codegen_flags: <defaults>
</compile_context>

<pallas_src>
import inspect
import math
from functools import partial

import jax
import jax.numpy as jnp
import numpy as np
from jax.experimental import pallas as pl
from jax.experimental.pallas import tpu as pltpu


def _round_up(x, m):
    return (x + m - 1) // m * m


def _cdiv(a, b):
    return (a + b - 1) // b


# Use a single VMEM buffer for blocks whose index_map is constant (weight/bias),
# if this jax version exposes BlockSpec(pipeline_mode=...).  Falls back silently.
try:
    _RESIDENT_KW = (
        {"pipeline_mode": pl.Buffered(1)}
        if hasattr(pl, "Buffered")
        and "pipeline_mode" in inspect.signature(pl.BlockSpec).parameters
        else {}
    )
except Exception:  # capability probe only
    _RESIDENT_KW = {}


def channel_shuffle(x, groups):
    """Matches the PyTorch reference exactly (used only by the pure-JAX reference;
    the Pallas path folds this permutation into the conv weight)."""
    n, c, h, w = x.shape
    cpg = c // groups
    x = x.reshape(n, groups, cpg, h, w)
    x = jnp.transpose(x, (0, 2, 1, 3, 4))
    return x.reshape(n, c, h, w)


def _shuffle_src_perm(c, groups):
    # shuffled[:, j] == x[:, src[j]]
    cpg = c // groups
    j = np.arange(c)
    return (j % groups) * cpg + (j // groups)


def _fused_weight(weight, sh_groups, conv_groups, C):
    """(G, C//conv_groups, k, k) grouped PyTorch weight -> dense (k*k, C, G) weight
    acting directly on the UNSHUFFLED input: the conv-group block-diagonal
    structure and the channel-shuffle permutation are both folded in (tiny,
    one-time work on the weight instead of an HBM pass over the activations)."""
    G, cin_g, kh, kw = weight.shape
    g_g = G // conv_groups
    wt = jnp.transpose(weight.reshape(conv_groups, g_g, cin_g, kh, kw),
                       (3, 4, 0, 2, 1))                     # (k, k, cg, cin_g, g_g)
    w_sh = jnp.zeros((kh, kw, C, G), weight.dtype)          # indexed by shuffled ch
    for gi in range(conv_groups):
        w_sh = w_sh.at[:, :, gi * cin_g:(gi + 1) * cin_g,
                       gi * g_g:(gi + 1) * g_g].set(wt[:, :, gi])
    # conv(shuffle(x), w_sh) == conv(x, w_sh[:, :, argsort(src), :])
    inv = np.argsort(_shuffle_src_perm(C, sh_groups))
    return w_sh[:, :, inv, :].reshape(kh * kw, C, G)


def _choose_row_tile(H, wp, N, row_align, target_rows=2048):
    """Pick TH (image rows per grid step) s.t. TH*wp is row_align-aligned, the
    per-step output block is ~target_rows rows, and N*row_blocks >= 2 (megacore)."""
    unit = row_align // math.gcd(wp, row_align)
    th = max(unit, (target_rows // wp) // unit * unit)
    th = min(th, _round_up(H, unit))
    if N * _cdiv(H, th) < 2 and th > unit:        # v7x: give both TCs work
        th = max(unit, _round_up(_cdiv(H, 2), unit))
    h_pad = _cdiv(H, th) * th
    return th, h_pad


def _make_kernel(ksize, wp, out_rows, win_rows, row_hint):
    """One grid step: 9 tap matmuls over a row window of the resident padded image,
    shift-accumulated in f32, + bias + ReLU."""

    def kernel(xp_ref, w_ref, b_ref, o_ref):
        # xp_ref: (1, RP, C)      flattened zero-padded NHWC image (resident per n)
        # w_ref : (k*k, C, G)     dense fused weight (resident, single buffer)
        # b_ref : (1, G) f32      (resident, single buffer)
        # o_ref : (1, out_rows, G)
        r = pl.program_id(1)
        row0 = pl.multiple_of(r * out_rows, row_hint)
        x_win = xp_ref[0, pl.ds(row0, win_rows), :]            # (win_rows, C)

        acc = None
        for kh in range(ksize):
            for kw in range(ksize):
                k = kh * ksize + kw
                y = jnp.dot(x_win, w_ref[k],
                            preferred_element_type=jnp.float32)  # (win_rows, G) f32
                off = kh * wp + kw                               # static shift
                ys = y[off:off + out_rows, :]                    # (out_rows, G)
                acc = ys if acc is None else acc + ys
        acc = jnp.maximum(acc + b_ref[...], 0.0)                 # f32 bias + ReLU
        o_ref[0] = acc.astype(o_ref.dtype)

    return kernel


@partial(jax.jit, static_argnames=("sh_groups", "conv_groups", "use_bf16", "kSize"))
def rdb_conv_forward(x, weight, bias, sh_groups, conv_groups, *,
                     use_bf16=True, kSize=3):
    """Forward of RDB_Conv.

    x      : (N, Cin, H, W) float32 (NCHW)
    weight : (G, Cin // conv_groups, k, k)   (PyTorch grouped-conv layout)
    bias   : (G,)
    returns: (N, Cin + G, H, W) float32
    """
    N, C, H, W = x.shape
    G = weight.shape[0]
    assert C % sh_groups == 0 and C % conv_groups == 0 and G % conv_groups == 0
    pad = (kSize - 1) // 2
    wp = W + 2 * pad

    in_dtype = jnp.bfloat16 if use_bf16 else jnp.float32
    out_dtype = jnp.bfloat16 if use_bf16 else jnp.float32     # bf16 halves out writes
    row_align = 16 if use_bf16 else 8                         # bf16 packs 2 rows/sublane

    th, h_pad = _choose_row_tile(H, wp, N, row_align)
    n_blocks = h_pad // th
    out_rows = th * wp                                        # output rows / grid step
    win_rows = (th + 2 * pad) * wp + 2 * pad                  # input rows / grid step
    rp = _round_up((h_pad + 2 * pad) * wp + 2 * pad, 8)       # flat padded rows / image

    # --- glue: NCHW -> zero-padded NHWC, flattened to (N, rp, C) rows -------------
    xs = jnp.transpose(x, (0, 2, 3, 1)).astype(in_dtype)                  # (N,H,W,C)
    xp = jnp.pad(xs, ((0, 0), (pad, pad + (h_pad - H)), (pad, pad), (0, 0)))
    xflat = xp.reshape(N, (h_pad + 2 * pad) * wp, C)
    if rp > xflat.shape[1]:
        xflat = jnp.pad(xflat, ((0, 0), (0, rp - xflat.shape[1]), (0, 0)))

    # --- glue: fused dense weight (shuffle + groups folded in), tiny --------------
    w9 = _fused_weight(weight, sh_groups, conv_groups, C).astype(in_dtype)  # (k*k,C,G)
    b2 = bias.reshape(1, G).astype(jnp.float32)

    row_hint = min(out_rows & -out_rows, 256)                 # pow2 divisor of out_rows
    kernel = _make_kernel(kSize, wp, out_rows, win_rows, row_hint)

    # --- VMEM budget derived from actual block sizes ------------------------------
    bw_in = jnp.dtype(in_dtype).itemsize
    bw_out = jnp.dtype(out_dtype).itemsize
    vmem_est = (2 * rp * C * bw_in                       # resident image, 2 buffers
                + 2 * out_rows * G * bw_out              # output blocks
                + 2 * (kSize * kSize * C * G * bw_in + G * 4)   # weight/bias
                + win_rows * C * bw_in                   # x_win load
                + 4 * win_rows * G * 4)                  # y/acc temporaries
    vmem_limit = int(min(max(int(vmem_est * 1.5) + (4 << 20), 16 << 20), 100 << 20))
    # TODO(synk): for very large images the per-batch resident padded image exceeds
    # VMEM (esp. v7x's 64 MiB); that regime needs memory_space=pl.ANY plus a
    # manually double-buffered halo'd row-tile DMA instead of a resident block.

    out = pl.pallas_call(
        kernel,
        out_shape=jax.ShapeDtypeStruct((N, n_blocks * out_rows, G), out_dtype),
        grid=(N, n_blocks),
        in_specs=[
            # padded image: resident across the row axis -> read from HBM once per n
            pl.BlockSpec((1, rp, C), lambda n, r: (n, 0, 0)),
            pl.BlockSpec((kSize * kSize, C, G), lambda n, r: (0, 0, 0), **_RESIDENT_KW),
            pl.BlockSpec((1, G), lambda n, r: (0, 0), **_RESIDENT_KW),
        ],
        out_specs=pl.BlockSpec((1, out_rows, G), lambda n, r: (n, r, 0)),
        compiler_params=pltpu.CompilerParams(
            dimension_semantics=("parallel", "parallel"),
            vmem_limit_bytes=vmem_limit),
    )(xflat, w9, b2)                                          # (N, h_pad*wp, G)

    # --- glue: crop padded width / rows, back to NCHW, concat with the input ------
    out = out.reshape(N, h_pad, wp, G)[:, :H, :W, :]
    out = jnp.transpose(out, (0, 3, 1, 2)).astype(x.dtype)    # (N, G, H, W)
    return jnp.concatenate([x, out], axis=1)


def _reference(x, weight, bias, sh_groups, conv_groups):
    """Pure-JAX reference (lax grouped conv) for correctness check."""
    xs = channel_shuffle(x, sh_groups)
    out = jax.lax.conv_general_dilated(
        xs, weight, window_strides=(1, 1), padding=((1, 1), (1, 1)),
        dimension_numbers=("NCHW", "OIHW", "NCHW"),
        feature_group_count=conv_groups)
    out = jnp.maximum(out + bias[None, :, None, None], 0.0)
    return jnp.concatenate([x, out], axis=1)


if __name__ == "__main__":
    # Small shapes consistent with the module: Cin divisible by sh/conv groups,
    # growRate divisible by conv groups.
    N, Cin, H, W = 2, 8, 16, 16
    growRate, sh_groups, conv_groups = 8, 2, 2

    key = jax.random.PRNGKey(0)
    kx, kw_, kb = jax.random.split(key, 3)
    x = jax.random.normal(kx, (N, Cin, H, W), dtype=jnp.float32)
    weight = 0.1 * jax.random.normal(
        kw_, (growRate, Cin // conv_groups, 3, 3), dtype=jnp.float32)
    bias = 0.1 * jax.random.normal(kb, (growRate,), dtype=jnp.float32)

    ref = jax.block_until_ready(_reference(x, weight, bias, sh_groups, conv_groups))

    # f32 MXU operands: tight check against the lax grouped-conv reference.
    out_f32 = jax.block_until_ready(
        rdb_conv_forward(x, weight, bias, sh_groups, conv_groups, use_bf16=False))
    assert out_f32.shape == (N, Cin + growRate, H, W)
    np.testing.assert_allclose(np.asarray(out_f32), np.asarray(ref),
                               rtol=1e-4, atol=1e-4)

    # bf16 MXU operands / bf16 kernel output, f32 accumulation: loose check.
    out_bf16 = jax.block_until_ready(
        rdb_conv_forward(x, weight, bias, sh_groups, conv_groups, use_bf16=True))
    assert out_bf16.shape == (N, Cin + growRate, H, W)
    np.testing.assert_allclose(np.asarray(out_bf16), np.asarray(ref),
                               rtol=1e-1, atol=2e-1)

    print("KERNEL_OK")
</pallas_src>

<mosaic_0001>
module attributes {stable_mosaic.version = 11 : i64} {
  func.func @kernel(%arg0: i32, %arg1: i32, %arg2: memref<1x328x8xf32, #tpu.memory_space<vmem>>, %arg3: memref<9x8x8xf32, #tpu.memory_space<vmem>>, %arg4: memref<1x8xf32, #tpu.memory_space<vmem>>, %arg5: memref<1x288x8xf32, #tpu.memory_space<vmem>>) attributes {dimension_semantics = [#tpu.dimension_semantics<parallel>, #tpu.dimension_semantics<parallel>], iteration_bounds = array<i64: 2, 1>, scalar_prefetch = 0 : i64, scratch_operands = 0 : i64, tpu.core_type = #tpu.core_type<tc>, window_params = [{transform_indices = @transform_0, window_bounds = array<i64: 1, 328, 8>}, {pipeline_mode = #tpu.pipeline_mode<synchronous>, transform_indices = @transform_1, window_bounds = array<i64: 9, 8, 8>}, {pipeline_mode = #tpu.pipeline_mode<synchronous>, transform_indices = @transform_2, window_bounds = array<i64: 1, 8>}, {transform_indices = @transform_3, window_bounds = array<i64: 1, 288, 8>}]} {
    %c288_i32 = arith.constant 288 : i32
    %0 = arith.muli %arg1, %c288_i32 : i32
    %1 = tpu.assume_multiple %0, 32 : i32
    %c0 = arith.constant 0 : index
    %2 = arith.index_cast %1 : i32 to index
    %c0_0 = arith.constant 0 : index
    %3 = vector.load %arg2[%c0, %2, %c0_0] : memref<1x328x8xf32, #tpu.memory_space<vmem>>, vector<1x326x8xf32>
    %4 = vector.shape_cast %3 : vector<1x326x8xf32> to vector<326x8xf32>
    %c0_1 = arith.constant 0 : index
    %c0_2 = arith.constant 0 : index
    %c0_3 = arith.constant 0 : index
    %5 = vector.load %arg3[%c0_1, %c0_2, %c0_3] : memref<9x8x8xf32, #tpu.memory_space<vmem>>, vector<1x8x8xf32>
    %6 = vector.shape_cast %5 : vector<1x8x8xf32> to vector<8x8xf32>
    %cst = arith.constant dense<0.000000e+00> : vector<326x8xf32>
    %7 = tpu.matmul %4, %6, %cst {dimension_numbers = #tpu.dot_dimension_numbers<[1], [0], [0], [1], [0, 0, 1, 1], [], []>} : vector<326x8xf32>, vector<8x8xf32>, vector<326x8xf32> -> vector<326x8xf32>
    %8 = vector.extract_strided_slice %7 {offsets = [0, 0], sizes = [288, 8], strides = [1, 1]} : vector<326x8xf32> to vector<288x8xf32>
    %c1 = arith.constant 1 : index
    %c0_4 = arith.constant 0 : index
    %c0_5 = arith.constant 0 : index
    %9 = vector.load %arg3[%c1, %c0_4, %c0_5] : memref<9x8x8xf32, #tpu.memory_space<vmem>>, vector<1x8x8xf32>
    %10 = vector.shape_cast %9 : vector<1x8x8xf32> to vector<8x8xf32>
    %cst_6 = arith.constant dense<0.000000e+00> : vector<326x8xf32>
    %11 = tpu.matmul %4, %10, %cst_6 {dimension_numbers = #tpu.dot_dimension_numbers<[1], [0], [0], [1], [0, 0, 1, 1], [], []>} : vector<326x8xf32>, vector<8x8xf32>, vector<326x8xf32> -> vector<326x8xf32>
    %12 = vector.extract_strided_slice %11 {offsets = [1, 0], sizes = [288, 8], strides = [1, 1]} : vector<326x8xf32> to vector<288x8xf32>
    %13 = arith.addf %8, %12 : vector<288x8xf32>
    %c2 = arith.constant 2 : index
    %c0_7 = arith.constant 0 : index
    %c0_8 = arith.constant 0 : index
    %14 = vector.load %arg3[%c2, %c0_7, %c0_8] : memref<9x8x8xf32, #tpu.memory_space<vmem>>, vector<1x8x8xf32>
    %15 = vector.shape_cast %14 : vector<1x8x8xf32> to vector<8x8xf32>
    %cst_9 = arith.constant dense<0.000000e+00> : vector<326x8xf32>
    %16 = tpu.matmul %4, %15, %cst_9 {dimension_numbers = #tpu.dot_dimension_numbers<[1], [0], [0], [1], [0, 0, 1, 1], [], []>} : vector<326x8xf32>, vector<8x8xf32>, vector<326x8xf32> -> vector<326x8xf32>
    %17 = vector.extract_strided_slice %16 {offsets = [2, 0], sizes = [288, 8], strides = [1, 1]} : vector<326x8xf32> to vector<288x8xf32>
    %18 = arith.addf %13, %17 : vector<288x8xf32>
    %c3 = arith.constant 3 : index
    %c0_10 = arith.constant 0 : index
    %c0_11 = arith.constant 0 : index
    %19 = vector.load %arg3[%c3, %c0_10, %c0_11] : memref<9x8x8xf32, #tpu.memory_space<vmem>>, vector<1x8x8xf32>
    %20 = vector.shape_cast %19 : vector<1x8x8xf32> to vector<8x8xf32>
    %cst_12 = arith.constant dense<0.000000e+00> : vector<326x8xf32>
    %21 = tpu.matmul %4, %20, %cst_12 {dimension_numbers = #tpu.dot_dimension_numbers<[1], [0], [0], [1], [0, 0, 1, 1], [], []>} : vector<326x8xf32>, vector<8x8xf32>, vector<326x8xf32> -> vector<326x8xf32>
    %22 = vector.extract_strided_slice %21 {offsets = [18, 0], sizes = [288, 8], strides = [1, 1]} : vector<326x8xf32> to vector<288x8xf32>
    %23 = arith.addf %18, %22 : vector<288x8xf32>
    %c4 = arith.constant 4 : index
    %c0_13 = arith.constant 0 : index
    %c0_14 = arith.constant 0 : index
    %24 = vector.load %arg3[%c4, %c0_13, %c0_14] : memref<9x8x8xf32, #tpu.memory_space<vmem>>, vector<1x8x8xf32>
    %25 = vector.shape_cast %24 : vector<1x8x8xf32> to vector<8x8xf32>
    %cst_15 = arith.constant dense<0.000000e+00> : vector<326x8xf32>
    %26 = tpu.matmul %4, %25, %cst_15 {dimension_numbers = #tpu.dot_dimension_numbers<[1], [0], [0], [1], [0, 0, 1, 1], [], []>} : vector<326x8xf32>, vector<8x8xf32>, vector<326x8xf32> -> vector<326x8xf32>
    %27 = vector.extract_strided_slice %26 {offsets = [19, 0], sizes = [288, 8], strides = [1, 1]} : vector<326x8xf32> to vector<288x8xf32>
    %28 = arith.addf %23, %27 : vector<288x8xf32>
    %c5 = arith.constant 5 : index
    %c0_16 = arith.constant 0 : index
    %c0_17 = arith.constant 0 : index
    %29 = vector.load %arg3[%c5, %c0_16, %c0_17] : memref<9x8x8xf32, #tpu.memory_space<vmem>>, vector<1x8x8xf32>
    %30 = vector.shape_cast %29 : vector<1x8x8xf32> to vector<8x8xf32>
    %cst_18 = arith.constant dense<0.000000e+00> : vector<326x8xf32>
    %31 = tpu.matmul %4, %30, %cst_18 {dimension_numbers = #tpu.dot_dimension_numbers<[1], [0], [0], [1], [0, 0, 1, 1], [], []>} : vector<326x8xf32>, vector<8x8xf32>, vector<326x8xf32> -> vector<326x8xf32>
    %32 = vector.extract_strided_slice %31 {offsets = [20, 0], sizes = [288, 8], strides = [1, 1]} : vector<326x8xf32> to vector<288x8xf32>
    %33 = arith.addf %28, %32 : vector<288x8xf32>
    %c6 = arith.constant 6 : index
    %c0_19 = arith.constant 0 : index
    %c0_20 = arith.constant 0 : index
    %34 = vector.load %arg3[%c6, %c0_19, %c0_20] : memref<9x8x8xf32, #tpu.memory_space<vmem>>, vector<1x8x8xf32>
    %35 = vector.shape_cast %34 : vector<1x8x8xf32> to vector<8x8xf32>
    %cst_21 = arith.constant dense<0.000000e+00> : vector<326x8xf32>
    %36 = tpu.matmul %4, %35, %cst_21 {dimension_numbers = #tpu.dot_dimension_numbers<[1], [0], [0], [1], [0, 0, 1, 1], [], []>} : vector<326x8xf32>, vector<8x8xf32>, vector<326x8xf32> -> vector<326x8xf32>
    %37 = vector.extract_strided_slice %36 {offsets = [36, 0], sizes = [288, 8], strides = [1, 1]} : vector<326x8xf32> to vector<288x8xf32>
    %38 = arith.addf %33, %37 : vector<288x8xf32>
    %c7 = arith.constant 7 : index
    %c0_22 = arith.constant 0 : index
    %c0_23 = arith.constant 0 : index
    %39 = vector.load %arg3[%c7, %c0_22, %c0_23] : memref<9x8x8xf32, #tpu.memory_space<vmem>>, vector<1x8x8xf32>
    %40 = vector.shape_cast %39 : vector<1x8x8xf32> to vector<8x8xf32>
    %cst_24 = arith.constant dense<0.000000e+00> : vector<326x8xf32>
    %41 = tpu.matmul %4, %40, %cst_24 {dimension_numbers = #tpu.dot_dimension_numbers<[1], [0], [0], [1], [0, 0, 1, 1], [], []>} : vector<326x8xf32>, vector<8x8xf32>, vector<326x8xf32> -> vector<326x8xf32>
    %42 = vector.extract_strided_slice %41 {offsets = [37, 0], sizes = [288, 8], strides = [1, 1]} : vector<326x8xf32> to vector<288x8xf32>
    %43 = arith.addf %38, %42 : vector<288x8xf32>
    %c8 = arith.constant 8 : index
    %c0_25 = arith.constant 0 : index
    %c0_26 = arith.constant 0 : index
    %44 = vector.load %arg3[%c8, %c0_25, %c0_26] : memref<9x8x8xf32, #tpu.memory_space<vmem>>, vector<1x8x8xf32>
    %45 = vector.shape_cast %44 : vector<1x8x8xf32> to vector<8x8xf32>
    %cst_27 = arith.constant dense<0.000000e+00> : vector<326x8xf32>
    %46 = tpu.matmul %4, %45, %cst_27 {dimension_numbers = #tpu.dot_dimension_numbers<[1], [0], [0], [1], [0, 0, 1, 1], [], []>} : vector<326x8xf32>, vector<8x8xf32>, vector<326x8xf32> -> vector<326x8xf32>
    %47 = vector.extract_strided_slice %46 {offsets = [38, 0], sizes = [288, 8], strides = [1, 1]} : vector<326x8xf32> to vector<288x8xf32>
    %48 = arith.addf %43, %47 : vector<288x8xf32>
    %c0_28 = arith.constant 0 : index
    %c0_29 = arith.constant 0 : index
    %49 = vector.load %arg4[%c0_28, %c0_29] : memref<1x8xf32, #tpu.memory_space<vmem>>, vector<1x8xf32>
    %50 = vector.broadcast %49 : vector<1x8xf32> to vector<288x8xf32>
    %51 = arith.addf %48, %50 : vector<288x8xf32>
    %cst_30 = arith.constant 0.000000e+00 : f32
    %52 = vector.broadcast %cst_30 : f32 to vector<288x8xf32>
    %53 = arith.maximumf %51, %52 : vector<288x8xf32>
    %c0_31 = arith.constant 0 : index
    %c0_32 = arith.constant 0 : index
    %c0_33 = arith.constant 0 : index
    %54 = vector.load %arg5[%c0_31, %c0_32, %c0_33] : memref<1x288x8xf32, #tpu.memory_space<vmem>>, vector<1x288x8xf32>
    %55 = vector.shape_cast %54 : vector<1x288x8xf32> to vector<288x8xf32>
    %56 = vector.shape_cast %53 : vector<288x8xf32> to vector<1x288x8xf32>
    tpu.vector_store %arg5[%c0_31, %c0_32, %c0_33], %56 {strides = array<i32>} : memref<1x288x8xf32, #tpu.memory_space<vmem>>, vector<1x288x8xf32>,
    return
  }
  func.func @transform_0(%arg0: i32, %arg1: i32) -> (i32, i32, i32) {
    %c0_i32 = arith.constant 0 : i32
    %c0_i32_0 = arith.constant 0 : i32
    %c0_i32_1 = arith.constant 0 : i32
    return %arg0, %c0_i32, %c0_i32_0 : i32, i32, i32
  }
  func.func @transform_1(%arg0: i32, %arg1: i32) -> (i32, i32, i32) {
    %c0_i32 = arith.constant 0 : i32
    %c0_i32_0 = arith.constant 0 : i32
    %c0_i32_1 = arith.constant 0 : i32
    %c0_i32_2 = arith.constant 0 : i32
    return %c0_i32, %c0_i32_0, %c0_i32_1 : i32, i32, i32
  }
  func.func @transform_2(%arg0: i32, %arg1: i32) -> (i32, i32) {
    %c0_i32 = arith.constant 0 : i32
    %c0_i32_0 = arith.constant 0 : i32
    %c0_i32_1 = arith.constant 0 : i32
    return %c0_i32, %c0_i32_0 : i32, i32
  }
  func.func @transform_3(%arg0: i32, %arg1: i32) -> (i32, i32, i32) {
    %c0_i32 = arith.constant 0 : i32
    %c0_i32_0 = arith.constant 0 : i32
    return %arg0, %arg1, %c0_i32 : i32, i32, i32
  }
}

</mosaic_0001>

<bundles_post_ra>
// kernel: rdb_conv_forward.1
= control target key start
LH: loop header
LB: loop body
LE: loop exit
PB: predicated region body
PF: predicated region fallthrough
CT: control target
= control target key end

     0   :  { %s6499_s12 = smov 0   ;;  %s6501_s13 = smov 0   ;;  %s8907_s0 = inlined_call_operand.vmem [shape: f32[2,328,8], index: 0, kind: input, shape index: {}]   ;;  %s8908_s1 = inlined_call_operand.vmem [shape: f32[9,8,8], index: 1, kind: input, shape index: {}]   ;;  %s8909_s2 = inlined_call_operand.vmem [shape: f32[1,8], index: 2, kind: input, shape index: {}]   ;;  %s8910_s3 = inlined_call_operand.vmem [shape: f32[2,288,8], index: 3, kind: output, shape index: {}]  }
   0x1   :  { %s6503_s14 = smov 0  }
   0x2 LB: > { %s25_s15 = sadd.s32 1, %s6471_s13  ;;  %p4435_p0 = scmp.ge.s32.totalorder %s6475_s14, 1  ;;  %s6475_s14 = sphi %s6503_s14, %s13_s14   ;;  %s6471_s13 = sphi %s6501_s13, %s8912_s13   ;;  %s6467_s12 = sphi %s6499_s12, %s8911_s12  }
   0x3   : > { %p27_p1 = scmp.ge.s32.totalorder %s25_s15, 2  ;;  %p151_p2 = scmp.lt.s32.totalorder %s6475_s14, 3 }
   0x5   : > { %s8914_s15 = smov (%p27_p1, %s25_s15), 0  ;;  %p152_p3 = pnand %p4435_p0, %p151_p2 }
   0x6   : > { %v237_v0 = vld [vmem:[%s8908_s1] sm:$0xff] (!%p152_p3)  ;;  %p179_p4 = scmp.lt.s32.totalorder (!%p152_p3), %s6467_s12, 1  ;;  %v6477_v1 = vmov (!%p152_p3), 0.0   ;;  %vm6478_vm0 = vmmov (!%p152_p3), 0   ;;  %vm238_vm1 = vcmask (!%p152_p3), 64512   ;;  %v4521_v2 = vld [vmem:[%s8908_s1 + $0x10] sm:$0xff] (!%p152_p3) }
   0x7   : > { %155 = sbr.rel (%p152_p3) target bundleno = 977 (0x3d1), region = 32  ;;  %5196 = vmatprep.subr.mxu0 (!%p152_p3), %v6477_v1  ;;  %6321 = vmatprep.subr.mxu1 (!%p152_p3), %v6477_v1  ;;  %v4479_v3 = vld [vmem:[%s8908_s1 + $0x8] sm:$0xff] (!%p152_p3)  ;;  %v4563_v45 = vld [vmem:[%s8908_s1 + $0x18] sm:$0xff] (!%p152_p3)  ;;  %v4605_v46 = vld [vmem:[%s8908_s1 + $0x20] sm:$0xff] (!%p152_p3)  ;;  %vm932_vm2 = vcmask (!%p152_p3), 1046528   ;;  %vm1383_vm3 = vcmask (!%p152_p3), 1045504  }
   0x8   : > { %5197 = vmatpush3.msra.mxu0 (!%p152_p3), %v237_v0  ;;  %6322 = vmatpush3.msra.mxu1 (!%p152_p3), %v237_v0  ;;  %vm2284_vm4 = vcmask (!%p152_p3), 1044480   ;;  %vm2735_vm5 = vcmask (!%p152_p3), 1043456   ;;  %vm3636_vm6 = vcmask (!%p152_p3), 1042432   ;;  %vm4087_vm7 = vcmask (!%p152_p3), 1041408  }
   0x9   : > { %5198 = vmatprep.mubr.msk.f32.mxu0 (!%p152_p3), %vm6478_vm0, %v6477_v1  ;;  %5261 = vmatprep.mubr.msk.f32.mxu1 (!%p152_p3), %vm6478_vm0, %v6477_v1 }
   0xa   : > { %5446 = vmatprep.subr.mxu0 (!%p152_p3), %v6477_v1  ;;  %5321 = vmatprep.subr.mxu1 (!%p152_p3), %v6477_v1 }
   0xe   : > { %s8916_s12 = smov (!%p179_p4, %s6467_s12), 1 }
   0xf   : > { %s6323_s18 = smul.u32 328, %s8916_s12 }
  0x10   : > { %s6324_s11 = smul.u32 288, %s8916_s12 }
  0x11   : > { %s6534_s21 = scalar_lea.vmem %s8907_s0, %s6323_s18 }
  0x12   : > { %v6543_v4 = vld [vmem:[%s6534_s21] sm:$0xff]  ;;  %v6546_v5 = vld [vmem:[%s6534_s21 + $0xa8] sm:$0xff]  ;;  %v6556_v7 = vld [vmem:[%s6534_s21 + $0xb0] sm:$0xff]  ;;  %s8686_s19 = scalar_lea.vmem %s8910_s3, %s6324_s11 }
  0x13   : > { %5199 = vmatmul.mubr.msk.f32.vlgmr.msra.gmra.mrb[0].mxu0 %vm238_vm1, %v6543_v4  ;;  %5262 = vmatmul.mubr.msk.f32.vlgmr.msra.gmra.mrb[0].mxu1 %vm238_vm1, %v6546_v5  ;;  %v6553_v6 = vld [vmem:[%s6534_s21 + $0x8] sm:$0xff]  ;;  %v6573_v8 = vld [vmem:[%s6534_s21 + $0x10] sm:$0xff]  ;;  %v6576_v9 = vld [vmem:[%s6534_s21 + $0xb8] sm:$0xff] }
  0x14   : > { %5447 = vmatpush3.msra.mxu0 %v4521_v2  ;;  %5322 = vmatpush3.msra.mxu1 %v4479_v3  ;;  %v6587_v10 = vld [vmem:[%s6534_s21 + $0x18] sm:$0xff]  ;;  %v6590_v11 = vld [vmem:[%s6534_s21 + $0xc0] sm:$0xff]  ;;  %v6604_v13 = vld [vmem:[%s6534_s21 + $0xc8] sm:$0xff] }
  0x15   : > { %5201 = vmatprep.mubr.msk.f32.mxu0 %vm6478_vm0, %v6477_v1  ;;  %5264 = vmatprep.mubr.msk.f32.mxu1 %vm6478_vm0, %v6477_v1  ;;  %v6601_v12 = vld [vmem:[%s6534_s21 + $0x20] sm:$0xff]  ;;  %v6615_v14 = vld [vmem:[%s6534_s21 + $0x28] sm:$0xff]  ;;  %v6618_v15 = vld [vmem:[%s6534_s21 + $0xd0] sm:$0xff] }
  0x16   : > { %5571 = vmatprep.subr.mxu1 %v6477_v1  ;;  %5696 = vmatprep.subr.mxu0 %v6477_v1  ;;  %v6629_v16 = vld [vmem:[%s6534_s21 + $0x30] sm:$0xff]  ;;  %v6632_v17 = vld [vmem:[%s6534_s21 + $0xd8] sm:$0xff]  ;;  %v6646_v19 = vld [vmem:[%s6534_s21 + $0xe0] sm:$0xff] }
  0x17   : > { %5202 = vmatmul.mubr.msk.f32.gmra.mrb[2].mxu0 %vm238_vm1, %v6553_v6  ;;  %5265 = vmatmul.mubr.msk.f32.gmra.mrb[2].mxu1 %vm238_vm1, %v6556_v7  ;;  %v6643_v18 = vld [vmem:[%s6534_s21 + $0x38] sm:$0xff]  ;;  %v6657_v20 = vld [vmem:[%s6534_s21 + $0x40] sm:$0xff]  ;;  %v6660_v21 = vld [vmem:[%s6534_s21 + $0xe8] sm:$0xff] }
  0x18   : > { %5204 = vmatprep.mubr.msk.f32.mxu0 %vm6478_vm0, %v6477_v1  ;;  %5267 = vmatprep.mubr.msk.f32.mxu1 %vm6478_vm0, %v6477_v1  ;;  %v6671_v22 = vld [vmem:[%s6534_s21 + $0x48] sm:$0xff]  ;;  %v6674_v23 = vld [vmem:[%s6534_s21 + $0xf0] sm:$0xff]  ;;  %v6688_v25 = vld [vmem:[%s6534_s21 + $0xf8] sm:$0xff] }
  0x19   : > { %v6685_v24 = vld [vmem:[%s6534_s21 + $0x50] sm:$0xff]  ;;  %v6699_v26 = vld [vmem:[%s6534_s21 + $0x58] sm:$0xff]  ;;  %v6702_v27 = vld [vmem:[%s6534_s21 + $0x100] sm:$0xff] }
  0x1a   : > { %v6713_v28 = vld [vmem:[%s6534_s21 + $0x60] sm:$0xff]  ;;  %v6716_v29 = vld [vmem:[%s6534_s21 + $0x108] sm:$0xff]  ;;  %v6730_v31 = vld [vmem:[%s6534_s21 + $0x110] sm:$0xff] }
  0x1b   : > { %5205 = vmatmul.mubr.msk.f32.gmra.mrb[4].mxu0 %vm238_vm1, %v6573_v8  ;;  %5268 = vmatmul.mubr.msk.f32.gmra.mrb[4].mxu1 %vm238_vm1, %v6576_v9  ;;  %v6727_v30 = vld [vmem:[%s6534_s21 + $0x68] sm:$0xff]  ;;  %v6741_v32 = vld [vmem:[%s6534_s21 + $0x70] sm:$0xff]  ;;  %v6744_v33 = vld [vmem:[%s6534_s21 + $0x118] sm:$0xff] }
  0x1c   : > { %5207 = vmatprep.mubr.msk.f32.mxu0 %vm6478_vm0, %v6477_v1  ;;  %5270 = vmatprep.mubr.msk.f32.mxu1 %vm6478_vm0, %v6477_v1  ;;  %v6755_v34 = vld [vmem:[%s6534_s21 + $0x78] sm:$0xff]  ;;  %v6758_v35 = vld [vmem:[%s6534_s21 + $0x120] sm:$0xff]  ;;  %v6772_v37 = vld [vmem:[%s6534_s21 + $0x128] sm:$0xff] }
  0x1d   : > { %v6769_v36 = vld [vmem:[%s6534_s21 + $0x80] sm:$0xff]  ;;  %v6783_v38 = vld [vmem:[%s6534_s21 + $0x88] sm:$0xff]  ;;  %v6786_v39 = vld [vmem:[%s6534_s21 + $0x130] sm:$0xff] }
  0x1e   : > { %v6797_v40 = vld [vmem:[%s6534_s21 + $0x90] sm:$0xff]  ;;  %v6800_v41 = vld [vmem:[%s6534_s21 + $0x138] sm:$0xff]  ;;  %v6814_v43 = vld [vmem:[%s6534_s21 + $0x140] sm:$0x3f] }
  0x1f   : > { %5208 = vmatmul.mubr.msk.f32.gmra.mrb[6].mxu0 %vm238_vm1, %v6587_v10  ;;  %5271 = vmatmul.mubr.msk.f32.gmra.mrb[6].mxu1 %vm238_vm1, %v6590_v11  ;;  %v6811_v42 = vld [vmem:[%s6534_s21 + $0x98] sm:$0xff]  ;;  %v6825_v44 = vld [vmem:[%s6534_s21 + $0xa0] sm:$0xff] }
  0x20   : > { %5210 = vmatprep.mubr.msk.f32.mxu0 %vm6478_vm0, %v6477_v1  ;;  %5273 = vmatprep.mubr.msk.f32.mxu1 %vm6478_vm0, %v6477_v1 }
  0x23   : > { %5211 = vmatmul.mubr.msk.f32.gmra.mrb[8].mxu0 %vm238_vm1, %v6601_v12  ;;  %5274 = vmatmul.mubr.msk.f32.gmra.mrb[8].mxu1 %vm238_vm1, %v6604_v13 }
  0x24   : > { %5213 = vmatprep.mubr.msk.f32.mxu0 %vm6478_vm0, %v6477_v1  ;;  %5276 = vmatprep.mubr.msk.f32.mxu1 %vm6478_vm0, %v6477_v1 }
  0x27   : > { %5214 = vmatmul.mubr.msk.f32.gmra.mrb[10].mxu0 %vm238_vm1, %v6615_v14  ;;  %5277 = vmatmul.mubr.msk.f32.gmra.mrb[10].mxu1 %vm238_vm1, %v6618_v15 }
  0x28   : > { %5216 = vmatprep.mubr.msk.f32.mxu0 %vm6478_vm0, %v6477_v1  ;;  %5279 = vmatprep.mubr.msk.f32.mxu1 %vm6478_vm0, %v6477_v1 }
  0x2b   : > { %5217 = vmatmul.mubr.msk.f32.gmra.mrb[12].mxu0 %vm238_vm1, %v6629_v16  ;;  %5280 = vmatmul.mubr.msk.f32.gmra.mrb[12].mxu1 %vm238_vm1, %v6632_v17 }
  0x2c   : > { %5219 = vmatprep.mubr.msk.f32.mxu0 %vm6478_vm0, %v6477_v1  ;;  %5282 = vmatprep.mubr.msk.f32.mxu1 %vm6478_vm0, %v6477_v1 }
  0x2f   : > { %5220 = vmatmul.mubr.msk.f32.gmra.mrb[14].mxu0 %vm238_vm1, %v6643_v18  ;;  %5283 = vmatmul.mubr.msk.f32.gmra.mrb[14].mxu1 %vm238_vm1, %v6646_v19 }
  0x30   : > { %5222 = vmatprep.mubr.msk.f32.mxu0 %vm6478_vm0, %v6477_v1  ;;  %5285 = vmatprep.mubr.msk.f32.mxu1 %vm6478_vm0, %v6477_v1 }
  0x33   : > { %5223 = vmatmul.mubr.msk.f32.gmra.mrb[16].mxu0 %vm238_vm1, %v6657_v20  ;;  %5286 = vmatmul.mubr.msk.f32.gmra.mrb[16].mxu1 %vm238_vm1, %v6660_v21 }
  0x34   : > { %5225 = vmatprep.mubr.msk.f32.mxu0 %vm6478_vm0, %v6477_v1  ;;  %5288 = vmatprep.mubr.msk.f32.mxu1 %vm6478_vm0, %v6477_v1 }
  0x37   : > { %5226 = vmatmul.mubr.msk.f32.gmra.mrb[18].mxu0 %vm238_vm1, %v6671_v22  ;;  %5289 = vmatmul.mubr.msk.f32.gmra.mrb[18].mxu1 %vm238_vm1, %v6674_v23 }
  0x38   : > { %5228 = vmatprep.mubr.msk.f32.mxu0 %vm6478_vm0, %v6477_v1  ;;  %5291 = vmatprep.mubr.msk.f32.mxu1 %vm6478_vm0, %v6477_v1 }
  0x3b   : > { %5229 = vmatmul.mubr.msk.f32.gmra.mrb[20].mxu0 %vm238_vm1, %v6685_v24  ;;  %5292 = vmatmul.mubr.msk.f32.gmra.mrb[20].mxu1 %vm238_vm1, %v6688_v25 }
  0x3c   : > { %5231 = vmatprep.mubr.msk.f32.mxu0 %vm6478_vm0, %v6477_v1  ;;  %5294 = vmatprep.mubr.msk.f32.mxu1 %vm6478_vm0, %v6477_v1 }
  0x3f   : > { %5232 = vmatmul.mubr.msk.f32.gmra.mrb[22].mxu0 %vm238_vm1, %v6699_v26  ;;  %5295 = vmatmul.mubr.msk.f32.gmra.mrb[22].mxu1 %vm238_vm1, %v6702_v27 }
  0x40   : > { %5234 = vmatprep.mubr.msk.f32.mxu0 %vm6478_vm0, %v6477_v1  ;;  %5297 = vmatprep.mubr.msk.f32.mxu1 %vm6478_vm0, %v6477_v1 }
  0x43   : > { %5235 = vmatmul.mubr.msk.f32.gmra.mrb[24].mxu0 %vm238_vm1, %v6713_v28  ;;  %5298 = vmatmul.mubr.msk.f32.gmra.mrb[24].mxu1 %vm238_vm1, %v6716_v29 }
  0x44   : > { %5237 = vmatprep.mubr.msk.f32.mxu0 %vm6478_vm0, %v6477_v1  ;;  %5300 = vmatprep.mubr.msk.f32.mxu1 %vm6478_vm0, %v6477_v1 }
  0x47   : > { %5238 = vmatmul.mubr.msk.f32.gmra.mrb[26].mxu0 %vm238_vm1, %v6727_v30  ;;  %5301 = vmatmul.mubr.msk.f32.gmra.mrb[26].mxu1 %vm238_vm1, %v6730_v31 }
  0x48   : > { %5240 = vmatprep.mubr.msk.f32.mxu0 %vm6478_vm0, %v6477_v1  ;;  %5303 = vmatprep.mubr.msk.f32.mxu1 %vm6478_vm0, %v6477_v1 }
  0x4b   : > { %5241 = vmatmul.mubr.msk.f32.gmra.mrb[28].mxu0 %vm238_vm1, %v6741_v32  ;;  %5304 = vmatmul.mubr.msk.f32.gmra.mrb[28].mxu1 %vm238_vm1, %v6744_v33 }
  0x4c   : > { %5243 = vmatprep.mubr.msk.f32.mxu0 %vm6478_vm0, %v6477_v1  ;;  %5306 = vmatprep.mubr.msk.f32.mxu1 %vm6478_vm0, %v6477_v1 }
  0x4f   : > { %5244 = vmatmul.mubr.msk.f32.gmra.mrb[30].mxu0 %vm238_vm1, %v6755_v34  ;;  %5307 = vmatmul.mubr.msk.f32.gmra.mrb[30].mxu1 %vm238_vm1, %v6758_v35 }
  0x50   : > { %5246 = vmatprep.mubr.msk.f32.mxu0 %vm6478_vm0, %v6477_v1  ;;  %5309 = vmatprep.mubr.msk.f32.mxu1 %vm6478_vm0, %v6477_v1 }
  0x53   : > { %5247 = vmatmul.mubr.msk.f32.gmra.mrb[32].mxu0 %vm238_vm1, %v6769_v36  ;;  %5310 = vmatmul.mubr.msk.f32.gmra.mrb[32].mxu1 %vm238_vm1, %v6772_v37 }
  0x54   : > { %5249 = vmatprep.mubr.msk.f32.mxu0 %vm6478_vm0, %v6477_v1  ;;  %5312 = vmatprep.mubr.msk.f32.mxu1 %vm6478_vm0, %v6477_v1 }
  0x57   : > { %5250 = vmatmul.mubr.msk.f32.gmra.mrb[34].mxu0 %vm238_vm1, %v6783_v38  ;;  %5313 = vmatmul.mubr.msk.f32.gmra.mrb[34].mxu1 %vm238_vm1, %v6786_v39 }
  0x58   : > { %5252 = vmatprep.mubr.msk.f32.mxu0 %vm6478_vm0, %v6477_v1  ;;  %5315 = vmatprep.mubr.msk.f32.mxu1 %vm6478_vm0, %v6477_v1 }
  0x5b   : > { %5253 = vmatmul.mubr.msk.f32.gmra.mrb[36].mxu0 %vm238_vm1, %v6797_v40  ;;  %5316 = vmatmul.mubr.msk.f32.gmra.mrb[36].mxu1 %vm238_vm1, %v6800_v41 }
  0x5c   : > { %5255 = vmatprep.mubr.msk.f32.mxu0 %vm6478_vm0, %v6477_v1  ;;  %5318 = vmatprep.mubr.msk.f32.mxu1 %vm6478_vm0, %v6477_v1 }
  0x5f   : > { %5256 = vmatmul.mubr.msk.f32.gmra.mrb[38].mxu0 %vm238_vm1, %v6811_v42  ;;  %5319 = vmatmul.mubr.msk.f32.gmra.mrb[38].mxu1 %vm238_vm1, %v6814_v43 }
  0x60   : > { %5258 = vmatprep.mubr.msk.f32.mxu0 %vm6478_vm0, %v6477_v1  ;;  %5323 = vmatprep.mubr.msk.f32.mxu1 %vm6478_vm0, %v6477_v1 }
  0x63   : > { %5259 = vmatmul.mubr.msk.f32.gmra.mrb[40].mxu0 %vm238_vm1, %v6825_v44  ;;  %5324 = vmatmul.mubr.msk.f32.vlgmr.msra.gmra.mrb[40].mxu1 %vm238_vm1, %v6543_v4 }
  0x64   : > { %5572 = vmatpush3.msra.mxu1 %v4563_v45  ;;  %5326 = vmatprep.mubr.msk.f32.mxu1 %vm6478_vm0, %v6477_v1 }
  0x65   : > { %5448 = vmatprep.mubr.msk.f32.mxu0 %vm6478_vm0, %v6477_v1  ;;  %5821 = vmatprep.subr.mxu1 %v6477_v1 }
  0x67   : > { %5327 = vmatmul.mubr.msk.f32.gmra.mrb[42].mxu1 %vm238_vm1, %v6553_v6  ;;  %5449 = vmatmul.mubr.msk.f32.vlgmr.msra.gmra.mrb[42].mxu0 %vm238_vm1, %v6543_v4 }
  0x68   : > { %5697 = vmatpush3.msra.mxu0 %v4605_v46  ;;  %5329 = vmatprep.mubr.msk.f32.mxu1 %vm6478_vm0, %v6477_v1 }
  0x69   : > { %5451 = vmatprep.mubr.msk.f32.mxu0 %vm6478_vm0, %v6477_v1  ;;  %5946 = vmatprep.subr.mxu0 %v6477_v1 }
  0x6b   : > { %5330 = vmatmul.mubr.msk.f32.gmra.mrb[44].mxu1 %vm238_vm1, %v6573_v8  ;;  %5452 = vmatmul.mubr.msk.f32.gmra.mrb[44].mxu0 %vm238_vm1, %v6553_v6 }
  0x6c   : > { %5332 = vmatprep.mubr.msk.f32.mxu1 %vm6478_vm0, %v6477_v1  ;;  %5454 = vmatprep.mubr.msk.f32.mxu0 %vm6478_vm0, %v6477_v1 }
  0x6f   : > { %5333 = vmatmul.mubr.msk.f32.gmra.mrb[46].mxu1 %vm238_vm1, %v6587_v10  ;;  %5455 = vmatmul.mubr.msk.f32.gmra.mrb[46].mxu0 %vm238_vm1, %v6573_v8 }
  0x70   : > { %5335 = vmatprep.mubr.msk.f32.mxu1 %vm6478_vm0, %v6477_v1  ;;  %5457 = vmatprep.mubr.msk.f32.mxu0 %vm6478_vm0, %v6477_v1 }
  0x73   : > { %5336 = vmatmul.mubr.msk.f32.gmra.mrb[48].mxu1 %vm238_vm1, %v6601_v12  ;;  %5458 = vmatmul.mubr.msk.f32.gmra.mrb[48].mxu0 %vm238_vm1, %v6587_v10 }
  0x74   : > { %5338 = vmatprep.mubr.msk.f32.mxu1 %vm6478_vm0, %v6477_v1  ;;  %5460 = vmatprep.mubr.msk.f32.mxu0 %vm6478_vm0, %v6477_v1 }
  0x77   : > { %5339 = vmatmul.mubr.msk.f32.gmra.mrb[50].mxu1 %vm238_vm1, %v6615_v14  ;;  %5461 = vmatmul.mubr.msk.f32.gmra.mrb[50].mxu0 %vm238_vm1, %v6601_v12 }
  0x78   : > { %5341 = vmatprep.mubr.msk.f32.mxu1 %vm6478_vm0, %v6477_v1  ;;  %5463 = vmatprep.mubr.msk.f32.mxu0 %vm6478_vm0, %v6477_v1 }
  0x7b   : > { %5342 = vmatmul.mubr.msk.f32.gmra.mrb[52].mxu1 %vm238_vm1, %v6629_v16  ;;  %5464 = vmatmul.mubr.msk.f32.gmra.mrb[52].mxu0 %vm238_vm1, %v6615_v14 }
  0x7c   : > { %5344 = vmatprep.mubr.msk.f32.mxu1 %vm6478_vm0, %v6477_v1  ;;  %5466 = vmatprep.mubr.msk.f32.mxu0 %vm6478_vm0, %v6477_v1 }
  0x7f   : > { %5345 = vmatmul.mubr.msk.f32.gmra.mrb[54].mxu1 %vm238_vm1, %v6643_v18  ;;  %5467 = vmatmul.mubr.msk.f32.gmra.mrb[54].mxu0 %vm238_vm1, %v6629_v16 }
  0x80   : > { %5347 = vmatprep.mubr.msk.f32.mxu1 %vm6478_vm0, %v6477_v1  ;;  %5469 = vmatprep.mubr.msk.f32.mxu0 %vm6478_vm0, %v6477_v1 }
  0x83   : > { %5348 = vmatmul.mubr.msk.f32.gmra.mrb[56].mxu1 %vm238_vm1, %v6657_v20  ;;  %5470 = vmatmul.mubr.msk.f32.gmra.mrb[56].mxu0 %vm238_vm1, %v6643_v18 }
  0x84   : > { %5350 = vmatprep.mubr.msk.f32.mxu1 %vm6478_vm0, %v6477_v1  ;;  %5472 = vmatprep.mubr.msk.f32.mxu0 %vm6478_vm0, %v6477_v1 }
  0x87   : > { %5351 = vmatmul.mubr.msk.f32.gmra.mrb[58].mxu1 %vm238_vm1, %v6671_v22  ;;  %5473 = vmatmul.mubr.msk.f32.gmra.mrb[58].mxu0 %vm238_vm1, %v6657_v20 }
  0x88   : > { %5353 = vmatprep.mubr.msk.f32.mxu1 %vm6478_vm0, %v6477_v1  ;;  %5475 = vmatprep.mubr.msk.f32.mxu0 %vm6478_vm0, %v6477_v1 }
  0x8b   : > { %5354 = vmatmul.mubr.msk.f32.gmra.mrb[60].mxu1 %vm238_vm1, %v6685_v24  ;;  %5476 = vmatmul.mubr.msk.f32.gmra.mrb[60].mxu0 %vm238_vm1, %v6671_v22 }
  0x8c   : > { %5356 = vmatprep.mubr.msk.f32.mxu1 %vm6478_vm0, %v6477_v1  ;;  %5478 = vmatprep.mubr.msk.f32.mxu0 %vm6478_vm0, %v6477_v1 }
  0x8f   : > { %5357 = vmatmul.mubr.msk.f32.gmra.mrb[62].mxu1 %vm238_vm1, %v6699_v26  ;;  %5479 = vmatmul.mubr.msk.f32.gmra.mrb[62].mxu0 %vm238_vm1, %v6685_v24 }
  0x90   : > { %5359 = vmatprep.mubr.msk.f32.mxu1 %vm6478_vm0, %v6477_v1  ;;  %5481 = vmatprep.mubr.msk.f32.mxu0 %vm6478_vm0, %v6477_v1 }
  0x93   : > { %5360 = vmatmul.mubr.msk.f32.gmra.mrb[64].mxu1 %vm238_vm1, %v6713_v28  ;;  %5482 = vmatmul.mubr.msk.f32.gmra.mrb[64].mxu0 %vm238_vm1, %v6699_v26 }
  0x94   : > { %5362 = vmatprep.mubr.msk.f32.mxu1 %vm6478_vm0, %v6477_v1  ;;  %5484 = vmatprep.mubr.msk.f32.mxu0 %vm6478_vm0, %v6477_v1 }
  0x97   : > { %5363 = vmatmul.mubr.msk.f32.gmra.mrb[66].mxu1 %vm238_vm1, %v6727_v30  ;;  %5485 = vmatmul.mubr.msk.f32.gmra.mrb[66].mxu0 %vm238_vm1, %v6713_v28 }
  0x98   : > { %5365 = vmatprep.mubr.msk.f32.mxu1 %vm6478_vm0, %v6477_v1  ;;  %5487 = vmatprep.mubr.msk.f32.mxu0 %vm6478_vm0, %v6477_v1 }
  0x9b   : > { %5366 = vmatmul.mubr.msk.f32.gmra.mrb[68].mxu1 %vm238_vm1, %v6741_v32  ;;  %5488 = vmatmul.mubr.msk.f32.gmra.mrb[68].mxu0 %vm238_vm1, %v6727_v30 }
  0x9c   : > { %5368 = vmatprep.mubr.msk.f32.mxu1 %vm6478_vm0, %v6477_v1  ;;  %5490 = vmatprep.mubr.msk.f32.mxu0 %vm6478_vm0, %v6477_v1 }
  0x9f   : > { %5369 = vmatmul.mubr.msk.f32.gmra.mrb[70].mxu1 %vm238_vm1, %v6755_v34  ;;  %5491 = vmatmul.mubr.msk.f32.gmra.mrb[70].mxu0 %vm238_vm1, %v6741_v32 }
  0xa0   : > { %5371 = vmatprep.mubr.msk.f32.mxu1 %vm6478_vm0, %v6477_v1  ;;  %5493 = vmatprep.mubr.msk.f32.mxu0 %vm6478_vm0, %v6477_v1 }
  0xa3   : > { %5372 = vmatmul.mubr.msk.f32.gmra.mrb[72].mxu1 %vm238_vm1, %v6769_v36  ;;  %5494 = vmatmul.mubr.msk.f32.gmra.mrb[72].mxu0 %vm238_vm1, %v6755_v34 }
  0xa4   : > { %5374 = vmatprep.mubr.msk.f32.mxu1 %vm6478_vm0, %v6477_v1  ;;  %5496 = vmatprep.mubr.msk.f32.mxu0 %vm6478_vm0, %v6477_v1 }
  0xa7   : > { %5375 = vmatmul.mubr.msk.f32.gmra.mrb[74].mxu1 %vm238_vm1, %v6783_v38  ;;  %5497 = vmatmul.mubr.msk.f32.gmra.mrb[74].mxu0 %vm238_vm1, %v6769_v36 }
  0xa8   : > { %5377 = vmatprep.mubr.msk.f32.mxu1 %vm6478_vm0, %v6477_v1  ;;  %5499 = vmatprep.mubr.msk.f32.mxu0 %vm6478_vm0, %v6477_v1 }
  0xab   : > { %5378 = vmatmul.mubr.msk.f32.gmra.mrb[76].mxu1 %vm238_vm1, %v6797_v40  ;;  %5500 = vmatmul.mubr.msk.f32.gmra.mrb[76].mxu0 %vm238_vm1, %v6783_v38 }
  0xac   : > { %5380 = vmatprep.mubr.msk.f32.mxu1 %vm6478_vm0, %v6477_v1  ;;  %5502 = vmatprep.mubr.msk.f32.mxu0 %vm6478_vm0, %v6477_v1 }
  0xaf   : > { %5381 = vmatmul.mubr.msk.f32.gmra.mrb[78].mxu1 %vm238_vm1, %v6811_v42  ;;  %5503 = vmatmul.mubr.msk.f32.gmra.mrb[78].mxu0 %vm238_vm1, %v6797_v40 }
  0xb0   : > { %5383 = vmatprep.mubr.msk.f32.mxu1 %vm6478_vm0, %v6477_v1  ;;  %5505 = vmatprep.mubr.msk.f32.mxu0 %vm6478_vm0, %v6477_v1 }
  0xb3   : > { %5384 = vmatmul.mubr.msk.f32.gmra.mrb[80].mxu1 %vm238_vm1, %v6825_v44  ;;  %5506 = vmatmul.mubr.msk.f32.gmra.mrb[80].mxu0 %vm238_vm1, %v6811_v42 }
  0xb4   : > { %5386 = vmatprep.mubr.msk.f32.mxu1 %vm6478_vm0, %v6477_v1  ;;  %5508 = vmatprep.mubr.msk.f32.mxu0 %vm6478_vm0, %v6477_v1 }
  0xb7   : > { %5387 = vmatmul.mubr.msk.f32.gmra.mrb[82].mxu1 %vm238_vm1, %v6546_v5  ;;  %5509 = vmatmul.mubr.msk.f32.gmra.mrb[82].mxu0 %vm238_vm1, %v6825_v44 }
  0xb8   : > { %5389 = vmatprep.mubr.msk.f32.mxu1 %vm6478_vm0, %v6477_v1  ;;  %5511 = vmatprep.mubr.msk.f32.mxu0 %vm6478_vm0, %v6477_v1 }
  0xbb   : > { %5390 = vmatmul.mubr.msk.f32.gmra.mrb[84].mxu1 %vm238_vm1, %v6556_v7  ;;  %5512 = vmatmul.mubr.msk.f32.gmra.mrb[84].mxu0 %vm238_vm1, %v6546_v5 }
  0xbc   : > { %5392 = vmatprep.mubr.msk.f32.mxu1 %vm6478_vm0, %v6477_v1  ;;  %5514 = vmatprep.mubr.msk.f32.mxu0 %vm6478_vm0, %v6477_v1 }
  0xbf   : > { %5393 = vmatmul.mubr.msk.f32.gmra.mrb[86].mxu1 %vm238_vm1, %v6576_v9  ;;  %5515 = vmatmul.mubr.msk.f32.gmra.mrb[86].mxu0 %vm238_vm1, %v6556_v7 }
  0xc0   : > { %5395 = vmatprep.mubr.msk.f32.mxu1 %vm6478_vm0, %v6477_v1  ;;  %5517 = vmatprep.mubr.msk.f32.mxu0 %vm6478_vm0, %v6477_v1 }
  0xc3   : > { %5396 = vmatmul.mubr.msk.f32.gmra.mrb[88].mxu1 %vm238_vm1, %v6590_v11  ;;  %5518 = vmatmul.mubr.msk.f32.gmra.mrb[88].mxu0 %vm238_vm1, %v6576_v9 }
  0xc4   : > { %5398 = vmatprep.mubr.msk.f32.mxu1 %vm6478_vm0, %v6477_v1  ;;  %5520 = vmatprep.mubr.msk.f32.mxu0 %vm6478_vm0, %v6477_v1 }
  0xc7   : > { %5399 = vmatmul.mubr.msk.f32.gmra.mrb[90].mxu1 %vm238_vm1, %v6604_v13  ;;  %5521 = vmatmul.mubr.msk.f32.gmra.mrb[90].mxu0 %vm238_vm1, %v6590_v11 }
  0xc8   : > { %5401 = vmatprep.mubr.msk.f32.mxu1 %vm6478_vm0, %v6477_v1  ;;  %5523 = vmatprep.mubr.msk.f32.mxu0 %vm6478_vm0, %v6477_v1 }
  0xcb   : > { %5402 = vmatmul.mubr.msk.f32.gmra.mrb[92].mxu1 %vm238_vm1, %v6618_v15  ;;  %5524 = vmatmul.mubr.msk.f32.gmra.mrb[92].mxu0 %vm238_vm1, %v6604_v13 }
  0xcc   : > { %5404 = vmatprep.mubr.msk.f32.mxu1 %vm6478_vm0, %v6477_v1  ;;  %5526 = vmatprep.mubr.msk.f32.mxu0 %vm6478_vm0, %v6477_v1 }
  0xcf   : > { %5405 = vmatmul.mubr.msk.f32.gmra.mrb[94].mxu1 %vm238_vm1, %v6632_v17  ;;  %5527 = vmatmul.mubr.msk.f32.gmra.mrb[94].mxu0 %vm238_vm1, %v6618_v15 }
  0xd0   : > { %5407 = vmatprep.mubr.msk.f32.mxu1 %vm6478_vm0, %v6477_v1  ;;  %5529 = vmatprep.mubr.msk.f32.mxu0 %vm6478_vm0, %v6477_v1 }
  0xd3   : > { %5408 = vmatmul.mubr.msk.f32.gmra.mrb[96].mxu1 %vm238_vm1, %v6646_v19  ;;  %5530 = vmatmul.mubr.msk.f32.gmra.mrb[96].mxu0 %vm238_vm1, %v6632_v17 }
  0xd4   : > { %5410 = vmatprep.mubr.msk.f32.mxu1 %vm6478_vm0, %v6477_v1  ;;  %5532 = vmatprep.mubr.msk.f32.mxu0 %vm6478_vm0, %v6477_v1 }
  0xd7   : > { %5411 = vmatmul.mubr.msk.f32.gmra.mrb[98].mxu1 %vm238_vm1, %v6660_v21  ;;  %5533 = vmatmul.mubr.msk.f32.gmra.mrb[98].mxu0 %vm238_vm1, %v6646_v19 }
  0xd8   : > { %5413 = vmatprep.mubr.msk.f32.mxu1 %vm6478_vm0, %v6477_v1  ;;  %5535 = vmatprep.mubr.msk.f32.mxu0 %vm6478_vm0, %v6477_v1 }
  0xdb   : > { %5414 = vmatmul.mubr.msk.f32.gmra.mrb[100].mxu1 %vm238_vm1, %v6674_v23  ;;  %5536 = vmatmul.mubr.msk.f32.gmra.mrb[100].mxu0 %vm238_vm1, %v6660_v21 }
  0xdc   : > { %5416 = vmatprep.mubr.msk.f32.mxu1 %vm6478_vm0, %v6477_v1  ;;  %5538 = vmatprep.mubr.msk.f32.mxu0 %vm6478_vm0, %v6477_v1 }
  0xdf   : > { %5417 = vmatmul.mubr.msk.f32.gmra.mrb[102].mxu1 %vm238_vm1, %v6688_v25  ;;  %5539 = vmatmul.mubr.msk.f32.gmra.mrb[102].mxu0 %vm238_vm1, %v6674_v23 }
  0xe0   : > { %5419 = vmatprep.mubr.msk.f32.mxu1 %vm6478_vm0, %v6477_v1  ;;  %5541 = vmatprep.mubr.msk.f32.mxu0 %vm6478_vm0, %v6477_v1 }
  0xe3   : > { %5420 = vmatmul.mubr.msk.f32.gmra.mrb[104].mxu1 %vm238_vm1, %v6702_v27  ;;  %5542 = vmatmul.mubr.msk.f32.gmra.mrb[104].mxu0 %vm238_vm1, %v6688_v25 }
  0xe4   : > { %5422 = vmatprep.mubr.msk.f32.mxu1 %vm6478_vm0, %v6477_v1  ;;  %5544 = vmatprep.mubr.msk.f32.mxu0 %vm6478_vm0, %v6477_v1 }
  0xe6   : > { %v7099_v47 = vpop.f32.mrb[0].mxu0  ;;  %v7101_v48 = vpop.f32.mrb[0].mxu1 }
  0xe7   : > { %v5200_v49 = vpop.f32.mrb[1].mxu0  ;;  %5423 = vmatmul.mubr.msk.f32.gmra.mrb[106].mxu1 %vm238_vm1, %v6716_v29  ;;  %5545 = vmatmul.mubr.msk.f32.gmra.mrb[106].mxu0 %vm238_vm1, %v6702_v27  ;;  %v5263_v50 = vpop.f32.mrb[1].mxu1 }
  0xe8   : > { %5425 = vmatprep.mubr.msk.f32.mxu1 %vm6478_vm0, %v6477_v1  ;;  %5547 = vmatprep.mubr.msk.f32.mxu0 %vm6478_vm0, %v6477_v1 }
  0xea   : > { %v7111_v51 = vpop.f32.mrb[2].mxu0  ;;  %v7113_v52 = vpop.f32.mrb[2].mxu1 }
  0xeb   : > { %v5203_v53 = vpop.f32.mrb[3].mxu0  ;;  %5426 = vmatmul.mubr.msk.f32.gmra.mrb[108].mxu1 %vm238_vm1, %v6730_v31  ;;  %5548 = vmatmul.mubr.msk.f32.gmra.mrb[108].mxu0 %vm238_vm1, %v6716_v29  ;;  %v5266_v54 = vpop.f32.mrb[3].mxu1  ;;  %v4647_v29 = vld [vmem:[%s8908_s1 + $0x28] sm:$0xff] }
  0xec   : > { %5428 = vmatprep.mubr.msk.f32.mxu1 %vm6478_vm0, %v6477_v1  ;;  %5550 = vmatprep.mubr.msk.f32.mxu0 %vm6478_vm0, %v6477_v1 }
  0xee   : > { %v7123_v55 = vpop.f32.mrb[4].mxu0  ;;  %v7125_v56 = vpop.f32.mrb[4].mxu1 }
  0xef   : > { %v5206_v57 = vpop.f32.mrb[5].mxu0  ;;  %5429 = vmatmul.mubr.msk.f32.gmra.mrb[110].mxu1 %vm238_vm1, %v6744_v33  ;;  %5551 = vmatmul.mubr.msk.f32.gmra.mrb[110].mxu0 %vm238_vm1, %v6730_v31  ;;  %v5269_v58 = vpop.f32.mrb[5].mxu1 }
  0xf0   : > { %5431 = vmatprep.mubr.msk.f32.mxu1 %vm6478_vm0, %v6477_v1  ;;  %5553 = vmatprep.mubr.msk.f32.mxu0 %vm6478_vm0, %v6477_v1 }
  0xf2   : > { %v7135_v59 = vpop.f32.mrb[6].mxu0  ;;  %v7137_v60 = vpop.f32.mrb[6].mxu1 }
  0xf3   : > { %v5209_v61 = vpop.f32.mrb[7].mxu0  ;;  %5432 = vmatmul.mubr.msk.f32.gmra.mrb[112].mxu1 %vm238_vm1, %v6758_v35  ;;  %5554 = vmatmul.mubr.msk.f32.gmra.mrb[112].mxu0 %vm238_vm1, %v6744_v33  ;;  %v5272_v62 = vpop.f32.mrb[7].mxu1 }
  0xf4   : > { %5434 = vmatprep.mubr.msk.f32.mxu1 %vm6478_vm0, %v6477_v1  ;;  %5556 = vmatprep.mubr.msk.f32.mxu0 %vm6478_vm0, %v6477_v1 }
  0xf6   : > { %v7147_v63 = vpop.f32.mrb[8].mxu0  ;;  %v7149_v0 = vpop.f32.mrb[8].mxu1 }
  0xf7   : > { %v5212_v2 = vpop.f32.mrb[9].mxu0  ;;  %5435 = vmatmul.mubr.msk.f32.gmra.mrb[114].mxu1 %vm238_vm1, %v6772_v37  ;;  %5557 = vmatmul.mubr.msk.f32.gmra.mrb[114].mxu0 %vm238_vm1, %v6758_v35  ;;  %v5275_v3 = vpop.f32.mrb[9].mxu1 }
  0xf8   : > { %5437 = vmatprep.mubr.msk.f32.mxu1 %vm6478_vm0, %v6477_v1  ;;  %5559 = vmatprep.mubr.msk.f32.mxu0 %vm6478_vm0, %v6477_v1 }
  0xfa   : > { %v7159_v5 = vpop.f32.mrb[10].mxu0  ;;  %v7161_v7 = vpop.f32.mrb[10].mxu1 }
  0xfb   : > { %v5215_v9 = vpop.f32.mrb[11].mxu0  ;;  %5438 = vmatmul.mubr.msk.f32.gmra.mrb[116].mxu1 %vm238_vm1, %v6786_v39  ;;  %5560 = vmatmul.mubr.msk.f32.gmra.mrb[116].mxu0 %vm238_vm1, %v6772_v37  ;;  %v5278_v11 = vpop.f32.mrb[11].mxu1 }
  0xfc   : > { %5440 = vmatprep.mubr.msk.f32.mxu1 %vm6478_vm0, %v6477_v1  ;;  %5562 = vmatprep.mubr.msk.f32.mxu0 %vm6478_vm0, %v6477_v1 }
  0xfe   : > { %v7171_v13 = vpop.f32.mrb[12].mxu0  ;;  %v7173_v15 = vpop.f32.mrb[12].mxu1 }
  0xff   : > { %v5218_v17 = vpop.f32.mrb[13].mxu0  ;;  %5441 = vmatmul.mubr.msk.f32.gmra.mrb[118].mxu1 %vm238_vm1, %v6800_v41  ;;  %5563 = vmatmul.mubr.msk.f32.gmra.mrb[118].mxu0 %vm238_vm1, %v6786_v39  ;;  %v5281_v19 = vpop.f32.mrb[13].mxu1  ;;  %v4689_v39 = vld [vmem:[%s8908_s1 + $0x30] sm:$0xff] }
 0x100   : > { %5443 = vmatprep.mubr.msk.f32.mxu1 %vm6478_vm0, %v6477_v1  ;;  %5565 = vmatprep.mubr.msk.f32.mxu0 %vm6478_vm0, %v6477_v1 }
 0x102   : > { %v7183_v21 = vpop.f32.mrb[14].mxu0  ;;  %v7185_v23 = vpop.f32.mrb[14].mxu1 }
 0x103   : > { %v5221_v25 = vpop.f32.mrb[15].mxu0  ;;  %5444 = vmatmul.mubr.msk.f32.gmra.mrb[120].mxu1 %vm238_vm1, %v6814_v43  ;;  %5566 = vmatmul.mubr.msk.f32.gmra.mrb[120].mxu0 %vm238_vm1, %v6800_v41  ;;  %v5284_v27 = vpop.f32.mrb[15].mxu1 }
 0x104   : > { %5568 = vmatprep.mubr.msk.f32.mxu0 %vm6478_vm0, %v6477_v1  ;;  %5573 = vmatprep.mubr.msk.f32.mxu1 %vm6478_vm0, %v6477_v1 }
 0x106   : > { %v7198_v31 = vpop.f32.mrb[16].mxu0  ;;  %v7200_v33 = vpop.f32.mrb[16].mxu1 }
 0x107   : > { %v5224_v35 = vpop.f32.mrb[17].mxu0  ;;  %5569 = vmatmul.mubr.msk.f32.gmra.mrb[122].mxu0 %vm238_vm1, %v6814_v43  ;;  %5574 = vmatmul.mubr.msk.f32.vlgmr.msra.gmra.mrb[122].mxu1 %vm238_vm1, %v6543_v4  ;;  %v5287_v37 = vpop.f32.mrb[17].mxu1 }
 0x108   : > { %5822 = vmatpush3.msra.mxu1 %v4647_v29  ;;  %5576 = vmatprep.mubr.msk.f32.mxu1 %vm6478_vm0, %v6477_v1 }
 0x109   : > { %5698 = vmatprep.mubr.msk.f32.mxu0 %vm6478_vm0, %v6477_v1  ;;  %6071 = vmatprep.subr.mxu1 %v6477_v1 }
 0x10a   : > { %v7214_v41 = vpop.f32.mrb[18].mxu0  ;;  %v7216_v43 = vpop.f32.mrb[18].mxu1 }
 0x10b   : > { %v5227_v45 = vpop.f32.mrb[19].mxu0  ;;  %5577 = vmatmul.mubr.msk.f32.gmra.mrb[124].mxu1 %vm238_vm1, %v6553_v6  ;;  %5699 = vmatmul.mubr.msk.f32.vlgmr.msra.gmra.mrb[124].mxu0 %vm238_vm1, %v6543_v4  ;;  %v5290_v46 = vpop.f32.mrb[19].mxu1 }
 0x10c   : > { %5947 = vmatpush3.msra.mxu0 %v4689_v39  ;;  %5579 = vmatprep.mubr.msk.f32.mxu1 %vm6478_vm0, %v6477_v1 }
 0x10d   : > { %5701 = vmatprep.mubr.msk.f32.mxu0 %vm6478_vm0, %v6477_v1  ;;  %6196 = vmatprep.subr.mxu0 %v6477_v1 }
 0x10e   : > { %v7227_v49 = vpop.f32.mrb[20].mxu0  ;;  %v7229_v50 = vpop.f32.mrb[20].mxu1 }
 0x10f   : > { %v5230_v53 = vpop.f32.mrb[21].mxu0  ;;  %5580 = vmatmul.mubr.msk.f32.gmra.mrb[126].mxu1 %vm238_vm1, %v6573_v8  ;;  %5702 = vmatmul.mubr.msk.f32.gmra.mrb[126].mxu0 %vm238_vm1, %v6553_v6  ;;  %v5293_v4 = vpop.f32.mrb[21].mxu1 }
 0x110   : > { %5582 = vmatprep.mubr.msk.f32.mxu1 %vm6478_vm0, %v6477_v1  ;;  %5704 = vmatprep.mubr.msk.f32.mxu0 %vm6478_vm0, %v6477_v1 }
 0x112   : > { %v7239_v54 = vpop.f32.mrb[22].mxu0  ;;  %v7241_v57 = vpop.f32.mrb[22].mxu1 }
 0x113   : > { %v5233_v58 = vpop.f32.mrb[23].mxu0  ;;  %5583 = vmatmul.mubr.msk.f32.gmra.mrb[128].mxu1 %vm238_vm1, %v6587_v10  ;;  %5705 = vmatmul.mubr.msk.f32.gmra.mrb[128].mxu0 %vm238_vm1, %v6573_v8  ;;  %v5296_v61 = vpop.f32.mrb[23].mxu1 }
 0x114   : > { %5585 = vmatprep.mubr.msk.f32.mxu1 %vm6478_vm0, %v6477_v1  ;;  %5707 = vmatprep.mubr.msk.f32.mxu0 %vm6478_vm0, %v6477_v1 }
 0x116   : > { %v7251_v6 = vpop.f32.mrb[24].mxu0  ;;  %v7253_v62 = vpop.f32.mrb[24].mxu1 }
 0x117   : > { %v5236_v2 = vpop.f32.mrb[25].mxu0  ;;  %5586 = vmatmul.mubr.msk.f32.gmra.mrb[130].mxu1 %vm238_vm1, %v6601_v12  ;;  %5708 = vmatmul.mubr.msk.f32.gmra.mrb[130].mxu0 %vm238_vm1, %v6587_v10  ;;  %v5299_v3 = vpop.f32.mrb[25].mxu1 }
 0x118   : > { %5588 = vmatprep.mubr.msk.f32.mxu1 %vm6478_vm0, %v6477_v1  ;;  %5710 = vmatprep.mubr.msk.f32.mxu0 %vm6478_vm0, %v6477_v1 }
 0x11a   : > { %v7263_v8 = vpop.f32.mrb[26].mxu0  ;;  %v7265_v9 = vpop.f32.mrb[26].mxu1 }
 0x11b   : > { %v5239_v11 = vpop.f32.mrb[27].mxu0  ;;  %5589 = vmatmul.mubr.msk.f32.gmra.mrb[132].mxu1 %vm238_vm1, %v6615_v14  ;;  %5711 = vmatmul.mubr.msk.f32.gmra.mrb[132].mxu0 %vm238_vm1, %v6601_v12  ;;  %v5302_v17 = vpop.f32.mrb[27].mxu1 }
 0x11c   : > { %5591 = vmatprep.mubr.msk.f32.mxu1 %vm6478_vm0, %v6477_v1  ;;  %5713 = vmatprep.mubr.msk.f32.mxu0 %vm6478_vm0, %v6477_v1 }
 0x11e   : > { %v7275_v10 = vpop.f32.mrb[28].mxu0  ;;  %v7277_v19 = vpop.f32.mrb[28].mxu1 }
 0x11f   : > { %v5242_v25 = vpop.f32.mrb[29].mxu0  ;;  %5592 = vmatmul.mubr.msk.f32.gmra.mrb[134].mxu1 %vm238_vm1, %v6629_v16  ;;  %5714 = vmatmul.mubr.msk.f32.gmra.mrb[134].mxu0 %vm238_vm1, %v6615_v14  ;;  %v5305_v27 = vpop.f32.mrb[29].mxu1 }
 0x120   : > { %5594 = vmatprep.mubr.msk.f32.mxu1 %vm6478_vm0, %v6477_v1  ;;  %5716 = vmatprep.mubr.msk.f32.mxu0 %vm6478_vm0, %v6477_v1 }
 0x122   : > { %v7287_v12 = vpop.f32.mrb[30].mxu0  ;;  %v608_v29 = vpop.f32.mrb[30].mxu1 }
 0x123   : > { %v5245_v35 = vpop.f32.mrb[31].mxu0  ;;  %5595 = vmatmul.mubr.msk.f32.gmra.mrb[136].mxu1 %vm238_vm1, %v6643_v18  ;;  %5717 = vmatmul.mubr.msk.f32.gmra.mrb[136].mxu0 %vm238_vm1, %v6629_v16  ;;  %v5308_v37 = vpop.f32.mrb[31].mxu1 }
 0x124   : > { %5597 = vmatprep.mubr.msk.f32.mxu1 %vm6478_vm0, %v6477_v1  ;;  %5719 = vmatprep.mubr.msk.f32.mxu0 %vm6478_vm0, %v6477_v1 }
 0x126   : > { %v7297_v14 = vpop.f32.mrb[32].mxu0  ;;  %v612_v39 = vpop.f32.mrb[32].mxu1 }
 0x127   : > { %v5248_v45 = vpop.f32.mrb[33].mxu0  ;;  %5598 = vmatmul.mubr.msk.f32.gmra.mrb[138].mxu1 %vm238_vm1, %v6657_v20  ;;  %5720 = vmatmul.mubr.msk.f32.gmra.mrb[138].mxu0 %vm238_vm1, %v6643_v18  ;;  %v5311_v46 = vpop.f32.mrb[33].mxu1 }
 0x128   : > { %5600 = vmatprep.mubr.msk.f32.mxu1 %vm6478_vm0, %v6477_v1  ;;  %5722 = vmatprep.mubr.msk.f32.mxu0 %vm6478_vm0, %v6477_v1 }
 0x12a   : > { %v7307_v16 = vpop.f32.mrb[34].mxu0  ;;  %v616_v53 = vpop.f32.mrb[34].mxu1 }
 0x12b   : > { %v5251_v4 = vpop.f32.mrb[35].mxu0  ;;  %5601 = vmatmul.mubr.msk.f32.gmra.mrb[140].mxu1 %vm238_vm1, %v6671_v22  ;;  %5723 = vmatmul.mubr.msk.f32.gmra.mrb[140].mxu0 %vm238_vm1, %v6657_v20  ;;  %v5314_v58 = vpop.f32.mrb[35].mxu1 }
 0x12c   : > { %5603 = vmatprep.mubr.msk.f32.mxu1 %vm6478_vm0, %v6477_v1  ;;  %5725 = vmatprep.mubr.msk.f32.mxu0 %vm6478_vm0, %v6477_v1 }
 0x12e   : > { %v7317_v18 = vpop.f32.mrb[36].mxu0  ;;  %v620_v61 = vpop.f32.mrb[36].mxu1 }
 0x12f   : > { %v5254_v2 = vpop.f32.mrb[37].mxu0  ;;  %5604 = vmatmul.mubr.msk.f32.gmra.mrb[142].mxu1 %vm238_vm1, %v6685_v24  ;;  %5726 = vmatmul.mubr.msk.f32.gmra.mrb[142].mxu0 %vm238_vm1, %v6671_v22  ;;  %v5317_v3 = vpop.f32.mrb[37].mxu1 }
 0x130   : > { %5606 = vmatprep.mubr.msk.f32.mxu1 %vm6478_vm0, %v6477_v1  ;;  %5728 = vmatprep.mubr.msk.f32.mxu0 %vm6478_vm0, %v6477_v1 }
 0x132   : > { %v7327_v20 = vpop.f32.mrb[38].mxu0  ;;  %v624_v11 = vpop.f32.mrb[38].mxu1 }
 0x133   : > { %v5257_v17 = vpop.f32.mrb[39].mxu0  ;;  %5607 = vmatmul.mubr.msk.f32.gmra.mrb[144].mxu1 %vm238_vm1, %v6699_v26  ;;  %5729 = vmatmul.mubr.msk.f32.gmra.mrb[144].mxu0 %vm238_vm1, %v6685_v24  ;;  %v5320_v25 = vpop.f32.mrb[39].mxu1 }
 0x134   : > { %5609 = vmatprep.mubr.msk.f32.mxu1 %vm6478_vm0, %v6477_v1  ;;  %5731 = vmatprep.mubr.msk.f32.mxu0 %vm6478_vm0, %v6477_v1 }
 0x136   : > { %v7337_v22 = vpop.f32.mrb[40].mxu0  ;;  %v695_v27 = vpop.f32.mrb[40].mxu1 }
 0x137   : > { %v5260_v29 = vpop.f32.mrb[41].mxu0  ;;  %5610 = vmatmul.mubr.msk.f32.gmra.mrb[146].mxu1 %vm238_vm1, %v6713_v28  ;;  %5732 = vmatmul.mubr.msk.f32.gmra.mrb[146].mxu0 %vm238_vm1, %v6699_v26  ;;  %v5325_v35 = vpop.f32.mrb[41].mxu1  ;;  %v933_v39 = vrot.slane %v695_v27, 1 }
 0x138   : > { %5612 = vmatprep.mubr.msk.f32.mxu1 %vm6478_vm0, %v6477_v1  ;;  %5734 = vmatprep.mubr.msk.f32.mxu0 %vm6478_vm0, %v6477_v1 }
 0x13a   : > { %v700_v24 = vpop.f32.mrb[42].mxu1  ;;  %v1146_v37 = vpop.f32.mrb[42].mxu0 }
 0x13b   : > { %v934_v45 = vrot.slane %v700_v24, 1  ;;  %v5450_v46 = vpop.f32.mrb[43].mxu0  ;;  %5613 = vmatmul.mubr.msk.f32.gmra.mrb[148].mxu1 %vm238_vm1, %v6727_v30  ;;  %5735 = vmatmul.mubr.msk.f32.gmra.mrb[148].mxu0 %vm238_vm1, %v6713_v28  ;;  %v5328_v26 = vpop.f32.mrb[43].mxu1  ;;  %v1384_v2 = vrot.slane %v1146_v37, 2 }
 0x13c   : > { %5615 = vmatprep.mubr.msk.f32.mxu1 %vm6478_vm0, %v6477_v1  ;;  %5737 = vmatprep.mubr.msk.f32.mxu0 %vm6478_vm0, %v6477_v1 }
 0x13d   : > { %v935_v53 = vsel %vm932_vm2, %v933_v39, %v934_v45 }
 0x13e   : > { %v1042_v4 = vadd.f32 %v935_v53, %v7099_v47  ;;  %v705_v58 = vpop.f32.mrb[44].mxu1  ;;  %v1151_v61 = vpop.f32.mrb[44].mxu0 }
 0x13f   : > { %v936_v3 = vrot.slane %v705_v58, 1  ;;  %v1385_v11 = vrot.slane %v1151_v61, 2  ;;  %v5453_v17 = vpop.f32.mrb[45].mxu0  ;;  %5616 = vmatmul.mubr.msk.f32.gmra.mrb[150].mxu1 %vm238_vm1, %v6741_v32  ;;  %5738 = vmatmul.mubr.msk.f32.gmra.mrb[150].mxu0 %vm238_vm1, %v6727_v30  ;;  %v5331_v28 = vpop.f32.mrb[45].mxu1 }
 0x140   : > { %5618 = vmatprep.mubr.msk.f32.mxu1 %vm6478_vm0, %v6477_v1  ;;  %5740 = vmatprep.mubr.msk.f32.mxu0 %vm6478_vm0, %v6477_v1 }
 0x141   : > { %v937_v47 = vsel %vm932_vm2, %v934_v45, %v936_v3  ;;  %v1386_v25 = vsel %vm1383_vm3, %v1384_v2, %v1385_v11 }
 0x142   : > { %v1043_v27 = vadd.f32 %v937_v47, %v7111_v51  ;;  %v710_v29 = vpop.f32.mrb[46].mxu1  ;;  %v1156_v35 = vpop.f32.mrb[46].mxu0  ;;  %v7368_v24 = vadd.f32 %v1386_v25, %v1042_v4 }
 0x143   : > { %v938_v37 = vrot.slane %v710_v29, 1  ;;  %v1387_v39 = vrot.slane %v1156_v35, 2  ;;  %v5456_v30 = vpop.f32.mrb[47].mxu0  ;;  %5619 = vmatmul.mubr.msk.f32.gmra.mrb[152].mxu1 %vm238_vm1, %v6755_v34  ;;  %5741 = vmatmul.mubr.msk.f32.gmra.mrb[152].mxu0 %vm238_vm1, %v6741_v32  ;;  %v5334_v46 = vpop.f32.mrb[47].mxu1 }
 0x144   : > { %5621 = vmatprep.mubr.msk.f32.mxu1 %vm6478_vm0, %v6477_v1  ;;  %5743 = vmatprep.mubr.msk.f32.mxu0 %vm6478_vm0, %v6477_v1 }
 0x145   : > { %v939_v51 = vsel %vm932_vm2, %v936_v3, %v938_v37  ;;  %v1388_v45 = vsel %vm1383_vm3, %v1385_v11, %v1387_v39 }
 0x146   : > { %v1044_v26 = vadd.f32 %v939_v51, %v7123_v55  ;;  %v715_v53 = vpop.f32.mrb[48].mxu1  ;;  %v1161_v4 = vpop.f32.mrb[48].mxu0  ;;  %v7381_v58 = vadd.f32 %v1388_v45, %v1043_v27 }
 0x147   : > { %v940_v61 = vrot.slane %v715_v53, 1  ;;  %v1389_v2 = vrot.slane %v1161_v4, 2  ;;  %v5459_v32 = vpop.f32.mrb[49].mxu0  ;;  %5622 = vmatmul.mubr.msk.f32.gmra.mrb[154].mxu1 %vm238_vm1, %v6769_v36  ;;  %5744 = vmatmul.mubr.msk.f32.gmra.mrb[154].mxu0 %vm238_vm1, %v6755_v34  ;;  %v5337_v17 = vpop.f32.mrb[49].mxu1 }
 0x148   : > { %5624 = vmatprep.mubr.msk.f32.mxu1 %vm6478_vm0, %v6477_v1  ;;  %5746 = vmatprep.mubr.msk.f32.mxu0 %vm6478_vm0, %v6477_v1 }
 0x149   : > { %v941_v55 = vsel %vm932_vm2, %v938_v37, %v940_v61  ;;  %v1390_v3 = vsel %vm1383_vm3, %v1387_v39, %v1389_v2 }
 0x14a   : > { %v1045_v11 = vadd.f32 %v941_v55, %v7135_v59  ;;  %v720_v28 = vpop.f32.mrb[50].mxu1  ;;  %v1166_v47 = vpop.f32.mrb[50].mxu0  ;;  %v7394_v25 = vadd.f32 %v1390_v3, %v1044_v26 }
 0x14b   : > { %v942_v27 = vrot.slane %v720_v28, 1  ;;  %v1391_v29 = vrot.slane %v1166_v47, 2  ;;  %v5462_v34 = vpop.f32.mrb[51].mxu0  ;;  %5625 = vmatmul.mubr.msk.f32.gmra.mrb[156].mxu1 %vm238_vm1, %v6783_v38  ;;  %5747 = vmatmul.mubr.msk.f32.gmra.mrb[156].mxu0 %vm238_vm1, %v6769_v36  ;;  %v5340_v35 = vpop.f32.mrb[51].mxu1 }
 0x14c   : > { %5627 = vmatprep.mubr.msk.f32.mxu1 %vm6478_vm0, %v6477_v1  ;;  %5749 = vmatprep.mubr.msk.f32.mxu0 %vm6478_vm0, %v6477_v1 }
 0x14d   : > { %v943_v59 = vsel %vm932_vm2, %v940_v61, %v942_v27  ;;  %v1392_v37 = vsel %vm1383_vm3, %v1389_v2, %v1391_v29 }
 0x14e   : > { %v1046_v39 = vadd.f32 %v943_v59, %v7147_v63  ;;  %v725_v30 = vpop.f32.mrb[52].mxu1  ;;  %v1171_v46 = vpop.f32.mrb[52].mxu0  ;;  %v7407_v51 = vadd.f32 %v1392_v37, %v1045_v11 }
 0x14f   : > { %v944_v45 = vrot.slane %v725_v30, 1  ;;  %v1393_v26 = vrot.slane %v1171_v46, 2  ;;  %v5465_v36 = vpop.f32.mrb[53].mxu0  ;;  %5628 = vmatmul.mubr.msk.f32.gmra.mrb[158].mxu1 %vm238_vm1, %v6797_v40  ;;  %5750 = vmatmul.mubr.msk.f32.gmra.mrb[158].mxu0 %vm238_vm1, %v6783_v38  ;;  %v5343_v53 = vpop.f32.mrb[53].mxu1 }
 0x150   : > { %5630 = vmatprep.mubr.msk.f32.mxu1 %vm6478_vm0, %v6477_v1  ;;  %5752 = vmatprep.mubr.msk.f32.mxu0 %vm6478_vm0, %v6477_v1 }
 0x151   : > { %v945_v63 = vsel %vm932_vm2, %v942_v27, %v944_v45  ;;  %v1394_v4 = vsel %vm1383_vm3, %v1391_v29, %v1393_v26 }
 0x152   : > { %v1047_v61 = vadd.f32 %v945_v63, %v7159_v5  ;;  %v730_v2 = vpop.f32.mrb[54].mxu1  ;;  %v1176_v32 = vpop.f32.mrb[54].mxu0  ;;  %v7420_v17 = vadd.f32 %v1394_v4, %v1046_v39  ;;  %v6351_v63 = vld [vmem:[%s6534_s21 + $0xa8] sm:$0xff] }
 0x153   : > { %v946_v55 = vrot.slane %v730_v2, 1  ;;  %v1395_v3 = vrot.slane %v1176_v32, 2  ;;  %v5468_v38 = vpop.f32.mrb[55].mxu0  ;;  %5631 = vmatmul.mubr.msk.f32.gmra.mrb[160].mxu1 %vm238_vm1, %v6811_v42  ;;  %5753 = vmatmul.mubr.msk.f32.gmra.mrb[160].mxu0 %vm238_vm1, %v6797_v40  ;;  %v5346_v11 = vpop.f32.mrb[55].mxu1 }
 0x154   : > { %5633 = vmatprep.mubr.msk.f32.mxu1 %vm6478_vm0, %v6477_v1  ;;  %5755 = vmatprep.mubr.msk.f32.mxu0 %vm6478_vm0, %v6477_v1 }
 0x155   : > { %v947_v5 = vsel %vm932_vm2, %v944_v45, %v946_v55  ;;  %v1396_v28 = vsel %vm1383_vm3, %v1393_v26, %v1395_v3 }
 0x156   : > { %v1048_v47 = vadd.f32 %v947_v5, %v7171_v13  ;;  %v735_v27 = vpop.f32.mrb[56].mxu1  ;;  %v1181_v29 = vpop.f32.mrb[56].mxu0  ;;  %v7433_v34 = vadd.f32 %v1396_v28, %v1047_v61  ;;  %v6352_v5 = vld [vmem:[%s6534_s21 + $0xb0] sm:$0xff] }
 0x157   : > { %v948_v35 = vrot.slane %v735_v27, 1  ;;  %v1397_v59 = vrot.slane %v1181_v29, 2  ;;  %v5471_v40 = vpop.f32.mrb[57].mxu0  ;;  %5634 = vmatmul.mubr.msk.f32.gmra.mrb[162].mxu1 %vm238_vm1, %v6825_v44  ;;  %5756 = vmatmul.mubr.msk.f32.gmra.mrb[162].mxu0 %vm238_vm1, %v6811_v42  ;;  %v5349_v37 = vpop.f32.mrb[57].mxu1 }
 0x158   : > { %5636 = vmatprep.mubr.msk.f32.mxu1 %vm6478_vm0, %v6477_v1  ;;  %5758 = vmatprep.mubr.msk.f32.mxu0 %vm6478_vm0, %v6477_v1 }
 0x159   : > { %v949_v13 = vsel %vm932_vm2, %v946_v55, %v948_v35  ;;  %v1398_v39 = vsel %vm1383_vm3, %v1395_v3, %v1397_v59 }
 0x15a   : > { %v1049_v30 = vadd.f32 %v949_v13, %v7183_v21  ;;  %v740_v46 = vpop.f32.mrb[58].mxu1  ;;  %v1186_v45 = vpop.f32.mrb[58].mxu0  ;;  %v7446_v26 = vadd.f32 %v1398_v39, %v1048_v47  ;;  %v6353_v39 = vld [vmem:[%s6534_s21 + $0xb8] sm:$0xff] }
 0x15b   : > { %v950_v36 = vrot.slane %v740_v46, 1  ;;  %v1399_v53 = vrot.slane %v1186_v45, 2  ;;  %v5474_v42 = vpop.f32.mrb[59].mxu0  ;;  %5637 = vmatmul.mubr.msk.f32.gmra.mrb[164].mxu1 %vm238_vm1, %v6351_v63  ;;  %5759 = vmatmul.mubr.msk.f32.gmra.mrb[164].mxu0 %vm238_vm1, %v6825_v44  ;;  %v5352_v4 = vpop.f32.mrb[59].mxu1 }
 0x15c   : > { %5639 = vmatprep.mubr.msk.f32.mxu1 %vm6478_vm0, %v6477_v1  ;;  %5761 = vmatprep.mubr.msk.f32.mxu0 %vm6478_vm0, %v6477_v1 }
 0x15d   : > { %v951_v21 = vsel %vm932_vm2, %v948_v35, %v950_v36  ;;  %v1400_v61 = vsel %vm1383_vm3, %v1397_v59, %v1399_v53 }
 0x15e   : > { %v1050_v2 = vadd.f32 %v951_v21, %v7198_v31  ;;  %v745_v32 = vpop.f32.mrb[60].mxu1  ;;  %v1191_v55 = vpop.f32.mrb[60].mxu0  ;;  %v7459_v3 = vadd.f32 %v1400_v61, %v1049_v30  ;;  %v6354_v61 = vld [vmem:[%s6534_s21 + $0xc0] sm:$0xff] }
 0x15f   : > { %v952_v38 = vrot.slane %v745_v32, 1  ;;  %v1401_v11 = vrot.slane %v1191_v55, 2  ;;  %v5477_v44 = vpop.f32.mrb[61].mxu0  ;;  %5640 = vmatmul.mubr.msk.f32.gmra.mrb[166].mxu1 %vm238_vm1, %v6352_v5  ;;  %5762 = vmatmul.mubr.msk.f32.gmra.mrb[166].mxu0 %vm238_vm1, %v6351_v63  ;;  %v5355_v28 = vpop.f32.mrb[61].mxu1 }
 0x160   : > { %5642 = vmatprep.mubr.msk.f32.mxu1 %vm6478_vm0, %v6477_v1  ;;  %5764 = vmatprep.mubr.msk.f32.mxu0 %vm6478_vm0, %v6477_v1 }
 0x161   : > { %v953_v31 = vsel %vm932_vm2, %v950_v36, %v952_v38  ;;  %v1402_v47 = vsel %vm1383_vm3, %v1399_v53, %v1401_v11 }
 0x162   : > { %v1051_v27 = vadd.f32 %v953_v31, %v7214_v41  ;;  %v750_v29 = vpop.f32.mrb[62].mxu1  ;;  %v1196_v35 = vpop.f32.mrb[62].mxu0  ;;  %v7471_v59 = vadd.f32 %v1402_v47, %v1050_v2  ;;  %v6355_v47 = vld [vmem:[%s6534_s21 + $0xc8] sm:$0xff] }
 0x163   : > { %v954_v40 = vrot.slane %v750_v29, 1  ;;  %v1403_v37 = vrot.slane %v1196_v35, 2  ;;  %v5480_v13 = vpop.f32.mrb[63].mxu0  ;;  %5643 = vmatmul.mubr.msk.f32.gmra.mrb[168].mxu1 %vm238_vm1, %v6353_v39  ;;  %5765 = vmatmul.mubr.msk.f32.gmra.mrb[168].mxu0 %vm238_vm1, %v6352_v5  ;;  %v5358_v30 = vpop.f32.mrb[63].mxu1 }
 0x164   : > { %5645 = vmatprep.mubr.msk.f32.mxu1 %vm6478_vm0, %v6477_v1  ;;  %5767 = vmatprep.mubr.msk.f32.mxu0 %vm6478_vm0, %v6477_v1 }
 0x165   : > { %v955_v41 = vsel %vm932_vm2, %v952_v38, %v954_v40  ;;  %v1404_v46 = vsel %vm1383_vm3, %v1401_v11, %v1403_v37 }
 0x166   : > { %v1052_v45 = vadd.f32 %v955_v41, %v7227_v49  ;;  %v755_v36 = vpop.f32.mrb[64].mxu1  ;;  %v1201_v53 = vpop.f32.mrb[64].mxu0  ;;  %v7483_v42 = vadd.f32 %v1404_v46, %v1051_v27  ;;  %v6356_v46 = vld [vmem:[%s6534_s21 + $0xd0] sm:$0xff] }
 0x167   : > { %v956_v63 = vrot.slane %v755_v36, 1  ;;  %v1405_v4 = vrot.slane %v1201_v53, 2  ;;  %v5483_v21 = vpop.f32.mrb[65].mxu0  ;;  %5646 = vmatmul.mubr.msk.f32.gmra.mrb[170].mxu1 %vm238_vm1, %v6354_v61  ;;  %5768 = vmatmul.mubr.msk.f32.gmra.mrb[170].mxu0 %vm238_vm1, %v6353_v39  ;;  %v5361_v2 = vpop.f32.mrb[65].mxu1 }
 0x168   : > { %5648 = vmatprep.mubr.msk.f32.mxu1 %vm6478_vm0, %v6477_v1  ;;  %5770 = vmatprep.mubr.msk.f32.mxu0 %vm6478_vm0, %v6477_v1 }
 0x169   : > { %v957_v49 = vsel %vm932_vm2, %v954_v40, %v956_v63  ;;  %v1406_v32 = vsel %vm1383_vm3, %v1403_v37, %v1405_v4 }
 0x16a   : > { %v1053_v55 = vadd.f32 %v957_v49, %v7239_v54  ;;  %v760_v38 = vpop.f32.mrb[66].mxu1  ;;  %v1206_v11 = vpop.f32.mrb[66].mxu0  ;;  %v7495_v44 = vadd.f32 %v1406_v32, %v1052_v45  ;;  %v6357_v32 = vld [vmem:[%s6534_s21 + $0xd8] sm:$0xff] }
 0x16b   : > { %v958_v5 = vrot.slane %v760_v38, 1  ;;  %v1407_v28 = vrot.slane %v1206_v11, 2  ;;  %v5486_v31 = vpop.f32.mrb[67].mxu0  ;;  %5649 = vmatmul.mubr.msk.f32.gmra.mrb[172].mxu1 %vm238_vm1, %v6355_v47  ;;  %5771 = vmatmul.mubr.msk.f32.gmra.mrb[172].mxu0 %vm238_vm1, %v6354_v61  ;;  %v5364_v27 = vpop.f32.mrb[67].mxu1 }
 0x16c   : > { %5651 = vmatprep.mubr.msk.f32.mxu1 %vm6478_vm0, %v6477_v1  ;;  %5773 = vmatprep.mubr.msk.f32.mxu0 %vm6478_vm0, %v6477_v1 }
 0x16d   : > { %v959_v54 = vsel %vm932_vm2, %v956_v63, %v958_v5  ;;  %v1408_v29 = vsel %vm1383_vm3, %v1405_v4, %v1407_v28 }
 0x16e   : > { %v1054_v35 = vadd.f32 %v959_v54, %v7251_v6  ;;  %v765_v40 = vpop.f32.mrb[68].mxu1  ;;  %v1211_v37 = vpop.f32.mrb[68].mxu0  ;;  %v7507_v13 = vadd.f32 %v1408_v29, %v1053_v55  ;;  %v6358_v29 = vld [vmem:[%s6534_s21 + $0xe0] sm:$0xff] }
 0x16f   : > { %v960_v39 = vrot.slane %v765_v40, 1  ;;  %v1409_v30 = vrot.slane %v1211_v37, 2  ;;  %v5489_v41 = vpop.f32.mrb[69].mxu0  ;;  %5652 = vmatmul.mubr.msk.f32.gmra.mrb[174].mxu1 %vm238_vm1, %v6356_v46  ;;  %5774 = vmatmul.mubr.msk.f32.gmra.mrb[174].mxu0 %vm238_vm1, %v6355_v47  ;;  %v5367_v45 = vpop.f32.mrb[69].mxu1 }
 0x170   : > { %5654 = vmatprep.mubr.msk.f32.mxu1 %vm6478_vm0, %v6477_v1  ;;  %5776 = vmatprep.mubr.msk.f32.mxu0 %vm6478_vm0, %v6477_v1 }
 0x171   : > { %v961_v6 = vsel %vm932_vm2, %v958_v5, %v960_v39  ;;  %v1410_v36 = vsel %vm1383_vm3, %v1407_v28, %v1409_v30 }
 0x172   : > { %v1055_v53 = vadd.f32 %v961_v6, %v7263_v8  ;;  %v770_v63 = vpop.f32.mrb[70].mxu1  ;;  %v1216_v4 = vpop.f32.mrb[70].mxu0  ;;  %v7519_v21 = vadd.f32 %v1410_v36, %v1054_v35  ;;  %v6359_v36 = vld [vmem:[%s6534_s21 + $0xe8] sm:$0xff] }
 0x173   : > { %v962_v61 = vrot.slane %v770_v63, 1  ;;  %v1411_v2 = vrot.slane %v1216_v4, 2  ;;  %v5492_v49 = vpop.f32.mrb[71].mxu0  ;;  %5655 = vmatmul.mubr.msk.f32.gmra.mrb[176].mxu1 %vm238_vm1, %v6357_v32  ;;  %5777 = vmatmul.mubr.msk.f32.gmra.mrb[176].mxu0 %vm238_vm1, %v6356_v46  ;;  %v5370_v55 = vpop.f32.mrb[71].mxu1 }
 0x174   : > { %5657 = vmatprep.mubr.msk.f32.mxu1 %vm6478_vm0, %v6477_v1  ;;  %5779 = vmatprep.mubr.msk.f32.mxu0 %vm6478_vm0, %v6477_v1 }
 0x175   : > { %v963_v8 = vsel %vm932_vm2, %v960_v39, %v962_v61  ;;  %v1412_v38 = vsel %vm1383_vm3, %v1409_v30, %v1411_v2 }
 0x176   : > { %v1056_v11 = vadd.f32 %v963_v8, %v7275_v10  ;;  %v775_v5 = vpop.f32.mrb[72].mxu1  ;;  %v1221_v28 = vpop.f32.mrb[72].mxu0  ;;  %v7531_v31 = vadd.f32 %v1412_v38, %v1055_v53  ;;  %v6360_v38 = vld [vmem:[%s6534_s21 + $0xf0] sm:$0xff] }
 0x177   : > { %v964_v47 = vrot.slane %v775_v5, 1  ;;  %v1413_v27 = vrot.slane %v1221_v28, 2  ;;  %v5495_v54 = vpop.f32.mrb[73].mxu0  ;;  %5658 = vmatmul.mubr.msk.f32.gmra.mrb[178].mxu1 %vm238_vm1, %v6358_v29  ;;  %5780 = vmatmul.mubr.msk.f32.gmra.mrb[178].mxu0 %vm238_vm1, %v6357_v32  ;;  %v5373_v35 = vpop.f32.mrb[73].mxu1 }
 0x178   : > { %5660 = vmatprep.mubr.msk.f32.mxu1 %vm6478_vm0, %v6477_v1  ;;  %5782 = vmatprep.mubr.msk.f32.mxu0 %vm6478_vm0, %v6477_v1 }
 0x179   : > { %v965_v10 = vsel %vm932_vm2, %v962_v61, %v964_v47  ;;  %v1414_v40 = vsel %vm1383_vm3, %v1411_v2, %v1413_v27 }
 0x17a   : > { %v1057_v37 = vadd.f32 %v965_v10, %v7287_v12  ;;  %v780_v39 = vpop.f32.mrb[74].mxu1  ;;  %v1226_v30 = vpop.f32.mrb[74].mxu0  ;;  %v7543_v41 = vadd.f32 %v1414_v40, %v1056_v11  ;;  %v6361_v40 = vld [vmem:[%s6534_s21 + $0xf8] sm:$0xff] }
 0x17b   : > { %v966_v46 = vrot.slane %v780_v39, 1  ;;  %v1415_v45 = vrot.slane %v1226_v30, 2  ;;  %v5498_v6 = vpop.f32.mrb[75].mxu0  ;;  %5661 = vmatmul.mubr.msk.f32.gmra.mrb[180].mxu1 %vm238_vm1, %v6359_v36  ;;  %5783 = vmatmul.mubr.msk.f32.gmra.mrb[180].mxu0 %vm238_vm1, %v6358_v29  ;;  %v5376_v53 = vpop.f32.mrb[75].mxu1 }
 0x17c   : > { %5663 = vmatprep.mubr.msk.f32.mxu1 %vm6478_vm0, %v6477_v1  ;;  %5785 = vmatprep.mubr.msk.f32.mxu0 %vm6478_vm0, %v6477_v1 }
 0x17d   : > { %v967_v12 = vsel %vm932_vm2, %v964_v47, %v966_v46  ;;  %v1416_v63 = vsel %vm1383_vm3, %v1413_v27, %v1415_v45 }
 0x17e   : > { %v1058_v4 = vadd.f32 %v967_v12, %v7297_v14  ;;  %v785_v61 = vpop.f32.mrb[76].mxu1  ;;  %v1231_v2 = vpop.f32.mrb[76].mxu0  ;;  %v7555_v49 = vadd.f32 %v1416_v63, %v1057_v37  ;;  %v6362_v63 = vld [vmem:[%s6534_s21 + $0x100] sm:$0xff] }
 0x17f   : > { %v968_v32 = vrot.slane %v785_v61, 1  ;;  %v1417_v55 = vrot.slane %v1231_v2, 2  ;;  %v5501_v8 = vpop.f32.mrb[77].mxu0  ;;  %5664 = vmatmul.mubr.msk.f32.gmra.mrb[182].mxu1 %vm238_vm1, %v6360_v38  ;;  %5786 = vmatmul.mubr.msk.f32.gmra.mrb[182].mxu0 %vm238_vm1, %v6359_v36  ;;  %v5379_v11 = vpop.f32.mrb[77].mxu1 }
 0x180   : > { %5666 = vmatprep.mubr.msk.f32.mxu1 %vm6478_vm0, %v6477_v1  ;;  %5788 = vmatprep.mubr.msk.f32.mxu0 %vm6478_vm0, %v6477_v1 }
 0x181   : > { %v969_v14 = vsel %vm932_vm2, %v966_v46, %v968_v32  ;;  %v1418_v5 = vsel %vm1383_vm3, %v1415_v45, %v1417_v55 }
 0x182   : > { %v1059_v28 = vadd.f32 %v969_v14, %v7307_v16  ;;  %v790_v47 = vpop.f32.mrb[78].mxu1  ;;  %v1236_v27 = vpop.f32.mrb[78].mxu0  ;;  %v7567_v54 = vadd.f32 %v1418_v5, %v1058_v4  ;;  %v6363_v5 = vld [vmem:[%s6534_s21 + $0x108] sm:$0xff] }
 0x183   : > { %v970_v29 = vrot.slane %v790_v47, 1  ;;  %v1419_v35 = vrot.slane %v1236_v27, 2  ;;  %v5504_v10 = vpop.f32.mrb[79].mxu0  ;;  %5667 = vmatmul.mubr.msk.f32.gmra.mrb[184].mxu1 %vm238_vm1, %v6361_v40  ;;  %5789 = vmatmul.mubr.msk.f32.gmra.mrb[184].mxu0 %vm238_vm1, %v6360_v38  ;;  %v5382_v37 = vpop.f32.mrb[79].mxu1 }
 0x184   : > { %5669 = vmatprep.mubr.msk.f32.mxu1 %vm6478_vm0, %v6477_v1  ;;  %5791 = vmatprep.mubr.msk.f32.mxu0 %vm6478_vm0, %v6477_v1 }
 0x185   : > { %v971_v16 = vsel %vm932_vm2, %v968_v32, %v970_v29  ;;  %v1420_v39 = vsel %vm1383_vm3, %v1417_v55, %v1419_v35 }
 0x186   : > { %v1060_v30 = vadd.f32 %v971_v16, %v7317_v18  ;;  %v795_v46 = vpop.f32.mrb[80].mxu1  ;;  %v1241_v45 = vpop.f32.mrb[80].mxu0  ;;  %v7579_v6 = vadd.f32 %v1420_v39, %v1059_v28  ;;  %v6364_v39 = vld [vmem:[%s6534_s21 + $0x110] sm:$0xff] }
 0x187   : > { %v972_v36 = vrot.slane %v795_v46, 1  ;;  %v1421_v53 = vrot.slane %v1241_v45, 2  ;;  %v5507_v12 = vpop.f32.mrb[81].mxu0  ;;  %5670 = vmatmul.mubr.msk.f32.gmra.mrb[186].mxu1 %vm238_vm1, %v6362_v63  ;;  %5792 = vmatmul.mubr.msk.f32.gmra.mrb[186].mxu0 %vm238_vm1, %v6361_v40  ;;  %v5385_v4 = vpop.f32.mrb[81].mxu1 }
 0x188   : > { %5672 = vmatprep.mubr.msk.f32.mxu1 %vm6478_vm0, %v6477_v1  ;;  %5794 = vmatprep.mubr.msk.f32.mxu0 %vm6478_vm0, %v6477_v1 }
 0x189   : > { %v973_v18 = vsel %vm932_vm2, %v970_v29, %v972_v36  ;;  %v1422_v61 = vsel %vm1383_vm3, %v1419_v35, %v1421_v53 }
 0x18a   : > { %v1061_v2 = vadd.f32 %v973_v18, %v7327_v20  ;;  %v800_v32 = vpop.f32.mrb[82].mxu1  ;;  %v1246_v55 = vpop.f32.mrb[82].mxu0  ;;  %v7591_v8 = vadd.f32 %v1422_v61, %v1060_v30  ;;  %v6365_v61 = vld [vmem:[%s6534_s21 + $0x118] sm:$0xff] }
 0x18b   : > { %v974_v38 = vrot.slane %v800_v32, 1  ;;  %v1423_v11 = vrot.slane %v1246_v55, 2  ;;  %v5510_v14 = vpop.f32.mrb[83].mxu0  ;;  %5673 = vmatmul.mubr.msk.f32.gmra.mrb[188].mxu1 %vm238_vm1, %v6363_v5  ;;  %5795 = vmatmul.mubr.msk.f32.gmra.mrb[188].mxu0 %vm238_vm1, %v6362_v63  ;;  %v5388_v28 = vpop.f32.mrb[83].mxu1 }
 0x18c   : > { %5675 = vmatprep.mubr.msk.f32.mxu1 %vm6478_vm0, %v6477_v1  ;;  %5797 = vmatprep.mubr.msk.f32.mxu0 %vm6478_vm0, %v6477_v1 }
 0x18d   : > { %v975_v20 = vsel %vm932_vm2, %v972_v36, %v974_v38  ;;  %v1424_v47 = vsel %vm1383_vm3, %v1421_v53, %v1423_v11 }
 0x18e   : > { %v1062_v27 = vadd.f32 %v975_v20, %v7337_v22  ;;  %v805_v29 = vpop.f32.mrb[84].mxu1  ;;  %v1251_v35 = vpop.f32.mrb[84].mxu0  ;;  %v7603_v10 = vadd.f32 %v1424_v47, %v1061_v2  ;;  %v6366_v47 = vld [vmem:[%s6534_s21 + $0x120] sm:$0xff] }
 0x18f   : > { %v976_v40 = vrot.slane %v805_v29, 1  ;;  %v1425_v37 = vrot.slane %v1251_v35, 2  ;;  %v5513_v16 = vpop.f32.mrb[85].mxu0  ;;  %5676 = vmatmul.mubr.msk.f32.gmra.mrb[190].mxu1 %vm238_vm1, %v6364_v39  ;;  %5798 = vmatmul.mubr.msk.f32.gmra.mrb[190].mxu0 %vm238_vm1, %v6363_v5  ;;  %v5391_v30 = vpop.f32.mrb[85].mxu1 }
 0x190   : > { %5678 = vmatprep.mubr.msk.f32.mxu1 %vm6478_vm0, %v6477_v1  ;;  %5800 = vmatprep.mubr.msk.f32.mxu0 %vm6478_vm0, %v6477_v1 }
 0x191   : > { %v977_v22 = vsel %vm932_vm2, %v974_v38, %v976_v40  ;;  %v1426_v46 = vsel %vm1383_vm3, %v1423_v11, %v1425_v37 }
 0x192   : > { %v1063_v45 = vadd.f32 %v977_v22, %v7101_v48  ;;  %v810_v36 = vpop.f32.mrb[86].mxu1  ;;  %v1256_v53 = vpop.f32.mrb[86].mxu0  ;;  %v7615_v12 = vadd.f32 %v1426_v46, %v1062_v27  ;;  %v6367_v46 = vld [vmem:[%s6534_s21 + $0x128] sm:$0xff] }
 0x193   : > { %v978_v63 = vrot.slane %v810_v36, 1  ;;  %v1427_v4 = vrot.slane %v1256_v53, 2  ;;  %v5516_v18 = vpop.f32.mrb[87].mxu0  ;;  %5679 = vmatmul.mubr.msk.f32.gmra.mrb[192].mxu1 %vm238_vm1, %v6365_v61  ;;  %5801 = vmatmul.mubr.msk.f32.gmra.mrb[192].mxu0 %vm238_vm1, %v6364_v39  ;;  %v5394_v2 = vpop.f32.mrb[87].mxu1 }
 0x194   : > { %5681 = vmatprep.mubr.msk.f32.mxu1 %vm6478_vm0, %v6477_v1  ;;  %5803 = vmatprep.mubr.msk.f32.mxu0 %vm6478_vm0, %v6477_v1 }
 0x195   : > { %v979_v48 = vsel %vm932_vm2, %v976_v40, %v978_v63  ;;  %v1428_v32 = vsel %vm1383_vm3, %v1425_v37, %v1427_v4 }
 0x196   : > { %v1064_v55 = vadd.f32 %v979_v48, %v7113_v52  ;;  %v815_v38 = vpop.f32.mrb[88].mxu1  ;;  %v1261_v11 = vpop.f32.mrb[88].mxu0  ;;  %v7627_v14 = vadd.f32 %v1428_v32, %v1063_v45  ;;  %v6368_v32 = vld [vmem:[%s6534_s21 + $0x130] sm:$0xff] }
 0x197   : > { %v980_v5 = vrot.slane %v815_v38, 1  ;;  %v1429_v28 = vrot.slane %v1261_v11, 2  ;;  %v5519_v20 = vpop.f32.mrb[89].mxu0  ;;  %5682 = vmatmul.mubr.msk.f32.gmra.mrb[194].mxu1 %vm238_vm1, %v6366_v47  ;;  %5804 = vmatmul.mubr.msk.f32.gmra.mrb[194].mxu0 %vm238_vm1, %v6365_v61  ;;  %v5397_v27 = vpop.f32.mrb[89].mxu1 }
 0x198   : > { %5684 = vmatprep.mubr.msk.f32.mxu1 %vm6478_vm0, %v6477_v1  ;;  %5806 = vmatprep.mubr.msk.f32.mxu0 %vm6478_vm0, %v6477_v1 }
 0x199   : > { %v981_v52 = vsel %vm932_vm2, %v978_v63, %v980_v5  ;;  %v1430_v29 = vsel %vm1383_vm3, %v1427_v4, %v1429_v28 }
 0x19a   : > { %v1065_v35 = vadd.f32 %v981_v52, %v7125_v56  ;;  %v820_v40 = vpop.f32.mrb[90].mxu1  ;;  %v1266_v37 = vpop.f32.mrb[90].mxu0  ;;  %v7639_v16 = vadd.f32 %v1430_v29, %v1064_v55  ;;  %v6369_v29 = vld [vmem:[%s6534_s21 + $0x138] sm:$0xff] }
 0x19b   : > { %v982_v39 = vrot.slane %v820_v40, 1  ;;  %v1431_v30 = vrot.slane %v1266_v37, 2  ;;  %v5522_v22 = vpop.f32.mrb[91].mxu0  ;;  %5685 = vmatmul.mubr.msk.f32.gmra.mrb[196].mxu1 %vm238_vm1, %v6367_v46  ;;  %5807 = vmatmul.mubr.msk.f32.gmra.mrb[196].mxu0 %vm238_vm1, %v6366_v47  ;;  %v5400_v45 = vpop.f32.mrb[91].mxu1 }
 0x19c   : > { %5687 = vmatprep.mubr.msk.f32.mxu1 %vm6478_vm0, %v6477_v1  ;;  %5809 = vmatprep.mubr.msk.f32.mxu0 %vm6478_vm0, %v6477_v1 }
 0x19d   : > { %v983_v56 = vsel %vm932_vm2, %v980_v5, %v982_v39  ;;  %v1432_v36 = vsel %vm1383_vm3, %v1429_v28, %v1431_v30 }
 0x19e   : > { %v1066_v53 = vadd.f32 %v983_v56, %v7137_v60  ;;  %v825_v63 = vpop.f32.mrb[92].mxu1  ;;  %v1271_v4 = vpop.f32.mrb[92].mxu0  ;;  %v7651_v18 = vadd.f32 %v1432_v36, %v1065_v35  ;;  %v6370_v36 = vld [vmem:[%s6534_s21 + $0x140] sm:$0x3f] }
 0x19f   : > { %v984_v61 = vrot.slane %v825_v63, 1  ;;  %v1433_v2 = vrot.slane %v1271_v4, 2  ;;  %v5525_v48 = vpop.f32.mrb[93].mxu0  ;;  %5688 = vmatmul.mubr.msk.f32.gmra.mrb[198].mxu1 %vm238_vm1, %v6368_v32  ;;  %5810 = vmatmul.mubr.msk.f32.gmra.mrb[198].mxu0 %vm238_vm1, %v6367_v46  ;;  %v5403_v55 = vpop.f32.mrb[93].mxu1  ;;  %v4731_v4 = vld [vmem:[%s8908_s1 + $0x38] sm:$0xff] }
 0x1a0   : > { %5690 = vmatprep.mubr.msk.f32.mxu1 %vm6478_vm0, %v6477_v1  ;;  %5812 = vmatprep.mubr.msk.f32.mxu0 %vm6478_vm0, %v6477_v1 }
 0x1a1   : > { %v985_v60 = vsel %vm932_vm2, %v982_v39, %v984_v61  ;;  %v1434_v38 = vsel %vm1383_vm3, %v1431_v30, %v1433_v2 }
 0x1a2   : > { %v1067_v11 = vadd.f32 %v985_v60, %v7149_v0  ;;  %v830_v5 = vpop.f32.mrb[94].mxu1  ;;  %v1276_v28 = vpop.f32.mrb[94].mxu0  ;;  %v7663_v20 = vadd.f32 %v1434_v38, %v1066_v53 }
 0x1a3   : > { %v986_v47 = vrot.slane %v830_v5, 1  ;;  %v1435_v27 = vrot.slane %v1276_v28, 2  ;;  %v5528_v52 = vpop.f32.mrb[95].mxu0  ;;  %5691 = vmatmul.mubr.msk.f32.gmra.mrb[200].mxu1 %vm238_vm1, %v6369_v29  ;;  %5813 = vmatmul.mubr.msk.f32.gmra.mrb[200].mxu0 %vm238_vm1, %v6368_v32  ;;  %v5406_v35 = vpop.f32.mrb[95].mxu1 }
 0x1a4   : > { %5693 = vmatprep.mubr.msk.f32.mxu1 %vm6478_vm0, %v6477_v1  ;;  %5815 = vmatprep.mubr.msk.f32.mxu0 %vm6478_vm0, %v6477_v1 }
 0x1a5   : > { %v987_v0 = vsel %vm932_vm2, %v984_v61, %v986_v47  ;;  %v1436_v40 = vsel %vm1383_vm3, %v1433_v2, %v1435_v27 }
 0x1a6   : > { %v1068_v37 = vadd.f32 %v987_v0, %v7161_v7  ;;  %v835_v39 = vpop.f32.mrb[96].mxu1  ;;  %v1281_v30 = vpop.f32.mrb[96].mxu0  ;;  %v7675_v22 = vadd.f32 %v1436_v40, %v1067_v11  ;;  %v6371_v11 = vld [vmem:[%s6534_s21] sm:$0xff] }
 0x1a7   : > { %v988_v46 = vrot.slane %v835_v39, 1  ;;  %v1437_v45 = vrot.slane %v1281_v30, 2  ;;  %v5531_v56 = vpop.f32.mrb[97].mxu0  ;;  %5694 = vmatmul.mubr.msk.f32.gmra.mrb[202].mxu1 %vm238_vm1, %v6370_v36  ;;  %5816 = vmatmul.mubr.msk.f32.gmra.mrb[202].mxu0 %vm238_vm1, %v6369_v29  ;;  %v5409_v53 = vpop.f32.mrb[97].mxu1  ;;  %v6372_v39 = vld [vmem:[%s6534_s21 + $0x8] sm:$0xff] }
 0x1a8   : > { %5818 = vmatprep.mubr.msk.f32.mxu0 %vm6478_vm0, %v6477_v1  ;;  %5823 = vmatprep.mubr.msk.f32.mxu1 %vm6478_vm0, %v6477_v1 }
 0x1a9   : > { %v989_v7 = vsel %vm932_vm2, %v986_v47, %v988_v46  ;;  %v1438_v63 = vsel %vm1383_vm3, %v1435_v27, %v1437_v45  ;;  %v4773_v47 = vld [vmem:[%s8908_s1 + $0x40] sm:$0xff] }
 0x1aa   : > { %v1069_v61 = vadd.f32 %v989_v7, %v7173_v15  ;;  %v840_v2 = vpop.f32.mrb[98].mxu1  ;;  %v1286_v48 = vpop.f32.mrb[98].mxu0  ;;  %v7690_v32 = vadd.f32 %v1438_v63, %v1068_v37 }
 0x1ab   : > { %v990_v55 = vrot.slane %v840_v2, 1  ;;  %v1439_v60 = vrot.slane %v1286_v48, 2  ;;  %v5534_v38 = vpop.f32.mrb[99].mxu0  ;;  %5819 = vmatmul.mubr.msk.f32.gmra.mrb[204].mxu0 %vm238_vm1, %v6370_v36  ;;  %5824 = vmatmul.mubr.msk.f32.vlgmr.msra.gmra.mrb[204].mxu1 %vm238_vm1, %v6371_v11  ;;  %v5412_v5 = vpop.f32.mrb[99].mxu1 }
 0x1ac   : > { %6072 = vmatpush3.msra.mxu1 %v4731_v4  ;;  %5826 = vmatprep.mubr.msk.f32.mxu1 %vm6478_vm0, %v6477_v1 }
 0x1ad   : > { %v991_v15 = vsel %vm932_vm2, %v988_v46, %v990_v55  ;;  %v1440_v28 = vsel %vm1383_vm3, %v1437_v45, %v1439_v60  ;;  %5948 = vmatprep.mubr.msk.f32.mxu0 %vm6478_vm0, %v6477_v1 }
 0x1ae   : > { %v1070_v27 = vadd.f32 %v991_v15, %v7185_v23  ;;  %v845_v52 = vpop.f32.mrb[100].mxu1  ;;  %v1291_v29 = vpop.f32.mrb[100].mxu0  ;;  %v7705_v35 = vadd.f32 %v1440_v28, %v1069_v61  ;;  %v6373_v61 = vld [vmem:[%s6534_s21 + $0x10] sm:$0xff] }
 0x1af   : > { %v992_v0 = vrot.slane %v845_v52, 1  ;;  %v1441_v40 = vrot.slane %v1291_v29, 2  ;;  %v5537_v37 = vpop.f32.mrb[101].mxu0  ;;  %5827 = vmatmul.mubr.msk.f32.gmra.mrb[206].mxu1 %vm238_vm1, %v6372_v39  ;;  %5949 = vmatmul.mubr.msk.f32.vlgmr.msra.gmra.mrb[206].mxu0 %vm238_vm1, %v6371_v11  ;;  %v5415_v30 = vpop.f32.mrb[101].mxu1 }
 0x1b0   : > { %6197 = vmatpush3.msra.mxu0 %v4773_v47  ;;  %5829 = vmatprep.mubr.msk.f32.mxu1 %vm6478_vm0, %v6477_v1  ;;  %v6374_v47 = vld [vmem:[%s6534_s21 + $0x18] sm:$0xff] }
 0x1b1   : > { %v993_v23 = vsel %vm932_vm2, %v990_v55, %v992_v0  ;;  %v1442_v46 = vsel %vm1383_vm3, %v1439_v60, %v1441_v40  ;;  %5951 = vmatprep.mubr.msk.f32.mxu0 %vm6478_vm0, %v6477_v1 }
 0x1b2   : > { %v1071_v45 = vadd.f32 %v993_v23, %v7200_v33  ;;  %v850_v56 = vpop.f32.mrb[102].mxu1  ;;  %v1296_v36 = vpop.f32.mrb[102].mxu0  ;;  %v7717_v53 = vadd.f32 %v1442_v46, %v1070_v27  ;;  %v6375_v46 = vld [vmem:[%s6534_s21 + $0x20] sm:$0xff] }
 0x1b3   : > { %v994_v7 = vrot.slane %v850_v56, 1  ;;  %v1443_v63 = vrot.slane %v1296_v36, 2  ;;  %v5540_v4 = vpop.f32.mrb[103].mxu0  ;;  %5830 = vmatmul.mubr.msk.f32.gmra.mrb[208].mxu1 %vm238_vm1, %v6373_v61  ;;  %5952 = vmatmul.mubr.msk.f32.gmra.mrb[208].mxu0 %vm238_vm1, %v6372_v39  ;;  %v5418_v2 = vpop.f32.mrb[103].mxu1 }
 0x1b4   : > { %5832 = vmatprep.mubr.msk.f32.mxu1 %vm6478_vm0, %v6477_v1  ;;  %5954 = vmatprep.mubr.msk.f32.mxu0 %vm6478_vm0, %v6477_v1 }
 0x1b5   : > { %v995_v33 = vsel %vm932_vm2, %v992_v0, %v994_v7  ;;  %v1444_v48 = vsel %vm1383_vm3, %v1441_v40, %v1443_v63 }
 0x1b6   : > { %v1072_v55 = vadd.f32 %v995_v33, %v7216_v43  ;;  %v855_v60 = vpop.f32.mrb[104].mxu1  ;;  %v1301_v38 = vpop.f32.mrb[104].mxu0  ;;  %v7729_v11 = vadd.f32 %v1444_v48, %v1071_v45  ;;  %v6376_v48 = vld [vmem:[%s6534_s21 + $0x28] sm:$0xff] }
 0x1b7   : > { %v996_v5 = vrot.slane %v855_v60, 1  ;;  %v1445_v15 = vrot.slane %v1301_v38, 2  ;;  %v5543_v28 = vpop.f32.mrb[105].mxu0  ;;  %5833 = vmatmul.mubr.msk.f32.gmra.mrb[210].mxu1 %vm238_vm1, %v6374_v47  ;;  %5955 = vmatmul.mubr.msk.f32.gmra.mrb[210].mxu0 %vm238_vm1, %v6373_v61  ;;  %v5421_v27 = vpop.f32.mrb[105].mxu1 }
 0x1b8   : > { %5835 = vmatprep.mubr.msk.f32.mxu1 %vm6478_vm0, %v6477_v1  ;;  %5957 = vmatprep.mubr.msk.f32.mxu0 %vm6478_vm0, %v6477_v1 }
 0x1b9   : > { %v997_v43 = vsel %vm932_vm2, %v994_v7, %v996_v5  ;;  %v1446_v52 = vsel %vm1383_vm3, %v1443_v63, %v1445_v15 }
 0x1ba   : > { %v1073_v29 = vadd.f32 %v997_v43, %v7229_v50  ;;  %v860_v0 = vpop.f32.mrb[106].mxu1  ;;  %v1306_v40 = vpop.f32.mrb[106].mxu0  ;;  %v7741_v37 = vadd.f32 %v1446_v52, %v1072_v55  ;;  %v6377_v52 = vld [vmem:[%s6534_s21 + $0x30] sm:$0xff] }
 0x1bb   : > { %v998_v39 = vrot.slane %v860_v0, 1  ;;  %v1447_v30 = vrot.slane %v1306_v40, 2  ;;  %v5546_v23 = vpop.f32.mrb[107].mxu0  ;;  %5836 = vmatmul.mubr.msk.f32.gmra.mrb[212].mxu1 %vm238_vm1, %v6375_v46  ;;  %5958 = vmatmul.mubr.msk.f32.gmra.mrb[212].mxu0 %vm238_vm1, %v6374_v47  ;;  %v5424_v45 = vpop.f32.mrb[107].mxu1 }
 0x1bc   : > { %5838 = vmatprep.mubr.msk.f32.mxu1 %vm6478_vm0, %v6477_v1  ;;  %5960 = vmatprep.mubr.msk.f32.mxu0 %vm6478_vm0, %v6477_v1 }
 0x1bd   : > { %v999_v50 = vsel %vm932_vm2, %v996_v5, %v998_v39  ;;  %v1448_v56 = vsel %vm1383_vm3, %v1445_v15, %v1447_v30 }
 0x1be   : > { %v1074_v36 = vadd.f32 %v999_v50, %v7241_v57  ;;  %v865_v7 = vpop.f32.mrb[108].mxu1  ;;  %v1311_v63 = vpop.f32.mrb[108].mxu0  ;;  %v7753_v4 = vadd.f32 %v1448_v56, %v1073_v29  ;;  %v6378_v56 = vld [vmem:[%s6534_s21 + $0x38] sm:$0xff] }
 0x1bf   : > { %v1000_v61 = vrot.slane %v865_v7, 1  ;;  %v1449_v2 = vrot.slane %v1311_v63, 2  ;;  %v5549_v33 = vpop.f32.mrb[109].mxu0  ;;  %5839 = vmatmul.mubr.msk.f32.gmra.mrb[214].mxu1 %vm238_vm1, %v6376_v48  ;;  %5961 = vmatmul.mubr.msk.f32.gmra.mrb[214].mxu0 %vm238_vm1, %v6375_v46  ;;  %v5427_v55 = vpop.f32.mrb[109].mxu1 }
 0x1c0   : > { %5841 = vmatprep.mubr.msk.f32.mxu1 %vm6478_vm0, %v6477_v1  ;;  %5963 = vmatprep.mubr.msk.f32.mxu0 %vm6478_vm0, %v6477_v1 }
 0x1c1   : > { %v1001_v57 = vsel %vm932_vm2, %v998_v39, %v1000_v61  ;;  %v1450_v60 = vsel %vm1383_vm3, %v1447_v30, %v1449_v2 }
 0x1c2   : > { %v1075_v38 = vadd.f32 %v1001_v57, %v7253_v62  ;;  %v870_v5 = vpop.f32.mrb[110].mxu1  ;;  %v1316_v15 = vpop.f32.mrb[110].mxu0  ;;  %v7765_v28 = vadd.f32 %v1450_v60, %v1074_v36  ;;  %v6379_v57 = vld [vmem:[%s6534_s21 + $0x40] sm:$0xff] }
 0x1c3   : > { %v1002_v47 = vrot.slane %v870_v5, 1  ;;  %v1451_v27 = vrot.slane %v1316_v15, 2  ;;  %v5552_v43 = vpop.f32.mrb[111].mxu0  ;;  %5842 = vmatmul.mubr.msk.f32.gmra.mrb[216].mxu1 %vm238_vm1, %v6377_v52  ;;  %5964 = vmatmul.mubr.msk.f32.gmra.mrb[216].mxu0 %vm238_vm1, %v6376_v48  ;;  %v5430_v29 = vpop.f32.mrb[111].mxu1 }
 0x1c4   : > { %5844 = vmatprep.mubr.msk.f32.mxu1 %vm6478_vm0, %v6477_v1  ;;  %5966 = vmatprep.mubr.msk.f32.mxu0 %vm6478_vm0, %v6477_v1 }
 0x1c5   : > { %v1003_v62 = vsel %vm932_vm2, %v1000_v61, %v1002_v47  ;;  %v1452_v0 = vsel %vm1383_vm3, %v1449_v2, %v1451_v27 }
 0x1c6   : > { %v1076_v40 = vadd.f32 %v1003_v62, %v7265_v9  ;;  %v875_v39 = vpop.f32.mrb[112].mxu1  ;;  %v1321_v30 = vpop.f32.mrb[112].mxu0  ;;  %v7777_v23 = vadd.f32 %v1452_v0, %v1075_v38  ;;  %v6381_v0 = vld [vmem:[%s6534_s21 + $0x50] sm:$0xff] }
 0x1c7   : > { %v1004_v46 = vrot.slane %v875_v39, 1  ;;  %v1453_v45 = vrot.slane %v1321_v30, 2  ;;  %v5555_v50 = vpop.f32.mrb[113].mxu0  ;;  %5845 = vmatmul.mubr.msk.f32.gmra.mrb[218].mxu1 %vm238_vm1, %v6378_v56  ;;  %5967 = vmatmul.mubr.msk.f32.gmra.mrb[218].mxu0 %vm238_vm1, %v6377_v52  ;;  %v5433_v36 = vpop.f32.mrb[113].mxu1 }
 0x1c8   : > { %5847 = vmatprep.mubr.msk.f32.mxu1 %vm6478_vm0, %v6477_v1  ;;  %5969 = vmatprep.mubr.msk.f32.mxu0 %vm6478_vm0, %v6477_v1 }
 0x1c9   : > { %v1005_v9 = vsel %vm932_vm2, %v1002_v47, %v1004_v46  ;;  %v1454_v7 = vsel %vm1383_vm3, %v1451_v27, %v1453_v45  ;;  %v6380_v27 = vld [vmem:[%s6534_s21 + $0x48] sm:$0xff] }
 0x1ca   : > { %v1077_v63 = vadd.f32 %v1005_v9, %v7277_v19  ;;  %v1326_v61 = vpop.f32.mrb[114].mxu0  ;;  %v880_v2 = vpop.f32.mrb[114].mxu1  ;;  %v7789_v33 = vadd.f32 %v1454_v7, %v1076_v40  ;;  %v6383_v7 = vld [vmem:[%s6534_s21 + $0x60] sm:$0xff] }
 0x1cb   : > { %v1455_v48 = vrot.slane %v1326_v61, 2  ;;  %v5558_v55 = vpop.f32.mrb[115].mxu0  ;;  %5848 = vmatmul.mubr.msk.f32.gmra.mrb[220].mxu1 %vm238_vm1, %v6379_v57  ;;  %5970 = vmatmul.mubr.msk.f32.gmra.mrb[220].mxu0 %vm238_vm1, %v6378_v56  ;;  %v5436_v60 = vpop.f32.mrb[115].mxu1 }
 0x1cc   : > { %5850 = vmatprep.mubr.msk.f32.mxu1 %vm6478_vm0, %v6477_v1  ;;  %5972 = vmatprep.mubr.msk.f32.mxu0 %vm6478_vm0, %v6477_v1  ;;  %v6384_v55 = vld [vmem:[%s6534_s21 + $0x68] sm:$0xff] }
 0x1cd   : > { %v1456_v19 = vsel %vm1383_vm3, %v1453_v45, %v1455_v48  ;;  %v6382_v45 = vld [vmem:[%s6534_s21 + $0x58] sm:$0xff] }
 0x1ce   : > { %v7799_v38 = vadd.f32 %v1456_v19, %v1077_v63  ;;  %v1331_v5 = vpop.f32.mrb[116].mxu0  ;;  %v884_v15 = vpop.f32.mrb[116].mxu1 }
 0x1cf   : > { %v5561_v47 = vpop.f32.mrb[117].mxu0  ;;  %5851 = vmatmul.mubr.msk.f32.gmra.mrb[222].mxu1 %vm238_vm1, %v6380_v27  ;;  %5973 = vmatmul.mubr.msk.f32.gmra.mrb[222].mxu0 %vm238_vm1, %v6379_v57  ;;  %v5439_v43 = vpop.f32.mrb[117].mxu1  ;;  %v6385_v15 = vld [vmem:[%s6534_s21 + $0x70] sm:$0xff] }
 0x1d0   : > { %5853 = vmatprep.mubr.msk.f32.mxu1 %vm6478_vm0, %v6477_v1  ;;  %5975 = vmatprep.mubr.msk.f32.mxu0 %vm6478_vm0, %v6477_v1 }
 0x1d2   : > { %v1335_v52 = vpop.f32.mrb[118].mxu0  ;;  %v888_v29 = vpop.f32.mrb[118].mxu1 }
 0x1d3   : > { %v5564_v62 = vpop.f32.mrb[119].mxu0  ;;  %5854 = vmatmul.mubr.msk.f32.gmra.mrb[224].mxu1 %vm238_vm1, %v6381_v0  ;;  %5976 = vmatmul.mubr.msk.f32.gmra.mrb[224].mxu0 %vm238_vm1, %v6380_v27  ;;  %v5442_v40 = vpop.f32.mrb[119].mxu1 }
 0x1d4   : > { %5856 = vmatprep.mubr.msk.f32.mxu1 %vm6478_vm0, %v6477_v1  ;;  %5978 = vmatprep.mubr.msk.f32.mxu0 %vm6478_vm0, %v6477_v1 }
 0x1d6   : > { %v1339_v39 = vpop.f32.mrb[120].mxu0  ;;  %v892_v30 = vpop.f32.mrb[120].mxu1 }
 0x1d7   : > { %v5567_v46 = vpop.f32.mrb[121].mxu0  ;;  %5857 = vmatmul.mubr.msk.f32.gmra.mrb[226].mxu1 %vm238_vm1, %v6382_v45  ;;  %5979 = vmatmul.mubr.msk.f32.gmra.mrb[226].mxu0 %vm238_vm1, %v6381_v0  ;;  %v5445_v50 = vpop.f32.mrb[121].mxu1  ;;  %v6386_v0 = vld [vmem:[%s6534_s21 + $0x78] sm:$0xff] }
 0x1d8   : > { %5859 = vmatprep.mubr.msk.f32.mxu1 %vm6478_vm0, %v6477_v1  ;;  %5981 = vmatprep.mubr.msk.f32.mxu0 %vm6478_vm0, %v6477_v1 }
 0x1da   : > { %v1343_v56 = vpop.f32.mrb[122].mxu0  ;;  %v1597_v36 = vpop.f32.mrb[122].mxu1 }
 0x1db   : > { %v5570_v9 = vpop.f32.mrb[123].mxu0  ;;  %5860 = vmatmul.mubr.msk.f32.gmra.mrb[228].mxu1 %vm238_vm1, %v6383_v7  ;;  %5982 = vmatmul.mubr.msk.f32.gmra.mrb[228].mxu0 %vm238_vm1, %v6382_v45  ;;  %v5575_v63 = vpop.f32.mrb[123].mxu1 }
 0x1dc   : > { %5862 = vmatprep.mubr.msk.f32.mxu1 %vm6478_vm0, %v6477_v1  ;;  %5984 = vmatprep.mubr.msk.f32.mxu0 %vm6478_vm0, %v6477_v1 }
 0x1de   : > { %v2047_v61 = vpop.f32.mrb[124].mxu0  ;;  %v1601_v2 = vpop.f32.mrb[124].mxu1 }
 0x1df   : > { %v5700_v48 = vpop.f32.mrb[125].mxu0  ;;  %5863 = vmatmul.mubr.msk.f32.gmra.mrb[230].mxu1 %vm238_vm1, %v6384_v55  ;;  %5985 = vmatmul.mubr.msk.f32.gmra.mrb[230].mxu0 %vm238_vm1, %v6383_v7  ;;  %v5578_v57 = vpop.f32.mrb[125].mxu1  ;;  %v6387_v7 = vld [vmem:[%s6534_s21 + $0x80] sm:$0xff] }
 0x1e0   : > { %5865 = vmatprep.mubr.msk.f32.mxu1 %vm6478_vm0, %v6477_v1  ;;  %5987 = vmatprep.mubr.msk.f32.mxu0 %vm6478_vm0, %v6477_v1 }
 0x1e2   : > { %v2051_v60 = vpop.f32.mrb[126].mxu0  ;;  %v1605_v19 = vpop.f32.mrb[126].mxu1 }
 0x1e3   : > { %v5703_v5 = vpop.f32.mrb[127].mxu0  ;;  %5866 = vmatmul.mubr.msk.f32.gmra.mrb[232].mxu1 %vm238_vm1, %v6385_v15  ;;  %5988 = vmatmul.mubr.msk.f32.gmra.mrb[232].mxu0 %vm238_vm1, %v6384_v55  ;;  %v5581_v47 = vpop.f32.mrb[127].mxu1  ;;  %v1834_v52 = vrot.slane %v1605_v19, 2 }
 0x1e4   : > { %5868 = vmatprep.mubr.msk.f32.mxu1 %vm6478_vm0, %v6477_v1  ;;  %5990 = vmatprep.mubr.msk.f32.mxu0 %vm6478_vm0, %v6477_v1 }
 0x1e6   : > { %v1610_v27 = vpop.f32.mrb[128].mxu1  ;;  %v2055_v43 = vpop.f32.mrb[128].mxu0 }
 0x1e7   : > { %v1835_v29 = vrot.slane %v1610_v27, 2  ;;  %v5706_v62 = vpop.f32.mrb[129].mxu0  ;;  %5869 = vmatmul.mubr.msk.f32.gmra.mrb[234].mxu1 %vm238_vm1, %v6386_v0  ;;  %5991 = vmatmul.mubr.msk.f32.gmra.mrb[234].mxu0 %vm238_vm1, %v6385_v15  ;;  %v5584_v40 = vpop.f32.mrb[129].mxu1  ;;  %v2285_v50 = vrot.slane %v2055_v43, 3  ;;  %v6388_v15 = vld [vmem:[%s6534_s21 + $0x88] sm:$0xff] }
 0x1e8   : > { %5871 = vmatprep.mubr.msk.f32.mxu1 %vm6478_vm0, %v6477_v1  ;;  %5993 = vmatprep.mubr.msk.f32.mxu0 %vm6478_vm0, %v6477_v1 }
 0x1e9   : > { %v1836_v39 = vsel %vm1383_vm3, %v1834_v52, %v1835_v29 }
 0x1ea   : > { %v1943_v30 = vadd.f32 %v1836_v39, %v7368_v24  ;;  %v1615_v46 = vpop.f32.mrb[130].mxu1  ;;  %v2060_v45 = vpop.f32.mrb[130].mxu0 }
 0x1eb   : > { %v1837_v56 = vrot.slane %v1615_v46, 2  ;;  %v2286_v36 = vrot.slane %v2060_v45, 3  ;;  %v5709_v9 = vpop.f32.mrb[131].mxu0  ;;  %5872 = vmatmul.mubr.msk.f32.gmra.mrb[236].mxu1 %vm238_vm1, %v6387_v7  ;;  %5994 = vmatmul.mubr.msk.f32.gmra.mrb[236].mxu0 %vm238_vm1, %v6386_v0  ;;  %v5587_v63 = vpop.f32.mrb[131].mxu1 }
 0x1ec   : > { %5874 = vmatprep.mubr.msk.f32.mxu1 %vm6478_vm0, %v6477_v1  ;;  %5996 = vmatprep.mubr.msk.f32.mxu0 %vm6478_vm0, %v6477_v1 }
 0x1ed   : > { %v1838_v24 = vsel %vm1383_vm3, %v1835_v29, %v1837_v56  ;;  %v2287_v61 = vsel %vm2284_vm4, %v2285_v50, %v2286_v36 }
 0x1ee   : > { %v1944_v2 = vadd.f32 %v1838_v24, %v7381_v58  ;;  %v7862_v48 = vadd.f32 %v2287_v61, %v1943_v30  ;;  %v1620_v55 = vpop.f32.mrb[132].mxu1  ;;  %v2065_v57 = vpop.f32.mrb[132].mxu0  ;;  %v6389_v30 = vld [vmem:[%s6534_s21 + $0x90] sm:$0xff]  ;;  %v6390_v61 = vld [vmem:[%s6534_s21 + $0x98] sm:$0xff] }
 0x1ef   : > { %v1839_v60 = vrot.slane %v1620_v55, 2  ;;  %v2288_v19 = vrot.slane %v2065_v57, 3  ;;  %v5712_v5 = vpop.f32.mrb[133].mxu0  ;;  %5875 = vmatmul.mubr.msk.f32.gmra.mrb[238].mxu1 %vm238_vm1, %v6388_v15  ;;  %5997 = vmatmul.mubr.msk.f32.gmra.mrb[238].mxu0 %vm238_vm1, %v6387_v7  ;;  %v5590_v47 = vpop.f32.mrb[133].mxu1 }
 0x1f0   : > { %5877 = vmatprep.mubr.msk.f32.mxu1 %vm6478_vm0, %v6477_v1  ;;  %5999 = vmatprep.mubr.msk.f32.mxu0 %vm6478_vm0, %v6477_v1 }
 0x1f1   : > { %v1840_v58 = vsel %vm1383_vm3, %v1837_v56, %v1839_v60  ;;  %v2289_v27 = vsel %vm2284_vm4, %v2286_v36, %v2288_v19 }
 0x1f2   : > { %v1945_v43 = vadd.f32 %v1840_v58, %v7394_v25  ;;  %v7874_v52 = vadd.f32 %v2289_v27, %v1944_v2  ;;  %v1625_v29 = vpop.f32.mrb[134].mxu1  ;;  %v2070_v62 = vpop.f32.mrb[134].mxu0  ;;  %v6391_v27 = vld [vmem:[%s6534_s21 + $0xa0] sm:$0xff] }
 0x1f3   : > { %v1841_v0 = vrot.slane %v1625_v29, 2  ;;  %v2290_v40 = vrot.slane %v2070_v62, 3  ;;  %v5715_v39 = vpop.f32.mrb[135].mxu0  ;;  %5878 = vmatmul.mubr.msk.f32.gmra.mrb[240].mxu1 %vm238_vm1, %v6389_v30  ;;  %6000 = vmatmul.mubr.msk.f32.gmra.mrb[240].mxu0 %vm238_vm1, %v6388_v15  ;;  %v5593_v46 = vpop.f32.mrb[135].mxu1 }
 0x1f4   : > { %5880 = vmatprep.mubr.msk.f32.mxu1 %vm6478_vm0, %v6477_v1  ;;  %6002 = vmatprep.mubr.msk.f32.mxu0 %vm6478_vm0, %v6477_v1 }
 0x1f5   : > { %v1842_v25 = vsel %vm1383_vm3, %v1839_v60, %v1841_v0  ;;  %v2291_v45 = vsel %vm2284_vm4, %v2288_v19, %v2290_v40 }
 0x1f6   : > { %v1946_v50 = vadd.f32 %v1842_v25, %v7407_v51  ;;  %v7886_v56 = vadd.f32 %v2291_v45, %v1945_v43  ;;  %v1630_v36 = vpop.f32.mrb[136].mxu1  ;;  %v2075_v9 = vpop.f32.mrb[136].mxu0  ;;  %v6392_v45 = vld [vmem:[%s6534_s21 + $0xa8] sm:$0xff] }
 0x1f7   : > { %v1843_v7 = vrot.slane %v1630_v36, 2  ;;  %v2292_v63 = vrot.slane %v2075_v9, 3  ;;  %v5718_v24 = vpop.f32.mrb[137].mxu0  ;;  %5881 = vmatmul.mubr.msk.f32.gmra.mrb[242].mxu1 %vm238_vm1, %v6390_v61  ;;  %6003 = vmatmul.mubr.msk.f32.gmra.mrb[242].mxu0 %vm238_vm1, %v6389_v30  ;;  %v5596_v2 = vpop.f32.mrb[137].mxu1 }
 0x1f8   : > { %5883 = vmatprep.mubr.msk.f32.mxu1 %vm6478_vm0, %v6477_v1  ;;  %6005 = vmatprep.mubr.msk.f32.mxu0 %vm6478_vm0, %v6477_v1 }
 0x1f9   : > { %v1844_v51 = vsel %vm1383_vm3, %v1841_v0, %v1843_v7  ;;  %v2293_v55 = vsel %vm2284_vm4, %v2290_v40, %v2292_v63 }
 0x1fa   : > { %v1947_v57 = vadd.f32 %v1844_v51, %v7420_v17  ;;  %v7898_v60 = vadd.f32 %v2293_v55, %v1946_v50  ;;  %v1635_v19 = vpop.f32.mrb[138].mxu1  ;;  %v2080_v5 = vpop.f32.mrb[138].mxu0  ;;  %v6393_v55 = vld [vmem:[%s6534_s21 + $0xb0] sm:$0xff] }
 0x1fb   : > { %v1845_v15 = vrot.slane %v1635_v19, 2  ;;  %v2294_v47 = vrot.slane %v2080_v5, 3  ;;  %v5721_v58 = vpop.f32.mrb[139].mxu0  ;;  %5884 = vmatmul.mubr.msk.f32.gmra.mrb[244].mxu1 %vm238_vm1, %v6391_v27  ;;  %6006 = vmatmul.mubr.msk.f32.gmra.mrb[244].mxu0 %vm238_vm1, %v6390_v61  ;;  %v5599_v43 = vpop.f32.mrb[139].mxu1 }
 0x1fc   : > { %5886 = vmatprep.mubr.msk.f32.mxu1 %vm6478_vm0, %v6477_v1  ;;  %6008 = vmatprep.mubr.msk.f32.mxu0 %vm6478_vm0, %v6477_v1 }
 0x1fd   : > { %v1846_v17 = vsel %vm1383_vm3, %v1843_v7, %v1845_v15  ;;  %v2295_v29 = vsel %vm2284_vm4, %v2292_v63, %v2294_v47 }
 0x1fe   : > { %v1948_v62 = vadd.f32 %v1846_v17, %v7433_v34  ;;  %v7910_v0 = vadd.f32 %v2295_v29, %v1947_v57  ;;  %v1640_v40 = vpop.f32.mrb[140].mxu1  ;;  %v2085_v39 = vpop.f32.mrb[140].mxu0  ;;  %v6394_v29 = vld [vmem:[%s6534_s21 + $0xb8] sm:$0xff] }
 0x1ff   : > { %v1847_v30 = vrot.slane %v1640_v40, 2  ;;  %v2296_v46 = vrot.slane %v2085_v39, 3  ;;  %v5724_v25 = vpop.f32.mrb[141].mxu0  ;;  %5887 = vmatmul.mubr.msk.f32.gmra.mrb[246].mxu1 %vm238_vm1, %v6392_v45  ;;  %6009 = vmatmul.mubr.msk.f32.gmra.mrb[246].mxu0 %vm238_vm1, %v6391_v27  ;;  %v5602_v50 = vpop.f32.mrb[141].mxu1 }
 0x200   : > { %5889 = vmatprep.mubr.msk.f32.mxu1 %vm6478_vm0, %v6477_v1  ;;  %6011 = vmatprep.mubr.msk.f32.mxu0 %vm6478_vm0, %v6477_v1 }
 0x201   : > { %v1848_v34 = vsel %vm1383_vm3, %v1845_v15, %v1847_v30  ;;  %v2297_v36 = vsel %vm2284_vm4, %v2294_v47, %v2296_v46 }
 0x202   : > { %v1949_v9 = vadd.f32 %v1848_v34, %v7446_v26  ;;  %v7922_v7 = vadd.f32 %v2297_v36, %v1948_v62  ;;  %v1645_v63 = vpop.f32.mrb[142].mxu1  ;;  %v2090_v24 = vpop.f32.mrb[142].mxu0  ;;  %v6395_v36 = vld [vmem:[%s6534_s21 + $0xc0] sm:$0xff] }
 0x203   : > { %v1849_v61 = vrot.slane %v1645_v63, 2  ;;  %v2298_v2 = vrot.slane %v2090_v24, 3  ;;  %v5727_v51 = vpop.f32.mrb[143].mxu0  ;;  %5890 = vmatmul.mubr.msk.f32.gmra.mrb[248].mxu1 %vm238_vm1, %v6393_v55  ;;  %6012 = vmatmul.mubr.msk.f32.gmra.mrb[248].mxu0 %vm238_vm1, %v6392_v45  ;;  %v5605_v57 = vpop.f32.mrb[143].mxu1 }
 0x204   : > { %5892 = vmatprep.mubr.msk.f32.mxu1 %vm6478_vm0, %v6477_v1  ;;  %6014 = vmatprep.mubr.msk.f32.mxu0 %vm6478_vm0, %v6477_v1 }
 0x205   : > { %v1850_v26 = vsel %vm1383_vm3, %v1847_v30, %v1849_v61  ;;  %v2299_v19 = vsel %vm2284_vm4, %v2296_v46, %v2298_v2 }
 0x206   : > { %v1950_v5 = vadd.f32 %v1850_v26, %v7459_v3  ;;  %v7934_v15 = vadd.f32 %v2299_v19, %v1949_v9  ;;  %v1650_v47 = vpop.f32.mrb[144].mxu1  ;;  %v2095_v58 = vpop.f32.mrb[144].mxu0  ;;  %v6396_v19 = vld [vmem:[%s6534_s21 + $0xc8] sm:$0xff] }
 0x207   : > { %v1851_v27 = vrot.slane %v1650_v47, 2  ;;  %v2300_v43 = vrot.slane %v2095_v58, 3  ;;  %v5730_v17 = vpop.f32.mrb[145].mxu0  ;;  %5893 = vmatmul.mubr.msk.f32.gmra.mrb[250].mxu1 %vm238_vm1, %v6394_v29  ;;  %6015 = vmatmul.mubr.msk.f32.gmra.mrb[250].mxu0 %vm238_vm1, %v6393_v55  ;;  %v5608_v62 = vpop.f32.mrb[145].mxu1 }
 0x208   : > { %5895 = vmatprep.mubr.msk.f32.mxu1 %vm6478_vm0, %v6477_v1  ;;  %6017 = vmatprep.mubr.msk.f32.mxu0 %vm6478_vm0, %v6477_v1 }
 0x209   : > { %v1852_v3 = vsel %vm1383_vm3, %v1849_v61, %v1851_v27  ;;  %v2301_v40 = vsel %vm2284_vm4, %v2298_v2, %v2300_v43 }
 0x20a   : > { %v1951_v39 = vadd.f32 %v1852_v3, %v7471_v59  ;;  %v7946_v30 = vadd.f32 %v2301_v40, %v1950_v5  ;;  %v1655_v46 = vpop.f32.mrb[146].mxu1  ;;  %v2100_v25 = vpop.f32.mrb[146].mxu0  ;;  %v6397_v40 = vld [vmem:[%s6534_s21 + $0xd0] sm:$0xff] }
 0x20b   : > { %v1853_v45 = vrot.slane %v1655_v46, 2  ;;  %v2302_v50 = vrot.slane %v2100_v25, 3  ;;  %v5733_v34 = vpop.f32.mrb[147].mxu0  ;;  %5896 = vmatmul.mubr.msk.f32.gmra.mrb[252].mxu1 %vm238_vm1, %v6395_v36  ;;  %6018 = vmatmul.mubr.msk.f32.gmra.mrb[252].mxu0 %vm238_vm1, %v6394_v29  ;;  %v5611_v9 = vpop.f32.mrb[147].mxu1 }
 0x20c   : > { %5898 = vmatprep.mubr.msk.f32.mxu1 %vm6478_vm0, %v6477_v1  ;;  %6020 = vmatprep.mubr.msk.f32.mxu0 %vm6478_vm0, %v6477_v1 }
 0x20d   : > { %v1854_v59 = vsel %vm1383_vm3, %v1851_v27, %v1853_v45  ;;  %v2303_v63 = vsel %vm2284_vm4, %v2300_v43, %v2302_v50 }
 0x20e   : > { %v1952_v24 = vadd.f32 %v1854_v59, %v7483_v42  ;;  %v7958_v61 = vadd.f32 %v2303_v63, %v1951_v39  ;;  %v1660_v2 = vpop.f32.mrb[148].mxu1  ;;  %v2105_v51 = vpop.f32.mrb[148].mxu0  ;;  %v6398_v63 = vld [vmem:[%s6534_s21 + $0xd8] sm:$0xff] }
 0x20f   : > { %v1855_v55 = vrot.slane %v1660_v2, 2  ;;  %v2304_v57 = vrot.slane %v2105_v51, 3  ;;  %v5736_v26 = vpop.f32.mrb[149].mxu0  ;;  %5899 = vmatmul.mubr.msk.f32.gmra.mrb[254].mxu1 %vm238_vm1, %v6396_v19  ;;  %6021 = vmatmul.mubr.msk.f32.gmra.mrb[254].mxu0 %vm238_vm1, %v6395_v36  ;;  %v5614_v5 = vpop.f32.mrb[149].mxu1 }
 0x210   : > { %5901 = vmatprep.mubr.msk.f32.mxu1 %vm6478_vm0, %v6477_v1  ;;  %6023 = vmatprep.mubr.msk.f32.mxu0 %vm6478_vm0, %v6477_v1 }
 0x211   : > { %v1856_v42 = vsel %vm1383_vm3, %v1853_v45, %v1855_v55  ;;  %v2305_v47 = vsel %vm2284_vm4, %v2302_v50, %v2304_v57 }
 0x212   : > { %v1953_v58 = vadd.f32 %v1856_v42, %v7495_v44  ;;  %v7970_v27 = vadd.f32 %v2305_v47, %v1952_v24  ;;  %v1665_v43 = vpop.f32.mrb[150].mxu1  ;;  %v2110_v17 = vpop.f32.mrb[150].mxu0  ;;  %v6399_v47 = vld [vmem:[%s6534_s21 + $0xe0] sm:$0xff] }
 0x213   : > { %v1857_v29 = vrot.slane %v1665_v43, 2  ;;  %v2306_v62 = vrot.slane %v2110_v17, 3  ;;  %v5739_v3 = vpop.f32.mrb[151].mxu0  ;;  %5902 = vmatmul.mubr.msk.f32.gmra.mrb[0].mxu1 %vm238_vm1, %v6397_v40  ;;  %6024 = vmatmul.mubr.msk.f32.gmra.mrb[0].mxu0 %vm238_vm1, %v6396_v19  ;;  %v5617_v39 = vpop.f32.mrb[151].mxu1 }
 0x214   : > { %5904 = vmatprep.mubr.msk.f32.mxu1 %vm6478_vm0, %v6477_v1  ;;  %6026 = vmatprep.mubr.msk.f32.mxu0 %vm6478_vm0, %v6477_v1 }
 0x215   : > { %v1858_v44 = vsel %vm1383_vm3, %v1855_v55, %v1857_v29  ;;  %v2307_v46 = vsel %vm2284_vm4, %v2304_v57, %v2306_v62 }
 0x216   : > { %v1954_v25 = vadd.f32 %v1858_v44, %v7507_v13  ;;  %v7982_v45 = vadd.f32 %v2307_v46, %v1953_v58  ;;  %v1670_v50 = vpop.f32.mrb[152].mxu1  ;;  %v2115_v34 = vpop.f32.mrb[152].mxu0  ;;  %v6400_v46 = vld [vmem:[%s6534_s21 + $0xe8] sm:$0xff] }
 0x217   : > { %v1859_v36 = vrot.slane %v1670_v50, 2  ;;  %v2308_v9 = vrot.slane %v2115_v34, 3  ;;  %v5742_v59 = vpop.f32.mrb[153].mxu0  ;;  %5905 = vmatmul.mubr.msk.f32.gmra.mrb[2].mxu1 %vm238_vm1, %v6398_v63  ;;  %6027 = vmatmul.mubr.msk.f32.gmra.mrb[2].mxu0 %vm238_vm1, %v6397_v40  ;;  %v5620_v24 = vpop.f32.mrb[153].mxu1 }
 0x218   : > { %5907 = vmatprep.mubr.msk.f32.mxu1 %vm6478_vm0, %v6477_v1  ;;  %6029 = vmatprep.mubr.msk.f32.mxu0 %vm6478_vm0, %v6477_v1 }
 0x219   : > { %v1860_v13 = vsel %vm1383_vm3, %v1857_v29, %v1859_v36  ;;  %v2309_v2 = vsel %vm2284_vm4, %v2306_v62, %v2308_v9 }
 0x21a   : > { %v1955_v51 = vadd.f32 %v1860_v13, %v7519_v21  ;;  %v7994_v55 = vadd.f32 %v2309_v2, %v1954_v25  ;;  %v1675_v57 = vpop.f32.mrb[154].mxu1  ;;  %v2120_v26 = vpop.f32.mrb[154].mxu0  ;;  %v6401_v2 = vld [vmem:[%s6534_s21 + $0xf0] sm:$0xff] }
 0x21b   : > { %v1861_v19 = vrot.slane %v1675_v57, 2  ;;  %v2310_v5 = vrot.slane %v2120_v26, 3  ;;  %v5745_v42 = vpop.f32.mrb[155].mxu0  ;;  %5908 = vmatmul.mubr.msk.f32.gmra.mrb[4].mxu1 %vm238_vm1, %v6399_v47  ;;  %6030 = vmatmul.mubr.msk.f32.gmra.mrb[4].mxu0 %vm238_vm1, %v6398_v63  ;;  %v5623_v58 = vpop.f32.mrb[155].mxu1 }
 0x21c   : > { %5910 = vmatprep.mubr.msk.f32.mxu1 %vm6478_vm0, %v6477_v1  ;;  %6032 = vmatprep.mubr.msk.f32.mxu0 %vm6478_vm0, %v6477_v1 }
 0x21d   : > { %v1862_v21 = vsel %vm1383_vm3, %v1859_v36, %v1861_v19  ;;  %v2311_v43 = vsel %vm2284_vm4, %v2308_v9, %v2310_v5 }
 0x21e   : > { %v1956_v17 = vadd.f32 %v1862_v21, %v7531_v31  ;;  %v8006_v29 = vadd.f32 %v2311_v43, %v1955_v51  ;;  %v1680_v62 = vpop.f32.mrb[156].mxu1  ;;  %v2125_v3 = vpop.f32.mrb[156].mxu0  ;;  %v6402_v43 = vld [vmem:[%s6534_s21 + $0xf8] sm:$0xff] }
 0x21f   : > { %v1863_v40 = vrot.slane %v1680_v62, 2  ;;  %v2312_v39 = vrot.slane %v2125_v3, 3  ;;  %v5748_v44 = vpop.f32.mrb[157].mxu0  ;;  %5911 = vmatmul.mubr.msk.f32.gmra.mrb[6].mxu1 %vm238_vm1, %v6400_v46  ;;  %6033 = vmatmul.mubr.msk.f32.gmra.mrb[6].mxu0 %vm238_vm1, %v6399_v47  ;;  %v5626_v25 = vpop.f32.mrb[157].mxu1 }
 0x220   : > { %5913 = vmatprep.mubr.msk.f32.mxu1 %vm6478_vm0, %v6477_v1  ;;  %6035 = vmatprep.mubr.msk.f32.mxu0 %vm6478_vm0, %v6477_v1 }
 0x221   : > { %v1864_v31 = vsel %vm1383_vm3, %v1861_v19, %v1863_v40  ;;  %v2313_v50 = vsel %vm2284_vm4, %v2310_v5, %v2312_v39 }
 0x222   : > { %v1957_v34 = vadd.f32 %v1864_v31, %v7543_v41  ;;  %v8018_v36 = vadd.f32 %v2313_v50, %v1956_v17  ;;  %v1685_v9 = vpop.f32.mrb[158].mxu1  ;;  %v2130_v59 = vpop.f32.mrb[158].mxu0  ;;  %v6403_v50 = vld [vmem:[%s6534_s21 + $0x100] sm:$0xff] }
 0x223   : > { %v1865_v63 = vrot.slane %v1685_v9, 2  ;;  %v2314_v24 = vrot.slane %v2130_v59, 3  ;;  %v5751_v13 = vpop.f32.mrb[159].mxu0  ;;  %5914 = vmatmul.mubr.msk.f32.gmra.mrb[8].mxu1 %vm238_vm1, %v6401_v2  ;;  %6036 = vmatmul.mubr.msk.f32.gmra.mrb[8].mxu0 %vm238_vm1, %v6400_v46  ;;  %v5629_v51 = vpop.f32.mrb[159].mxu1 }
 0x224   : > { %5916 = vmatprep.mubr.msk.f32.mxu1 %vm6478_vm0, %v6477_v1  ;;  %6038 = vmatprep.mubr.msk.f32.mxu0 %vm6478_vm0, %v6477_v1 }
 0x225   : > { %v1866_v41 = vsel %vm1383_vm3, %v1863_v40, %v1865_v63  ;;  %v2315_v57 = vsel %vm2284_vm4, %v2312_v39, %v2314_v24 }
 0x226   : > { %v1958_v26 = vadd.f32 %v1866_v41, %v7555_v49  ;;  %v8030_v19 = vadd.f32 %v2315_v57, %v1957_v34  ;;  %v1690_v5 = vpop.f32.mrb[160].mxu1  ;;  %v2135_v42 = vpop.f32.mrb[160].mxu0  ;;  %v6404_v57 = vld [vmem:[%s6534_s21 + $0x108] sm:$0xff] }
 0x227   : > { %v1867_v47 = vrot.slane %v1690_v5, 2  ;;  %v2316_v58 = vrot.slane %v2135_v42, 3  ;;  %v5754_v21 = vpop.f32.mrb[161].mxu0  ;;  %5917 = vmatmul.mubr.msk.f32.gmra.mrb[10].mxu1 %vm238_vm1, %v6402_v43  ;;  %6039 = vmatmul.mubr.msk.f32.gmra.mrb[10].mxu0 %vm238_vm1, %v6401_v2  ;;  %v5632_v17 = vpop.f32.mrb[161].mxu1 }
 0x228   : > { %5919 = vmatprep.mubr.msk.f32.mxu1 %vm6478_vm0, %v6477_v1  ;;  %6041 = vmatprep.mubr.msk.f32.mxu0 %vm6478_vm0, %v6477_v1 }
 0x229   : > { %v1868_v49 = vsel %vm1383_vm3, %v1865_v63, %v1867_v47  ;;  %v2317_v62 = vsel %vm2284_vm4, %v2314_v24, %v2316_v58 }
 0x22a   : > { %v1959_v3 = vadd.f32 %v1868_v49, %v7567_v54  ;;  %v8042_v40 = vadd.f32 %v2317_v62, %v1958_v26  ;;  %v1695_v39 = vpop.f32.mrb[162].mxu1  ;;  %v2140_v44 = vpop.f32.mrb[162].mxu0  ;;  %v6405_v62 = vld [vmem:[%s6534_s21 + $0x110] sm:$0xff] }
 0x22b   : > { %v1869_v46 = vrot.slane %v1695_v39, 2  ;;  %v2318_v25 = vrot.slane %v2140_v44, 3  ;;  %v5757_v31 = vpop.f32.mrb[163].mxu0  ;;  %5920 = vmatmul.mubr.msk.f32.gmra.mrb[12].mxu1 %vm238_vm1, %v6403_v50  ;;  %6042 = vmatmul.mubr.msk.f32.gmra.mrb[12].mxu0 %vm238_vm1, %v6402_v43  ;;  %v5635_v34 = vpop.f32.mrb[163].mxu1 }
 0x22c   : > { %5922 = vmatprep.mubr.msk.f32.mxu1 %vm6478_vm0, %v6477_v1  ;;  %6044 = vmatprep.mubr.msk.f32.mxu0 %vm6478_vm0, %v6477_v1 }
 0x22d   : > { %v1870_v54 = vsel %vm1383_vm3, %v1867_v47, %v1869_v46  ;;  %v2319_v9 = vsel %vm2284_vm4, %v2316_v58, %v2318_v25 }
 0x22e   : > { %v1960_v59 = vadd.f32 %v1870_v54, %v7579_v6  ;;  %v8054_v63 = vadd.f32 %v2319_v9, %v1959_v3  ;;  %v1700_v24 = vpop.f32.mrb[164].mxu1  ;;  %v2145_v13 = vpop.f32.mrb[164].mxu0  ;;  %v6406_v9 = vld [vmem:[%s6534_s21 + $0x118] sm:$0xff] }
 0x22f   : > { %v1871_v2 = vrot.slane %v1700_v24, 2  ;;  %v2320_v51 = vrot.slane %v2145_v13, 3  ;;  %v5760_v41 = vpop.f32.mrb[165].mxu0  ;;  %5923 = vmatmul.mubr.msk.f32.gmra.mrb[14].mxu1 %vm238_vm1, %v6404_v57  ;;  %6045 = vmatmul.mubr.msk.f32.gmra.mrb[14].mxu0 %vm238_vm1, %v6403_v50  ;;  %v5638_v26 = vpop.f32.mrb[165].mxu1 }
 0x230   : > { %5925 = vmatprep.mubr.msk.f32.mxu1 %vm6478_vm0, %v6477_v1  ;;  %6047 = vmatprep.mubr.msk.f32.mxu0 %vm6478_vm0, %v6477_v1 }
 0x231   : > { %v1872_v6 = vsel %vm1383_vm3, %v1869_v46, %v1871_v2  ;;  %v2321_v5 = vsel %vm2284_vm4, %v2318_v25, %v2320_v51 }
 0x232   : > { %v1961_v42 = vadd.f32 %v1872_v6, %v7591_v8  ;;  %v8066_v47 = vadd.f32 %v2321_v5, %v1960_v59  ;;  %v1705_v58 = vpop.f32.mrb[166].mxu1  ;;  %v2150_v21 = vpop.f32.mrb[166].mxu0  ;;  %v6407_v5 = vld [vmem:[%s6534_s21 + $0x120] sm:$0xff] }
 0x233   : > { %v1873_v43 = vrot.slane %v1705_v58, 2  ;;  %v2322_v17 = vrot.slane %v2150_v21, 3  ;;  %v5763_v49 = vpop.f32.mrb[167].mxu0  ;;  %5926 = vmatmul.mubr.msk.f32.gmra.mrb[16].mxu1 %vm238_vm1, %v6405_v62  ;;  %6048 = vmatmul.mubr.msk.f32.gmra.mrb[16].mxu0 %vm238_vm1, %v6404_v57  ;;  %v5641_v3 = vpop.f32.mrb[167].mxu1 }
 0x234   : > { %5928 = vmatprep.mubr.msk.f32.mxu1 %vm6478_vm0, %v6477_v1  ;;  %6050 = vmatprep.mubr.msk.f32.mxu0 %vm6478_vm0, %v6477_v1 }
 0x235   : > { %v1874_v8 = vsel %vm1383_vm3, %v1871_v2, %v1873_v43  ;;  %v2323_v39 = vsel %vm2284_vm4, %v2320_v51, %v2322_v17 }
 0x236   : > { %v1962_v44 = vadd.f32 %v1874_v8, %v7603_v10  ;;  %v8078_v46 = vadd.f32 %v2323_v39, %v1961_v42  ;;  %v1710_v25 = vpop.f32.mrb[168].mxu1  ;;  %v2155_v31 = vpop.f32.mrb[168].mxu0  ;;  %v6408_v39 = vld [vmem:[%s6534_s21 + $0x128] sm:$0xff] }
 0x237   : > { %v1875_v50 = vrot.slane %v1710_v25, 2  ;;  %v2324_v34 = vrot.slane %v2155_v31, 3  ;;  %v5766_v54 = vpop.f32.mrb[169].mxu0  ;;  %5929 = vmatmul.mubr.msk.f32.gmra.mrb[18].mxu1 %vm238_vm1, %v6406_v9  ;;  %6051 = vmatmul.mubr.msk.f32.gmra.mrb[18].mxu0 %vm238_vm1, %v6405_v62  ;;  %v5644_v59 = vpop.f32.mrb[169].mxu1 }
 0x238   : > { %5931 = vmatprep.mubr.msk.f32.mxu1 %vm6478_vm0, %v6477_v1  ;;  %6053 = vmatprep.mubr.msk.f32.mxu0 %vm6478_vm0, %v6477_v1 }
 0x239   : > { %v1876_v10 = vsel %vm1383_vm3, %v1873_v43, %v1875_v50  ;;  %v2325_v24 = vsel %vm2284_vm4, %v2322_v17, %v2324_v34 }
 0x23a   : > { %v1963_v13 = vadd.f32 %v1876_v10, %v7615_v12  ;;  %v8090_v2 = vadd.f32 %v2325_v24, %v1962_v44  ;;  %v1715_v51 = vpop.f32.mrb[170].mxu1  ;;  %v2160_v41 = vpop.f32.mrb[170].mxu0  ;;  %v6409_v24 = vld [vmem:[%s6534_s21 + $0x130] sm:$0xff] }
 0x23b   : > { %v1877_v57 = vrot.slane %v1715_v51, 2  ;;  %v2326_v26 = vrot.slane %v2160_v41, 3  ;;  %v5769_v6 = vpop.f32.mrb[171].mxu0  ;;  %5932 = vmatmul.mubr.msk.f32.gmra.mrb[20].mxu1 %vm238_vm1, %v6407_v5  ;;  %6054 = vmatmul.mubr.msk.f32.gmra.mrb[20].mxu0 %vm238_vm1, %v6406_v9  ;;  %v5647_v42 = vpop.f32.mrb[171].mxu1 }
 0x23c   : > { %5934 = vmatprep.mubr.msk.f32.mxu1 %vm6478_vm0, %v6477_v1  ;;  %6056 = vmatprep.mubr.msk.f32.mxu0 %vm6478_vm0, %v6477_v1 }
 0x23d   : > { %v1878_v12 = vsel %vm1383_vm3, %v1875_v50, %v1877_v57  ;;  %v2327_v58 = vsel %vm2284_vm4, %v2324_v34, %v2326_v26 }
 0x23e   : > { %v1964_v21 = vadd.f32 %v1878_v12, %v7627_v14  ;;  %v8102_v43 = vadd.f32 %v2327_v58, %v1963_v13  ;;  %v1720_v17 = vpop.f32.mrb[172].mxu1  ;;  %v2165_v49 = vpop.f32.mrb[172].mxu0  ;;  %v6410_v58 = vld [vmem:[%s6534_s21 + $0x138] sm:$0xff] }
 0x23f   : > { %v1879_v62 = vrot.slane %v1720_v17, 2  ;;  %v2328_v3 = vrot.slane %v2165_v49, 3  ;;  %v5772_v8 = vpop.f32.mrb[173].mxu0  ;;  %5935 = vmatmul.mubr.msk.f32.gmra.mrb[22].mxu1 %vm238_vm1, %v6408_v39  ;;  %6057 = vmatmul.mubr.msk.f32.gmra.mrb[22].mxu0 %vm238_vm1, %v6407_v5  ;;  %v5650_v44 = vpop.f32.mrb[173].mxu1 }
 0x240   : > { %5937 = vmatprep.mubr.msk.f32.mxu1 %vm6478_vm0, %v6477_v1  ;;  %6059 = vmatprep.mubr.msk.f32.mxu0 %vm6478_vm0, %v6477_v1 }
 0x241   : > { %v1880_v14 = vsel %vm1383_vm3, %v1877_v57, %v1879_v62  ;;  %v2329_v25 = vsel %vm2284_vm4, %v2326_v26, %v2328_v3 }
 0x242   : > { %v1965_v31 = vadd.f32 %v1880_v14, %v7639_v16  ;;  %v8114_v50 = vadd.f32 %v2329_v25, %v1964_v21  ;;  %v1725_v34 = vpop.f32.mrb[174].mxu1  ;;  %v2170_v54 = vpop.f32.mrb[174].mxu0  ;;  %v6411_v25 = vld [vmem:[%s6534_s21 + $0x140] sm:$0x3f] }
 0x243   : > { %v1881_v9 = vrot.slane %v1725_v34, 2  ;;  %v2330_v59 = vrot.slane %v2170_v54, 3  ;;  %v5775_v10 = vpop.f32.mrb[175].mxu0  ;;  %5938 = vmatmul.mubr.msk.f32.gmra.mrb[24].mxu1 %vm238_vm1, %v6409_v24  ;;  %6060 = vmatmul.mubr.msk.f32.gmra.mrb[24].mxu0 %vm238_vm1, %v6408_v39  ;;  %v5653_v13 = vpop.f32.mrb[175].mxu1 }
 0x244   : > { %5940 = vmatprep.mubr.msk.f32.mxu1 %vm6478_vm0, %v6477_v1  ;;  %6062 = vmatprep.mubr.msk.f32.mxu0 %vm6478_vm0, %v6477_v1 }
 0x245   : > { %v1882_v16 = vsel %vm1383_vm3, %v1879_v62, %v1881_v9  ;;  %v2331_v51 = vsel %vm2284_vm4, %v2328_v3, %v2330_v59 }
 0x246   : > { %v1966_v41 = vadd.f32 %v1882_v16, %v7651_v18  ;;  %v8126_v57 = vadd.f32 %v2331_v51, %v1965_v31  ;;  %v1730_v26 = vpop.f32.mrb[176].mxu1  ;;  %v2175_v6 = vpop.f32.mrb[176].mxu0  ;;  %v6412_v51 = vld [vmem:[%s6534_s21] sm:$0xff] }
 0x247   : > { %v1883_v5 = vrot.slane %v1730_v26, 2  ;;  %v2332_v42 = vrot.slane %v2175_v6, 3  ;;  %v5778_v12 = vpop.f32.mrb[177].mxu0  ;;  %5941 = vmatmul.mubr.msk.f32.gmra.mrb[26].mxu1 %vm238_vm1, %v6410_v58  ;;  %6063 = vmatmul.mubr.msk.f32.gmra.mrb[26].mxu0 %vm238_vm1, %v6409_v24  ;;  %v5656_v21 = vpop.f32.mrb[177].mxu1 }
 0x248   : > { %5943 = vmatprep.mubr.msk.f32.mxu1 %vm6478_vm0, %v6477_v1  ;;  %6065 = vmatprep.mubr.msk.f32.mxu0 %vm6478_vm0, %v6477_v1 }
 0x249   : > { %v1884_v18 = vsel %vm1383_vm3, %v1881_v9, %v1883_v5  ;;  %v2333_v17 = vsel %vm2284_vm4, %v2330_v59, %v2332_v42 }
 0x24a   : > { %v1967_v49 = vadd.f32 %v1884_v18, %v7663_v20  ;;  %v8138_v62 = vadd.f32 %v2333_v17, %v1966_v41  ;;  %v1735_v3 = vpop.f32.mrb[178].mxu1  ;;  %v2180_v8 = vpop.f32.mrb[178].mxu0  ;;  %v6413_v17 = vld [vmem:[%s6534_s21 + $0x8] sm:$0xff] }
 0x24b   : > { %v1885_v39 = vrot.slane %v1735_v3, 2  ;;  %v2334_v44 = vrot.slane %v2180_v8, 3  ;;  %v5781_v14 = vpop.f32.mrb[179].mxu0  ;;  %5944 = vmatmul.mubr.msk.f32.gmra.mrb[28].mxu1 %vm238_vm1, %v6411_v25  ;;  %6066 = vmatmul.mubr.msk.f32.gmra.mrb[28].mxu0 %vm238_vm1, %v6410_v58  ;;  %v5659_v31 = vpop.f32.mrb[179].mxu1 }
 0x24c   : > { %6068 = vmatprep.mubr.msk.f32.mxu0 %vm6478_vm0, %v6477_v1  ;;  %6073 = vmatprep.mubr.msk.f32.mxu1 %vm6478_vm0, %v6477_v1 }
 0x24d   : > { %v1886_v20 = vsel %vm1383_vm3, %v1883_v5, %v1885_v39  ;;  %v2335_v34 = vsel %vm2284_vm4, %v2332_v42, %v2334_v44 }
 0x24e   : > { %v1968_v54 = vadd.f32 %v1886_v20, %v7675_v22  ;;  %v8150_v9 = vadd.f32 %v2335_v34, %v1967_v49  ;;  %v1740_v59 = vpop.f32.mrb[180].mxu1  ;;  %v2185_v10 = vpop.f32.mrb[180].mxu0  ;;  %v6414_v34 = vld [vmem:[%s6534_s21 + $0x10] sm:$0xff] }
 0x24f   : > { %v1887_v24 = vrot.slane %v1740_v59, 2  ;;  %v2336_v13 = vrot.slane %v2185_v10, 3  ;;  %v5784_v16 = vpop.f32.mrb[181].mxu0  ;;  %6069 = vmatmul.mubr.msk.f32.gmra.mrb[30].mxu0 %vm238_vm1, %v6411_v25  ;;  %6074 = vmatmul.mubr.msk.f32.vlgmr.msra.gmra.mrb[30].mxu1 %vm238_vm1, %v6412_v51  ;;  %v5662_v41 = vpop.f32.mrb[181].mxu1 }
 0x250   : > { %6076 = vmatprep.mubr.msk.f32.mxu1 %vm6478_vm0, %v6477_v1  ;;  %6198 = vmatprep.mubr.msk.f32.mxu0 %vm6478_vm0, %v6477_v1 }
 0x251   : > { %v1888_v22 = vsel %vm1383_vm3, %v1885_v39, %v1887_v24  ;;  %v2337_v26 = vsel %vm2284_vm4, %v2334_v44, %v2336_v13 }
 0x252   : > { %v1969_v6 = vadd.f32 %v1888_v22, %v7690_v32  ;;  %v8162_v5 = vadd.f32 %v2337_v26, %v1968_v54  ;;  %v1745_v42 = vpop.f32.mrb[182].mxu1  ;;  %v2190_v12 = vpop.f32.mrb[182].mxu0  ;;  %v6415_v26 = vld [vmem:[%s6534_s21 + $0x18] sm:$0xff] }
 0x253   : > { %v1889_v58 = vrot.slane %v1745_v42, 2  ;;  %v2338_v21 = vrot.slane %v2190_v12, 3  ;;  %v5787_v18 = vpop.f32.mrb[183].mxu0  ;;  %6077 = vmatmul.mubr.msk.f32.gmra.mrb[32].mxu1 %vm238_vm1, %v6413_v17  ;;  %6199 = vmatmul.mubr.msk.f32.vlgmr.msra.gmra.mrb[32].mxu0 %vm238_vm1, %v6412_v51  ;;  %v5665_v49 = vpop.f32.mrb[183].mxu1 }
 0x254   : > { %6079 = vmatprep.mubr.msk.f32.mxu1 %vm6478_vm0, %v6477_v1  ;;  %6201 = vmatprep.mubr.msk.f32.mxu0 %vm6478_vm0, %v6477_v1 }
 0x255   : > { %v1890_v32 = vsel %vm1383_vm3, %v1887_v24, %v1889_v58  ;;  %v2339_v3 = vsel %vm2284_vm4, %v2336_v13, %v2338_v21 }
 0x256   : > { %v1970_v8 = vadd.f32 %v1890_v32, %v7705_v35  ;;  %v8174_v39 = vadd.f32 %v2339_v3, %v1969_v6  ;;  %v1750_v44 = vpop.f32.mrb[184].mxu1  ;;  %v2195_v14 = vpop.f32.mrb[184].mxu0  ;;  %v6416_v3 = vld [vmem:[%s6534_s21 + $0x20] sm:$0xff] }
 0x257   : > { %v1891_v25 = vrot.slane %v1750_v44, 2  ;;  %v2340_v31 = vrot.slane %v2195_v14, 3  ;;  %v5790_v20 = vpop.f32.mrb[185].mxu0  ;;  %6080 = vmatmul.mubr.msk.f32.gmra.mrb[34].mxu1 %vm238_vm1, %v6414_v34  ;;  %6202 = vmatmul.mubr.msk.f32.gmra.mrb[34].mxu0 %vm238_vm1, %v6413_v17  ;;  %v5668_v54 = vpop.f32.mrb[185].mxu1 }
 0x258   : > { %6082 = vmatprep.mubr.msk.f32.mxu1 %vm6478_vm0, %v6477_v1  ;;  %6204 = vmatprep.mubr.msk.f32.mxu0 %vm6478_vm0, %v6477_v1 }
 0x259   : > { %v1892_v35 = vsel %vm1383_vm3, %v1889_v58, %v1891_v25  ;;  %v2341_v59 = vsel %vm2284_vm4, %v2338_v21, %v2340_v31 }
 0x25a   : > { %v1971_v10 = vadd.f32 %v1892_v35, %v7717_v53  ;;  %v8186_v24 = vadd.f32 %v2341_v59, %v1970_v8  ;;  %v1755_v13 = vpop.f32.mrb[186].mxu1  ;;  %v2200_v16 = vpop.f32.mrb[186].mxu0  ;;  %v6417_v59 = vld [vmem:[%s6534_s21 + $0x28] sm:$0xff] }
 0x25b   : > { %v1893_v51 = vrot.slane %v1755_v13, 2  ;;  %v2342_v41 = vrot.slane %v2200_v16, 3  ;;  %v5793_v22 = vpop.f32.mrb[187].mxu0  ;;  %6083 = vmatmul.mubr.msk.f32.gmra.mrb[36].mxu1 %vm238_vm1, %v6415_v26  ;;  %6205 = vmatmul.mubr.msk.f32.gmra.mrb[36].mxu0 %vm238_vm1, %v6414_v34  ;;  %v5671_v6 = vpop.f32.mrb[187].mxu1 }
 0x25c   : > { %6085 = vmatprep.mubr.msk.f32.mxu1 %vm6478_vm0, %v6477_v1  ;;  %6207 = vmatprep.mubr.msk.f32.mxu0 %vm6478_vm0, %v6477_v1 }
 0x25d   : > { %v1894_v53 = vsel %vm1383_vm3, %v1891_v25, %v1893_v51  ;;  %v2343_v42 = vsel %vm2284_vm4, %v2340_v31, %v2342_v41 }
 0x25e   : > { %v1972_v12 = vadd.f32 %v1894_v53, %v7729_v11  ;;  %v8198_v58 = vadd.f32 %v2343_v42, %v1971_v10  ;;  %v1760_v21 = vpop.f32.mrb[188].mxu1  ;;  %v2205_v18 = vpop.f32.mrb[188].mxu0  ;;  %v6418_v42 = vld [vmem:[%s6534_s21 + $0x30] sm:$0xff] }
 0x25f   : > { %v1895_v17 = vrot.slane %v1760_v21, 2  ;;  %v2344_v49 = vrot.slane %v2205_v18, 3  ;;  %v5796_v32 = vpop.f32.mrb[189].mxu0  ;;  %6086 = vmatmul.mubr.msk.f32.gmra.mrb[38].mxu1 %vm238_vm1, %v6416_v3  ;;  %6208 = vmatmul.mubr.msk.f32.gmra.mrb[38].mxu0 %vm238_vm1, %v6415_v26  ;;  %v5674_v8 = vpop.f32.mrb[189].mxu1 }
 0x260   : > { %6088 = vmatprep.mubr.msk.f32.mxu1 %vm6478_vm0, %v6477_v1  ;;  %6210 = vmatprep.mubr.msk.f32.mxu0 %vm6478_vm0, %v6477_v1 }
 0x261   : > { %v1896_v11 = vsel %vm1383_vm3, %v1893_v51, %v1895_v17  ;;  %v2345_v44 = vsel %vm2284_vm4, %v2342_v41, %v2344_v49 }
 0x262   : > { %v1973_v14 = vadd.f32 %v1896_v11, %v7741_v37  ;;  %v8210_v25 = vadd.f32 %v2345_v44, %v1972_v12  ;;  %v1765_v31 = vpop.f32.mrb[190].mxu1  ;;  %v2210_v20 = vpop.f32.mrb[190].mxu0  ;;  %v6419_v44 = vld [vmem:[%s6534_s21 + $0x38] sm:$0xff] }
 0x263   : > { %v1897_v34 = vrot.slane %v1765_v31, 2  ;;  %v2346_v54 = vrot.slane %v2210_v20, 3  ;;  %v5799_v35 = vpop.f32.mrb[191].mxu0  ;;  %6089 = vmatmul.mubr.msk.f32.gmra.mrb[40].mxu1 %vm238_vm1, %v6417_v59  ;;  %6211 = vmatmul.mubr.msk.f32.gmra.mrb[40].mxu0 %vm238_vm1, %v6416_v3  ;;  %v5677_v10 = vpop.f32.mrb[191].mxu1 }
 0x264   : > { %6091 = vmatprep.mubr.msk.f32.mxu1 %vm6478_vm0, %v6477_v1  ;;  %6213 = vmatprep.mubr.msk.f32.mxu0 %vm6478_vm0, %v6477_v1 }
 0x265   : > { %v1898_v37 = vsel %vm1383_vm3, %v1895_v17, %v1897_v34  ;;  %v2347_v13 = vsel %vm2284_vm4, %v2344_v49, %v2346_v54 }
 0x266   : > { %v1974_v16 = vadd.f32 %v1898_v37, %v7753_v4  ;;  %v8222_v51 = vadd.f32 %v2347_v13, %v1973_v14  ;;  %v1770_v41 = vpop.f32.mrb[192].mxu1  ;;  %v2215_v22 = vpop.f32.mrb[192].mxu0  ;;  %v6420_v13 = vld [vmem:[%s6534_s21 + $0x40] sm:$0xff] }
 0x267   : > { %v1899_v26 = vrot.slane %v1770_v41, 2  ;;  %v2348_v6 = vrot.slane %v2215_v22, 3  ;;  %v5802_v53 = vpop.f32.mrb[193].mxu0  ;;  %6092 = vmatmul.mubr.msk.f32.gmra.mrb[42].mxu1 %vm238_vm1, %v6418_v42  ;;  %6214 = vmatmul.mubr.msk.f32.gmra.mrb[42].mxu0 %vm238_vm1, %v6417_v59  ;;  %v5680_v12 = vpop.f32.mrb[193].mxu1 }
 0x268   : > { %6094 = vmatprep.mubr.msk.f32.mxu1 %vm6478_vm0, %v6477_v1  ;;  %6216 = vmatprep.mubr.msk.f32.mxu0 %vm6478_vm0, %v6477_v1 }
 0x269   : > { %v1900_v4 = vsel %vm1383_vm3, %v1897_v34, %v1899_v26  ;;  %v2349_v21 = vsel %vm2284_vm4, %v2346_v54, %v2348_v6 }
 0x26a   : > { %v1975_v18 = vadd.f32 %v1900_v4, %v7765_v28  ;;  %v8234_v17 = vadd.f32 %v2349_v21, %v1974_v16  ;;  %v1775_v49 = vpop.f32.mrb[194].mxu1  ;;  %v2220_v32 = vpop.f32.mrb[194].mxu0  ;;  %v6421_v21 = vld [vmem:[%s6534_s21 + $0x48] sm:$0xff] }
 0x26b   : > { %v1901_v3 = vrot.slane %v1775_v49, 2  ;;  %v2350_v8 = vrot.slane %v2220_v32, 3  ;;  %v5805_v11 = vpop.f32.mrb[195].mxu0  ;;  %6095 = vmatmul.mubr.msk.f32.gmra.mrb[44].mxu1 %vm238_vm1, %v6419_v44  ;;  %6217 = vmatmul.mubr.msk.f32.gmra.mrb[44].mxu0 %vm238_vm1, %v6418_v42  ;;  %v5683_v14 = vpop.f32.mrb[195].mxu1 }
 0x26c   : > { %6097 = vmatprep.mubr.msk.f32.mxu1 %vm6478_vm0, %v6477_v1  ;;  %6219 = vmatprep.mubr.msk.f32.mxu0 %vm6478_vm0, %v6477_v1 }
 0x26d   : > { %v1902_v28 = vsel %vm1383_vm3, %v1899_v26, %v1901_v3  ;;  %v2351_v31 = vsel %vm2284_vm4, %v2348_v6, %v2350_v8 }
 0x26e   : > { %v1976_v20 = vadd.f32 %v1902_v28, %v7777_v23  ;;  %v8246_v34 = vadd.f32 %v2351_v31, %v1975_v18  ;;  %v1780_v54 = vpop.f32.mrb[196].mxu1  ;;  %v2225_v35 = vpop.f32.mrb[196].mxu0  ;;  %v6422_v28 = vld [vmem:[%s6534_s21 + $0x50] sm:$0xff] }
 0x26f   : > { %v1903_v59 = vrot.slane %v1780_v54, 2  ;;  %v2352_v10 = vrot.slane %v2225_v35, 3  ;;  %v5808_v37 = vpop.f32.mrb[197].mxu0  ;;  %6098 = vmatmul.mubr.msk.f32.gmra.mrb[46].mxu1 %vm238_vm1, %v6420_v13  ;;  %6220 = vmatmul.mubr.msk.f32.gmra.mrb[46].mxu0 %vm238_vm1, %v6419_v44  ;;  %v5686_v16 = vpop.f32.mrb[197].mxu1 }
 0x270   : > { %6100 = vmatprep.mubr.msk.f32.mxu1 %vm6478_vm0, %v6477_v1  ;;  %6222 = vmatprep.mubr.msk.f32.mxu0 %vm6478_vm0, %v6477_v1 }
 0x271   : > { %v1904_v23 = vsel %vm1383_vm3, %v1901_v3, %v1903_v59  ;;  %v2353_v41 = vsel %vm2284_vm4, %v2350_v8, %v2352_v10 }
 0x272   : > { %v1977_v22 = vadd.f32 %v1904_v23, %v7789_v33  ;;  %v8258_v26 = vadd.f32 %v2353_v41, %v1976_v20  ;;  %v1785_v6 = vpop.f32.mrb[198].mxu1  ;;  %v2230_v53 = vpop.f32.mrb[198].mxu0  ;;  %v6424_v41 = vld [vmem:[%s6534_s21 + $0x60] sm:$0xff] }
 0x273   : > { %v1905_v42 = vrot.slane %v1785_v6, 2  ;;  %v2354_v12 = vrot.slane %v2230_v53, 3  ;;  %v5811_v4 = vpop.f32.mrb[199].mxu0  ;;  %6101 = vmatmul.mubr.msk.f32.gmra.mrb[48].mxu1 %vm238_vm1, %v6421_v21  ;;  %6223 = vmatmul.mubr.msk.f32.gmra.mrb[48].mxu0 %vm238_vm1, %v6420_v13  ;;  %v5689_v18 = vpop.f32.mrb[199].mxu1 }
 0x274   : > { %6103 = vmatprep.mubr.msk.f32.mxu1 %vm6478_vm0, %v6477_v1  ;;  %6225 = vmatprep.mubr.msk.f32.mxu0 %vm6478_vm0, %v6477_v1 }
 0x275   : > { %v1906_v33 = vsel %vm1383_vm3, %v1903_v59, %v1905_v42  ;;  %v2355_v49 = vsel %vm2284_vm4, %v2352_v10, %v2354_v12  ;;  %v6423_v10 = vld [vmem:[%s6534_s21 + $0x58] sm:$0xff] }
 0x276   : > { %v1978_v32 = vadd.f32 %v1906_v33, %v7799_v38  ;;  %v8270_v3 = vadd.f32 %v2355_v49, %v1977_v22  ;;  %v2235_v8 = vpop.f32.mrb[200].mxu0  ;;  %v1790_v11 = vpop.f32.mrb[200].mxu1  ;;  %v6426_v49 = vld [vmem:[%s6534_s21 + $0x70] sm:$0xff] }
 0x277   : > { %v2356_v44 = vrot.slane %v2235_v8, 3  ;;  %v5814_v14 = vpop.f32.mrb[201].mxu0  ;;  %6104 = vmatmul.mubr.msk.f32.gmra.mrb[50].mxu1 %vm238_vm1, %v6422_v28  ;;  %6226 = vmatmul.mubr.msk.f32.gmra.mrb[50].mxu0 %vm238_vm1, %v6421_v21  ;;  %v5692_v31 = vpop.f32.mrb[201].mxu1 }
 0x278   : > { %6106 = vmatprep.mubr.msk.f32.mxu1 %vm6478_vm0, %v6477_v1  ;;  %6228 = vmatprep.mubr.msk.f32.mxu0 %vm6478_vm0, %v6477_v1  ;;  %v6427_v31 = vld [vmem:[%s6534_s21 + $0x78] sm:$0xff] }
 0x279   : > { %v2357_v38 = vsel %vm2284_vm4, %v2354_v12, %v2356_v44  ;;  %v6425_v12 = vld [vmem:[%s6534_s21 + $0x68] sm:$0xff] }
 0x27a   : > { %v8280_v20 = vadd.f32 %v2357_v38, %v1978_v32  ;;  %v2240_v54 = vpop.f32.mrb[202].mxu0  ;;  %v1794_v35 = vpop.f32.mrb[202].mxu1 }
 0x27b   : > { %v5817_v59 = vpop.f32.mrb[203].mxu0  ;;  %6107 = vmatmul.mubr.msk.f32.gmra.mrb[52].mxu1 %vm238_vm1, %v6423_v10  ;;  %6229 = vmatmul.mubr.msk.f32.gmra.mrb[52].mxu0 %vm238_vm1, %v6422_v28  ;;  %v5695_v37 = vpop.f32.mrb[203].mxu1 }
 0x27c   : > { %6109 = vmatprep.mubr.msk.f32.mxu1 %vm6478_vm0, %v6477_v1  ;;  %6231 = vmatprep.mubr.msk.f32.mxu0 %vm6478_vm0, %v6477_v1 }
 0x27e   : > { %v2244_v13 = vpop.f32.mrb[204].mxu0  ;;  %v2498_v16 = vpop.f32.mrb[204].mxu1 }
 0x27f   : > { %v5820_v23 = vpop.f32.mrb[205].mxu0  ;;  %6110 = vmatmul.mubr.msk.f32.gmra.mrb[54].mxu1 %vm238_vm1, %v6424_v41  ;;  %6232 = vmatmul.mubr.msk.f32.gmra.mrb[54].mxu0 %vm238_vm1, %v6423_v10  ;;  %v5825_v22 = vpop.f32.mrb[205].mxu1  ;;  %v6428_v16 = vld [vmem:[%s6534_s21 + $0x80] sm:$0xff] }
 0x280   : > { %6112 = vmatprep.mubr.msk.f32.mxu1 %vm6478_vm0, %v6477_v1  ;;  %6234 = vmatprep.mubr.msk.f32.mxu0 %vm6478_vm0, %v6477_v1 }
 0x282   : > { %v2949_v6 = vpop.f32.mrb[206].mxu0  ;;  %v2502_v53 = vpop.f32.mrb[206].mxu1 }
 0x283   : > { %v5950_v42 = vpop.f32.mrb[207].mxu0  ;;  %6113 = vmatmul.mubr.msk.f32.gmra.mrb[56].mxu1 %vm238_vm1, %v6425_v12  ;;  %6235 = vmatmul.mubr.msk.f32.gmra.mrb[56].mxu0 %vm238_vm1, %v6424_v41  ;;  %v5828_v4 = vpop.f32.mrb[207].mxu1 }
 0x284   : > { %6115 = vmatprep.mubr.msk.f32.mxu1 %vm6478_vm0, %v6477_v1  ;;  %6237 = vmatprep.mubr.msk.f32.mxu0 %vm6478_vm0, %v6477_v1 }
 0x286   : > { %v2953_v21 = vpop.f32.mrb[208].mxu0  ;;  %v2506_v18 = vpop.f32.mrb[208].mxu1 }
 0x287   : > { %v5953_v33 = vpop.f32.mrb[209].mxu0  ;;  %6116 = vmatmul.mubr.msk.f32.gmra.mrb[58].mxu1 %vm238_vm1, %v6426_v49  ;;  %6238 = vmatmul.mubr.msk.f32.gmra.mrb[58].mxu0 %vm238_vm1, %v6425_v12  ;;  %v5831_v32 = vpop.f32.mrb[209].mxu1  ;;  %v2736_v44 = vrot.slane %v2506_v18, 4  ;;  %v6429_v12 = vld [vmem:[%s6534_s21 + $0x88] sm:$0xff] }
 0x288   : > { %6118 = vmatprep.mubr.msk.f32.mxu1 %vm6478_vm0, %v6477_v1  ;;  %6240 = vmatprep.mubr.msk.f32.mxu0 %vm6478_vm0, %v6477_v1 }
 0x28a   : > { %v2511_v8 = vpop.f32.mrb[210].mxu1  ;;  %v2957_v11 = vpop.f32.mrb[210].mxu0 }
 0x28b   : > { %v2737_v14 = vrot.slane %v2511_v8, 4  ;;  %v5956_v28 = vpop.f32.mrb[211].mxu0  ;;  %6119 = vmatmul.mubr.msk.f32.gmra.mrb[60].mxu1 %vm238_vm1, %v6427_v31  ;;  %6241 = vmatmul.mubr.msk.f32.gmra.mrb[60].mxu0 %vm238_vm1, %v6426_v49  ;;  %v5834_v38 = vpop.f32.mrb[211].mxu1 }
 0x28c   : > { %6121 = vmatprep.mubr.msk.f32.mxu1 %vm6478_vm0, %v6477_v1  ;;  %6243 = vmatprep.mubr.msk.f32.mxu0 %vm6478_vm0, %v6477_v1 }
 0x28d   : > { %v2738_v54 = vsel %vm2735_vm5, %v2736_v44, %v2737_v14  ;;  %v6430_v44 = vld [vmem:[%s6534_s21 + $0x90] sm:$0xff] }
 0x28e   : > { %v2845_v35 = vadd.f32 %v2738_v54, %v7862_v48  ;;  %v2516_v59 = vpop.f32.mrb[212].mxu1  ;;  %v2961_v10 = vpop.f32.mrb[212].mxu0 }
 0x28f   : > { %v2739_v37 = vrot.slane %v2516_v59, 4  ;;  %v5959_v13 = vpop.f32.mrb[213].mxu0  ;;  %6122 = vmatmul.mubr.msk.f32.gmra.mrb[62].mxu1 %vm238_vm1, %v6428_v16  ;;  %6244 = vmatmul.mubr.msk.f32.gmra.mrb[62].mxu0 %vm238_vm1, %v6427_v31  ;;  %v5837_v23 = vpop.f32.mrb[213].mxu1 }
 0x290   : > { %6124 = vmatprep.mubr.msk.f32.mxu1 %vm6478_vm0, %v6477_v1  ;;  %6246 = vmatprep.mubr.msk.f32.mxu0 %vm6478_vm0, %v6477_v1 }
 0x291   : > { %v2740_v41 = vsel %vm2735_vm5, %v2737_v14, %v2739_v37 }
 0x292   : > { %v2846_v48 = vadd.f32 %v2740_v41, %v7874_v52  ;;  %v2521_v22 = vpop.f32.mrb[214].mxu1  ;;  %v2965_v6 = vpop.f32.mrb[214].mxu0 }
 0x293   : > { %v2741_v53 = vrot.slane %v2521_v22, 4  ;;  %v5962_v42 = vpop.f32.mrb[215].mxu0  ;;  %6125 = vmatmul.mubr.msk.f32.gmra.mrb[64].mxu1 %vm238_vm1, %v6429_v12  ;;  %6247 = vmatmul.mubr.msk.f32.gmra.mrb[64].mxu0 %vm238_vm1, %v6428_v16  ;;  %v5840_v4 = vpop.f32.mrb[215].mxu1  ;;  %v3186_v49 = vrot.slane %v2965_v6, 4  ;;  %v6431_v16 = vld [vmem:[%s6534_s21 + $0x98] sm:$0xff] }
 0x294   : > { %6127 = vmatprep.mubr.msk.f32.mxu1 %vm6478_vm0, %v6477_v1  ;;  %6249 = vmatprep.mubr.msk.f32.mxu0 %vm6478_vm0, %v6477_v1 }
 0x295   : > { %v2742_v21 = vsel %vm2735_vm5, %v2739_v37, %v2741_v53 }
 0x296   : > { %v2847_v52 = vadd.f32 %v2742_v21, %v7886_v56  ;;  %v2526_v18 = vpop.f32.mrb[216].mxu1  ;;  %v2970_v33 = vpop.f32.mrb[216].mxu0  ;;  %v6432_v21 = vld [vmem:[%s6534_s21 + $0xa0] sm:$0xff] }
 0x297   : > { %v2743_v32 = vrot.slane %v2526_v18, 4  ;;  %v3187_v8 = vrot.slane %v2970_v33, 4  ;;  %v5965_v11 = vpop.f32.mrb[217].mxu0  ;;  %6128 = vmatmul.mubr.msk.f32.gmra.mrb[66].mxu1 %vm238_vm1, %v6430_v44  ;;  %6250 = vmatmul.mubr.msk.f32.gmra.mrb[66].mxu0 %vm238_vm1, %v6429_v12  ;;  %v5843_v14 = vpop.f32.mrb[217].mxu1 }
 0x298   : > { %6130 = vmatprep.mubr.msk.f32.mxu1 %vm6478_vm0, %v6477_v1  ;;  %6252 = vmatprep.mubr.msk.f32.mxu0 %vm6478_vm0, %v6477_v1 }
 0x299   : > { %v2744_v56 = vsel %vm2735_vm5, %v2741_v53, %v2743_v32  ;;  %v3188_v28 = vsel %vm2735_vm5, %v3186_v49, %v3187_v8 }
 0x29a   : > { %v2848_v31 = vadd.f32 %v2744_v56, %v7898_v60  ;;  %v8347_v38 = vadd.f32 %v3188_v28, %v2845_v35  ;;  %v2531_v54 = vpop.f32.mrb[218].mxu1  ;;  %v2975_v59 = vpop.f32.mrb[218].mxu0  ;;  %v6433_v56 = vld [vmem:[%s6534_s21 + $0xa8] sm:$0xff] }
 0x29b   : > { %v2745_v10 = vrot.slane %v2531_v54, 4  ;;  %v3189_v37 = vrot.slane %v2975_v59, 4  ;;  %v5968_v13 = vpop.f32.mrb[219].mxu0  ;;  %6131 = vmatmul.mubr.msk.f32.gmra.mrb[68].mxu1 %vm238_vm1, %v6431_v16  ;;  %6253 = vmatmul.mubr.msk.f32.gmra.mrb[68].mxu0 %vm238_vm1, %v6430_v44  ;;  %v5846_v23 = vpop.f32.mrb[219].mxu1 }
 0x29c   : > { %6133 = vmatprep.mubr.msk.f32.mxu1 %vm6478_vm0, %v6477_v1  ;;  %6255 = vmatprep.mubr.msk.f32.mxu0 %vm6478_vm0, %v6477_v1 }
 0x29d   : > { %v2746_v60 = vsel %vm2735_vm5, %v2743_v32, %v2745_v10  ;;  %v3190_v35 = vsel %vm2735_vm5, %v3187_v8, %v3189_v37 }
 0x29e   : > { %v2849_v41 = vadd.f32 %v2746_v60, %v7910_v0  ;;  %v8359_v22 = vadd.f32 %v3190_v35, %v2846_v48  ;;  %v2536_v6 = vpop.f32.mrb[220].mxu1  ;;  %v2980_v53 = vpop.f32.mrb[220].mxu0  ;;  %v6434_v60 = vld [vmem:[%s6534_s21 + $0xb0] sm:$0xff] }
 0x29f   : > { %v2747_v42 = vrot.slane %v2536_v6, 4  ;;  %v3191_v12 = vrot.slane %v2980_v53, 4  ;;  %v5971_v4 = vpop.f32.mrb[221].mxu0  ;;  %6134 = vmatmul.mubr.msk.f32.gmra.mrb[70].mxu1 %vm238_vm1, %v6432_v21  ;;  %6256 = vmatmul.mubr.msk.f32.gmra.mrb[70].mxu0 %vm238_vm1, %v6431_v16  ;;  %v5849_v18 = vpop.f32.mrb[221].mxu1 }
 0x2a0   : > { %6136 = vmatprep.mubr.msk.f32.mxu1 %vm6478_vm0, %v6477_v1  ;;  %6258 = vmatprep.mubr.msk.f32.mxu0 %vm6478_vm0, %v6477_v1 }
 0x2a1   : > { %v2748_v0 = vsel %vm2735_vm5, %v2745_v10, %v2747_v42  ;;  %v3192_v48 = vsel %vm2735_vm5, %v3189_v37, %v3191_v12 }
 0x2a2   : > { %v2850_v33 = vadd.f32 %v2748_v0, %v7922_v7  ;;  %v8371_v49 = vadd.f32 %v3192_v48, %v2847_v52  ;;  %v2541_v32 = vpop.f32.mrb[222].mxu1  ;;  %v2985_v8 = vpop.f32.mrb[222].mxu0  ;;  %v6435_v0 = vld [vmem:[%s6534_s21 + $0xb8] sm:$0xff] }
 0x2a3   : > { %v2749_v11 = vrot.slane %v2541_v32, 4  ;;  %v3193_v44 = vrot.slane %v2985_v8, 4  ;;  %v5974_v14 = vpop.f32.mrb[223].mxu0  ;;  %6137 = vmatmul.mubr.msk.f32.gmra.mrb[72].mxu1 %vm238_vm1, %v6433_v56  ;;  %6259 = vmatmul.mubr.msk.f32.gmra.mrb[72].mxu0 %vm238_vm1, %v6432_v21  ;;  %v5852_v28 = vpop.f32.mrb[223].mxu1 }
 0x2a4   : > { %6139 = vmatprep.mubr.msk.f32.mxu1 %vm6478_vm0, %v6477_v1  ;;  %6261 = vmatprep.mubr.msk.f32.mxu0 %vm6478_vm0, %v6477_v1 }
 0x2a5   : > { %v2750_v7 = vsel %vm2735_vm5, %v2747_v42, %v2749_v11  ;;  %v3194_v52 = vsel %vm2735_vm5, %v3191_v12, %v3193_v44 }
 0x2a6   : > { %v2851_v54 = vadd.f32 %v2750_v7, %v7934_v15  ;;  %v8383_v59 = vadd.f32 %v3194_v52, %v2848_v31  ;;  %v2546_v10 = vpop.f32.mrb[224].mxu1  ;;  %v2990_v37 = vpop.f32.mrb[224].mxu0  ;;  %v6436_v7 = vld [vmem:[%s6534_s21 + $0xc0] sm:$0xff] }
 0x2a7   : > { %v2751_v13 = vrot.slane %v2546_v10, 4  ;;  %v3195_v16 = vrot.slane %v2990_v37, 4  ;;  %v5977_v23 = vpop.f32.mrb[225].mxu0  ;;  %6140 = vmatmul.mubr.msk.f32.gmra.mrb[74].mxu1 %vm238_vm1, %v6434_v60  ;;  %6262 = vmatmul.mubr.msk.f32.gmra.mrb[74].mxu0 %vm238_vm1, %v6433_v56  ;;  %v5855_v35 = vpop.f32.mrb[225].mxu1 }
 0x2a8   : > { %6142 = vmatprep.mubr.msk.f32.mxu1 %vm6478_vm0, %v6477_v1  ;;  %6264 = vmatprep.mubr.msk.f32.mxu0 %vm6478_vm0, %v6477_v1 }
 0x2a9   : > { %v2752_v15 = vsel %vm2735_vm5, %v2749_v11, %v2751_v13  ;;  %v3196_v31 = vsel %vm2735_vm5, %v3193_v44, %v3195_v16 }
 0x2aa   : > { %v2852_v6 = vadd.f32 %v2752_v15, %v7946_v30  ;;  %v8395_v53 = vadd.f32 %v3196_v31, %v2849_v41  ;;  %v2551_v42 = vpop.f32.mrb[226].mxu1  ;;  %v2995_v12 = vpop.f32.mrb[226].mxu0  ;;  %v6437_v15 = vld [vmem:[%s6534_s21 + $0xc8] sm:$0xff] }
 0x2ab   : > { %v2753_v4 = vrot.slane %v2551_v42, 4  ;;  %v3197_v21 = vrot.slane %v2995_v12, 4  ;;  %v5980_v18 = vpop.f32.mrb[227].mxu0  ;;  %6143 = vmatmul.mubr.msk.f32.gmra.mrb[76].mxu1 %vm238_vm1, %v6435_v0  ;;  %6265 = vmatmul.mubr.msk.f32.gmra.mrb[76].mxu0 %vm238_vm1, %v6434_v60  ;;  %v5858_v48 = vpop.f32.mrb[227].mxu1 }
 0x2ac   : > { %6145 = vmatprep.mubr.msk.f32.mxu1 %vm6478_vm0, %v6477_v1  ;;  %6267 = vmatprep.mubr.msk.f32.mxu0 %vm6478_vm0, %v6477_v1 }
 0x2ad   : > { %v2754_v30 = vsel %vm2735_vm5, %v2751_v13, %v2753_v4  ;;  %v3198_v41 = vsel %vm2735_vm5, %v3195_v16, %v3197_v21 }
 0x2ae   : > { %v2853_v32 = vadd.f32 %v2754_v30, %v7958_v61  ;;  %v8407_v8 = vadd.f32 %v3198_v41, %v2850_v33  ;;  %v2556_v11 = vpop.f32.mrb[228].mxu1  ;;  %v3000_v44 = vpop.f32.mrb[228].mxu0  ;;  %v6438_v30 = vld [vmem:[%s6534_s21 + $0xd0] sm:$0xff] }
 0x2af   : > { %v2755_v14 = vrot.slane %v2556_v11, 4  ;;  %v3199_v56 = vrot.slane %v3000_v44, 4  ;;  %v5983_v28 = vpop.f32.mrb[229].mxu0  ;;  %6146 = vmatmul.mubr.msk.f32.gmra.mrb[78].mxu1 %vm238_vm1, %v6436_v7  ;;  %6268 = vmatmul.mubr.msk.f32.gmra.mrb[78].mxu0 %vm238_vm1, %v6435_v0  ;;  %v5861_v52 = vpop.f32.mrb[229].mxu1 }
 0x2b0   : > { %6148 = vmatprep.mubr.msk.f32.mxu1 %vm6478_vm0, %v6477_v1  ;;  %6270 = vmatprep.mubr.msk.f32.mxu0 %vm6478_vm0, %v6477_v1 }
 0x2b1   : > { %v2756_v61 = vsel %vm2735_vm5, %v2753_v4, %v2755_v14  ;;  %v3200_v33 = vsel %vm2735_vm5, %v3197_v21, %v3199_v56 }
 0x2b2   : > { %v2854_v10 = vadd.f32 %v2756_v61, %v7970_v27  ;;  %v8419_v37 = vadd.f32 %v3200_v33, %v2851_v54  ;;  %v2561_v13 = vpop.f32.mrb[230].mxu1  ;;  %v3005_v16 = vpop.f32.mrb[230].mxu0  ;;  %v6439_v61 = vld [vmem:[%s6534_s21 + $0xd8] sm:$0xff] }
 0x2b3   : > { %v2757_v23 = vrot.slane %v2561_v13, 4  ;;  %v3201_v60 = vrot.slane %v3005_v16, 4  ;;  %v5986_v35 = vpop.f32.mrb[231].mxu0  ;;  %6149 = vmatmul.mubr.msk.f32.gmra.mrb[80].mxu1 %vm238_vm1, %v6437_v15  ;;  %6271 = vmatmul.mubr.msk.f32.gmra.mrb[80].mxu0 %vm238_vm1, %v6436_v7  ;;  %v5864_v31 = vpop.f32.mrb[231].mxu1 }
 0x2b4   : > { %6151 = vmatprep.mubr.msk.f32.mxu1 %vm6478_vm0, %v6477_v1  ;;  %6273 = vmatprep.mubr.msk.f32.mxu0 %vm6478_vm0, %v6477_v1 }
 0x2b5   : > { %v2758_v27 = vsel %vm2735_vm5, %v2755_v14, %v2757_v23  ;;  %v3202_v54 = vsel %vm2735_vm5, %v3199_v56, %v3201_v60 }
 0x2b6   : > { %v2855_v42 = vadd.f32 %v2758_v27, %v7982_v45  ;;  %v8431_v12 = vadd.f32 %v3202_v54, %v2852_v6  ;;  %v2566_v4 = vpop.f32.mrb[232].mxu1  ;;  %v3010_v21 = vpop.f32.mrb[232].mxu0  ;;  %v6440_v27 = vld [vmem:[%s6534_s21 + $0xe0] sm:$0xff] }
 0x2b7   : > { %v2759_v18 = vrot.slane %v2566_v4, 4  ;;  %v3203_v0 = vrot.slane %v3010_v21, 4  ;;  %v5989_v48 = vpop.f32.mrb[233].mxu0  ;;  %6152 = vmatmul.mubr.msk.f32.gmra.mrb[82].mxu1 %vm238_vm1, %v6438_v30  ;;  %6274 = vmatmul.mubr.msk.f32.gmra.mrb[82].mxu0 %vm238_vm1, %v6437_v15  ;;  %v5867_v41 = vpop.f32.mrb[233].mxu1 }
 0x2b8   : > { %6154 = vmatprep.mubr.msk.f32.mxu1 %vm6478_vm0, %v6477_v1  ;;  %6276 = vmatprep.mubr.msk.f32.mxu0 %vm6478_vm0, %v6477_v1 }
 0x2b9   : > { %v2760_v45 = vsel %vm2735_vm5, %v2757_v23, %v2759_v18  ;;  %v3204_v6 = vsel %vm2735_vm5, %v3201_v60, %v3203_v0 }
 0x2ba   : > { %v2856_v11 = vadd.f32 %v2760_v45, %v7994_v55  ;;  %v8443_v44 = vadd.f32 %v3204_v6, %v2853_v32  ;;  %v2571_v14 = vpop.f32.mrb[234].mxu1  ;;  %v3015_v56 = vpop.f32.mrb[234].mxu0  ;;  %v6441_v45 = vld [vmem:[%s6534_s21 + $0xe8] sm:$0xff] }
 0x2bb   : > { %v2761_v28 = vrot.slane %v2571_v14, 4  ;;  %v3205_v7 = vrot.slane %v3015_v56, 4  ;;  %v5992_v52 = vpop.f32.mrb[235].mxu0  ;;  %6155 = vmatmul.mubr.msk.f32.gmra.mrb[84].mxu1 %vm238_vm1, %v6439_v61  ;;  %6277 = vmatmul.mubr.msk.f32.gmra.mrb[84].mxu0 %vm238_vm1, %v6438_v30  ;;  %v5870_v33 = vpop.f32.mrb[235].mxu1 }
 0x2bc   : > { %6157 = vmatprep.mubr.msk.f32.mxu1 %vm6478_vm0, %v6477_v1  ;;  %6279 = vmatprep.mubr.msk.f32.mxu0 %vm6478_vm0, %v6477_v1 }
 0x2bd   : > { %v2762_v55 = vsel %vm2735_vm5, %v2759_v18, %v2761_v28  ;;  %v3206_v32 = vsel %vm2735_vm5, %v3203_v0, %v3205_v7 }
 0x2be   : > { %v2857_v13 = vadd.f32 %v2762_v55, %v8006_v29  ;;  %v8455_v16 = vadd.f32 %v3206_v32, %v2854_v10  ;;  %v2576_v23 = vpop.f32.mrb[236].mxu1  ;;  %v3020_v60 = vpop.f32.mrb[236].mxu0  ;;  %v6442_v55 = vld [vmem:[%s6534_s21 + $0xf0] sm:$0xff] }
 0x2bf   : > { %v2763_v35 = vrot.slane %v2576_v23, 4  ;;  %v3207_v15 = vrot.slane %v3020_v60, 4  ;;  %v5995_v31 = vpop.f32.mrb[237].mxu0  ;;  %6158 = vmatmul.mubr.msk.f32.gmra.mrb[86].mxu1 %vm238_vm1, %v6440_v27  ;;  %6280 = vmatmul.mubr.msk.f32.gmra.mrb[86].mxu0 %vm238_vm1, %v6439_v61  ;;  %v5873_v54 = vpop.f32.mrb[237].mxu1 }
 0x2c0   : > { %6160 = vmatprep.mubr.msk.f32.mxu1 %vm6478_vm0, %v6477_v1  ;;  %6282 = vmatprep.mubr.msk.f32.mxu0 %vm6478_vm0, %v6477_v1 }
 0x2c1   : > { %v2764_v29 = vsel %vm2735_vm5, %v2761_v28, %v2763_v35  ;;  %v3208_v10 = vsel %vm2735_vm5, %v3205_v7, %v3207_v15 }
 0x2c2   : > { %v2858_v4 = vadd.f32 %v2764_v29, %v8018_v36  ;;  %v8467_v21 = vadd.f32 %v3208_v10, %v2855_v42  ;;  %v2581_v18 = vpop.f32.mrb[238].mxu1  ;;  %v3025_v0 = vpop.f32.mrb[238].mxu0  ;;  %v6443_v29 = vld [vmem:[%s6534_s21 + $0xf8] sm:$0xff] }
 0x2c3   : > { %v2765_v48 = vrot.slane %v2581_v18, 4  ;;  %v3209_v30 = vrot.slane %v3025_v0, 4  ;;  %v5998_v41 = vpop.f32.mrb[239].mxu0  ;;  %6161 = vmatmul.mubr.msk.f32.gmra.mrb[88].mxu1 %vm238_vm1, %v6441_v45  ;;  %6283 = vmatmul.mubr.msk.f32.gmra.mrb[88].mxu0 %vm238_vm1, %v6440_v27  ;;  %v5876_v6 = vpop.f32.mrb[239].mxu1 }
 0x2c4   : > { %6163 = vmatprep.mubr.msk.f32.mxu1 %vm6478_vm0, %v6477_v1  ;;  %6285 = vmatprep.mubr.msk.f32.mxu0 %vm6478_vm0, %v6477_v1 }
 0x2c5   : > { %v2766_v36 = vsel %vm2735_vm5, %v2763_v35, %v2765_v48  ;;  %v3210_v42 = vsel %vm2735_vm5, %v3207_v15, %v3209_v30 }
 0x2c6   : > { %v2859_v14 = vadd.f32 %v2766_v36, %v8030_v19  ;;  %v8479_v56 = vadd.f32 %v3210_v42, %v2856_v11  ;;  %v2586_v28 = vpop.f32.mrb[240].mxu1  ;;  %v3030_v7 = vpop.f32.mrb[240].mxu0  ;;  %v6444_v36 = vld [vmem:[%s6534_s21 + $0x100] sm:$0xff] }
 0x2c7   : > { %v2767_v52 = vrot.slane %v2586_v28, 4  ;;  %v3211_v61 = vrot.slane %v3030_v7, 4  ;;  %v6001_v33 = vpop.f32.mrb[241].mxu0  ;;  %6164 = vmatmul.mubr.msk.f32.gmra.mrb[90].mxu1 %vm238_vm1, %v6442_v55  ;;  %6286 = vmatmul.mubr.msk.f32.gmra.mrb[90].mxu0 %vm238_vm1, %v6441_v45  ;;  %v5879_v32 = vpop.f32.mrb[241].mxu1 }
 0x2c8   : > { %6166 = vmatprep.mubr.msk.f32.mxu1 %vm6478_vm0, %v6477_v1  ;;  %6288 = vmatprep.mubr.msk.f32.mxu0 %vm6478_vm0, %v6477_v1 }
 0x2c9   : > { %v2768_v19 = vsel %vm2735_vm5, %v2765_v48, %v2767_v52  ;;  %v3212_v11 = vsel %vm2735_vm5, %v3209_v30, %v3211_v61 }
 0x2ca   : > { %v2860_v23 = vadd.f32 %v2768_v19, %v8042_v40  ;;  %v8491_v60 = vadd.f32 %v3212_v11, %v2857_v13  ;;  %v2591_v35 = vpop.f32.mrb[242].mxu1  ;;  %v3035_v15 = vpop.f32.mrb[242].mxu0  ;;  %v6445_v19 = vld [vmem:[%s6534_s21 + $0x108] sm:$0xff] }
 0x2cb   : > { %v2769_v31 = vrot.slane %v2591_v35, 4  ;;  %v3213_v27 = vrot.slane %v3035_v15, 4  ;;  %v6004_v54 = vpop.f32.mrb[243].mxu0  ;;  %6167 = vmatmul.mubr.msk.f32.gmra.mrb[92].mxu1 %vm238_vm1, %v6443_v29  ;;  %6289 = vmatmul.mubr.msk.f32.gmra.mrb[92].mxu0 %vm238_vm1, %v6442_v55  ;;  %v5882_v10 = vpop.f32.mrb[243].mxu1 }
 0x2cc   : > { %6169 = vmatprep.mubr.msk.f32.mxu1 %vm6478_vm0, %v6477_v1  ;;  %6291 = vmatprep.mubr.msk.f32.mxu0 %vm6478_vm0, %v6477_v1 }
 0x2cd   : > { %v2770_v40 = vsel %vm2735_vm5, %v2767_v52, %v2769_v31  ;;  %v3214_v13 = vsel %vm2735_vm5, %v3211_v61, %v3213_v27 }
 0x2ce   : > { %v2861_v18 = vadd.f32 %v2770_v40, %v8054_v63  ;;  %v8503_v0 = vadd.f32 %v3214_v13, %v2858_v4  ;;  %v2596_v48 = vpop.f32.mrb[244].mxu1  ;;  %v3040_v30 = vpop.f32.mrb[244].mxu0  ;;  %v6446_v40 = vld [vmem:[%s6534_s21 + $0x110] sm:$0xff] }
 0x2cf   : > { %v2771_v41 = vrot.slane %v2596_v48, 4  ;;  %v3215_v45 = vrot.slane %v3040_v30, 4  ;;  %v6007_v6 = vpop.f32.mrb[245].mxu0  ;;  %6170 = vmatmul.mubr.msk.f32.gmra.mrb[94].mxu1 %vm238_vm1, %v6444_v36  ;;  %6292 = vmatmul.mubr.msk.f32.gmra.mrb[94].mxu0 %vm238_vm1, %v6443_v29  ;;  %v5885_v42 = vpop.f32.mrb[245].mxu1 }
 0x2d0   : > { %6172 = vmatprep.mubr.msk.f32.mxu1 %vm6478_vm0, %v6477_v1  ;;  %6294 = vmatprep.mubr.msk.f32.mxu0 %vm6478_vm0, %v6477_v1 }
 0x2d1   : > { %v2772_v63 = vsel %vm2735_vm5, %v2769_v31, %v2771_v41  ;;  %v3216_v4 = vsel %vm2735_vm5, %v3213_v27, %v3215_v45 }
 0x2d2   : > { %v2862_v28 = vadd.f32 %v2772_v63, %v8066_v47  ;;  %v8515_v7 = vadd.f32 %v3216_v4, %v2859_v14  ;;  %v2601_v52 = vpop.f32.mrb[246].mxu1  ;;  %v3045_v61 = vpop.f32.mrb[246].mxu0  ;;  %v6447_v63 = vld [vmem:[%s6534_s21 + $0x118] sm:$0xff] }
 0x2d3   : > { %v2773_v33 = vrot.slane %v2601_v52, 4  ;;  %v3217_v55 = vrot.slane %v3045_v61, 4  ;;  %v6010_v32 = vpop.f32.mrb[247].mxu0  ;;  %6173 = vmatmul.mubr.msk.f32.gmra.mrb[96].mxu1 %vm238_vm1, %v6445_v19  ;;  %6295 = vmatmul.mubr.msk.f32.gmra.mrb[96].mxu0 %vm238_vm1, %v6444_v36  ;;  %v5888_v11 = vpop.f32.mrb[247].mxu1 }
 0x2d4   : > { %6175 = vmatprep.mubr.msk.f32.mxu1 %vm6478_vm0, %v6477_v1  ;;  %6297 = vmatprep.mubr.msk.f32.mxu0 %vm6478_vm0, %v6477_v1 }
 0x2d5   : > { %v2774_v47 = vsel %vm2735_vm5, %v2771_v41, %v2773_v33  ;;  %v3218_v14 = vsel %vm2735_vm5, %v3215_v45, %v3217_v55 }
 0x2d6   : > { %v2863_v35 = vadd.f32 %v2774_v47, %v8078_v46  ;;  %v8527_v15 = vadd.f32 %v3218_v14, %v2860_v23  ;;  %v2606_v31 = vpop.f32.mrb[248].mxu1  ;;  %v3050_v27 = vpop.f32.mrb[248].mxu0  ;;  %v6448_v47 = vld [vmem:[%s6534_s21 + $0x120] sm:$0xff] }
 0x2d7   : > { %v2775_v54 = vrot.slane %v2606_v31, 4  ;;  %v3219_v29 = vrot.slane %v3050_v27, 4  ;;  %v6013_v10 = vpop.f32.mrb[249].mxu0  ;;  %6176 = vmatmul.mubr.msk.f32.gmra.mrb[98].mxu1 %vm238_vm1, %v6446_v40  ;;  %6298 = vmatmul.mubr.msk.f32.gmra.mrb[98].mxu0 %vm238_vm1, %v6445_v19  ;;  %v5891_v13 = vpop.f32.mrb[249].mxu1 }
 0x2d8   : > { %6178 = vmatprep.mubr.msk.f32.mxu1 %vm6478_vm0, %v6477_v1  ;;  %6300 = vmatprep.mubr.msk.f32.mxu0 %vm6478_vm0, %v6477_v1 }
 0x2d9   : > { %v2776_v46 = vsel %vm2735_vm5, %v2773_v33, %v2775_v54  ;;  %v3220_v23 = vsel %vm2735_vm5, %v3217_v55, %v3219_v29 }
 0x2da   : > { %v2864_v48 = vadd.f32 %v2776_v46, %v8090_v2  ;;  %v8539_v30 = vadd.f32 %v3220_v23, %v2861_v18  ;;  %v2611_v41 = vpop.f32.mrb[250].mxu1  ;;  %v3055_v45 = vpop.f32.mrb[250].mxu0  ;;  %v6449_v46 = vld [vmem:[%s6534_s21 + $0x128] sm:$0xff] }
 0x2db   : > { %v2777_v6 = vrot.slane %v2611_v41, 4  ;;  %v3221_v36 = vrot.slane %v3055_v45, 4  ;;  %v6016_v42 = vpop.f32.mrb[251].mxu0  ;;  %6179 = vmatmul.mubr.msk.f32.gmra.mrb[100].mxu1 %vm238_vm1, %v6447_v63  ;;  %6301 = vmatmul.mubr.msk.f32.gmra.mrb[100].mxu0 %vm238_vm1, %v6446_v40  ;;  %v5894_v4 = vpop.f32.mrb[251].mxu1 }
 0x2dc   : > { %6181 = vmatprep.mubr.msk.f32.mxu1 %vm6478_vm0, %v6477_v1  ;;  %6303 = vmatprep.mubr.msk.f32.mxu0 %vm6478_vm0, %v6477_v1 }
 0x2dd   : > { %v2778_v2 = vsel %vm2735_vm5, %v2775_v54, %v2777_v6  ;;  %v3222_v18 = vsel %vm2735_vm5, %v3219_v29, %v3221_v36 }
 0x2de   : > { %v2865_v52 = vadd.f32 %v2778_v2, %v8102_v43  ;;  %v8551_v61 = vadd.f32 %v3222_v18, %v2862_v28  ;;  %v2616_v33 = vpop.f32.mrb[252].mxu1  ;;  %v3060_v55 = vpop.f32.mrb[252].mxu0  ;;  %v6450_v2 = vld [vmem:[%s6534_s21 + $0x130] sm:$0xff] }
 0x2df   : > { %v2779_v32 = vrot.slane %v2616_v33, 4  ;;  %v3223_v19 = vrot.slane %v3060_v55, 4  ;;  %v6019_v11 = vpop.f32.mrb[253].mxu0  ;;  %6182 = vmatmul.mubr.msk.f32.gmra.mrb[102].mxu1 %vm238_vm1, %v6448_v47  ;;  %6304 = vmatmul.mubr.msk.f32.gmra.mrb[102].mxu0 %vm238_vm1, %v6447_v63  ;;  %v5897_v14 = vpop.f32.mrb[253].mxu1 }
 0x2e0   : > { %6184 = vmatprep.mubr.msk.f32.mxu1 %vm6478_vm0, %v6477_v1  ;;  %6306 = vmatprep.mubr.msk.f32.mxu0 %vm6478_vm0, %v6477_v1 }
 0x2e1   : > { %v2780_v43 = vsel %vm2735_vm5, %v2777_v6, %v2779_v32  ;;  %v3224_v28 = vsel %vm2735_vm5, %v3221_v36, %v3223_v19 }
 0x2e2   : > { %v2866_v31 = vadd.f32 %v2780_v43, %v8114_v50  ;;  %v8563_v27 = vadd.f32 %v3224_v28, %v2863_v35  ;;  %v2621_v54 = vpop.f32.mrb[254].mxu1  ;;  %v3065_v29 = vpop.f32.mrb[254].mxu0  ;;  %v6451_v43 = vld [vmem:[%s6534_s21 + $0x138] sm:$0xff] }
 0x2e3   : > { %v2781_v10 = vrot.slane %v2621_v54, 4  ;;  %v3225_v40 = vrot.slane %v3065_v29, 4  ;;  %v6022_v13 = vpop.f32.mrb[255].mxu0  ;;  %6185 = vmatmul.mubr.msk.f32.gmra.mrb[104].mxu1 %vm238_vm1, %v6449_v46  ;;  %6307 = vmatmul.mubr.msk.f32.gmra.mrb[104].mxu0 %vm238_vm1, %v6448_v47  ;;  %v5900_v23 = vpop.f32.mrb[255].mxu1 }
 0x2e4   : > { %6187 = vmatprep.mubr.msk.f32.mxu1 %vm6478_vm0, %v6477_v1  ;;  %6309 = vmatprep.mubr.msk.f32.mxu0 %vm6478_vm0, %v6477_v1 }
 0x2e5   : > { %v2782_v50 = vsel %vm2735_vm5, %v2779_v32, %v2781_v10  ;;  %v3226_v35 = vsel %vm2735_vm5, %v3223_v19, %v3225_v40 }
 0x2e6   : > { %v2867_v41 = vadd.f32 %v2782_v50, %v8126_v57  ;;  %v8575_v45 = vadd.f32 %v3226_v35, %v2864_v48  ;;  %v2626_v6 = vpop.f32.mrb[0].mxu1  ;;  %v3070_v36 = vpop.f32.mrb[0].mxu0  ;;  %v6452_v50 = vld [vmem:[%s6534_s21 + $0x140] sm:$0x3f] }
 0x2e7   : > { %v2783_v42 = vrot.slane %v2626_v6, 4  ;;  %v3227_v63 = vrot.slane %v3070_v36, 4  ;;  %v6025_v4 = vpop.f32.mrb[1].mxu0  ;;  %6188 = vmatmul.mubr.msk.f32.gmra.mrb[106].mxu1 %vm238_vm1, %v6450_v2  ;;  %6310 = vmatmul.mubr.msk.f32.gmra.mrb[106].mxu0 %vm238_vm1, %v6449_v46  ;;  %v5903_v18 = vpop.f32.mrb[1].mxu1 }
 0x2e8   : > { %6190 = vmatprep.mubr.msk.f32.mxu1 %vm6478_vm0, %v6477_v1  ;;  %6312 = vmatprep.mubr.msk.f32.mxu0 %vm6478_vm0, %v6477_v1 }
 0x2e9   : > { %v2784_v57 = vsel %vm2735_vm5, %v2781_v10, %v2783_v42  ;;  %v3228_v48 = vsel %vm2735_vm5, %v3225_v40, %v3227_v63 }
 0x2ea   : > { %v2868_v33 = vadd.f32 %v2784_v57, %v8138_v62  ;;  %v8587_v55 = vadd.f32 %v3228_v48, %v2865_v52  ;;  %v2631_v32 = vpop.f32.mrb[2].mxu1  ;;  %v3075_v19 = vpop.f32.mrb[2].mxu0 }
 0x2eb   : > { %v2785_v11 = vrot.slane %v2631_v32, 4  ;;  %v3229_v47 = vrot.slane %v3075_v19, 4  ;;  %v6028_v14 = vpop.f32.mrb[3].mxu0  ;;  %6191 = vmatmul.mubr.msk.f32.gmra.mrb[108].mxu1 %vm238_vm1, %v6451_v43  ;;  %6313 = vmatmul.mubr.msk.f32.gmra.mrb[108].mxu0 %vm238_vm1, %v6450_v2  ;;  %v5906_v28 = vpop.f32.mrb[3].mxu1 }
 0x2ec   : > { %6193 = vmatprep.mubr.msk.f32.mxu1 %vm6478_vm0, %v6477_v1  ;;  %6315 = vmatprep.mubr.msk.f32.mxu0 %vm6478_vm0, %v6477_v1 }
 0x2ed   : > { %v2786_v62 = vsel %vm2735_vm5, %v2783_v42, %v2785_v11  ;;  %v3230_v52 = vsel %vm2735_vm5, %v3227_v63, %v3229_v47 }
 0x2ee   : > { %v2869_v54 = vadd.f32 %v2786_v62, %v8150_v9  ;;  %v8599_v29 = vadd.f32 %v3230_v52, %v2866_v31  ;;  %v2636_v10 = vpop.f32.mrb[4].mxu1  ;;  %v3080_v40 = vpop.f32.mrb[4].mxu0 }
 0x2ef   : > { %v2787_v13 = vrot.slane %v2636_v10, 4  ;;  %v3231_v46 = vrot.slane %v3080_v40, 4  ;;  %v6031_v23 = vpop.f32.mrb[5].mxu0  ;;  %6194 = vmatmul.mubr.msk.f32.gmra.mrb[110].mxu1 %vm238_vm1, %v6452_v50  ;;  %6316 = vmatmul.mubr.msk.f32.gmra.mrb[110].mxu0 %vm238_vm1, %v6451_v43  ;;  %v5909_v35 = vpop.f32.mrb[5].mxu1 }
 0x2f0   : > { %6318 = vmatprep.mubr.msk.f32.mxu0 %vm6478_vm0, %v6477_v1 }
 0x2f1   : > { %v2788_v6 = vsel %vm2735_vm5, %v2785_v11, %v2787_v13  ;;  %v3232_v9 = vsel %vm2735_vm5, %v3229_v47, %v3231_v46 }
 0x2f2   : > { %v2870_v31 = vadd.f32 %v2788_v6, %v8162_v5  ;;  %v8609_v36 = vadd.f32 %v3232_v9, %v2867_v41  ;;  %v2641_v42 = vpop.f32.mrb[6].mxu1  ;;  %v3085_v63 = vpop.f32.mrb[6].mxu0 }
 0x2f3   : > { %v2789_v4 = vrot.slane %v2641_v42, 4  ;;  %v3233_v2 = vrot.slane %v3085_v63, 4  ;;  %v6034_v18 = vpop.f32.mrb[7].mxu0  ;;  %6319 = vmatmul.mubr.msk.f32.gmra.mrb[112].mxu0 %vm238_vm1, %v6452_v50  ;;  %v5912_v57 = vpop.f32.mrb[7].mxu1 }
 0x2f5   : > { %v2790_v48 = vsel %vm2735_vm5, %v2787_v13, %v2789_v4  ;;  %v3234_v1 = vsel %vm2735_vm5, %v3231_v46, %v3233_v2 }
 0x2f6   : > { %v2871_v32 = vadd.f32 %v2790_v48, %v8174_v39  ;;  %v8615_v19 = vadd.f32 %v3234_v1, %v2868_v33  ;;  %v2646_v11 = vpop.f32.mrb[8].mxu1  ;;  %v3090_v5 = vpop.f32.mrb[8].mxu0 }
 0x2f7   : > { %v2791_v41 = vrot.slane %v2646_v11, 4  ;;  %v3235_v47 = vrot.slane %v3090_v5, 4  ;;  %v6037_v14 = vpop.f32.mrb[9].mxu0  ;;  %v5915_v43 = vpop.f32.mrb[9].mxu1 }
 0x2f9   : > { %v2792_v28 = vsel %vm2735_vm5, %v2789_v4, %v2791_v41  ;;  %v3236_v62 = vsel %vm2735_vm5, %v3233_v2, %v3235_v47 }
 0x2fa   : > { %v2872_v52 = vadd.f32 %v2792_v28, %v8186_v24  ;;  %v8620_v10 = vadd.f32 %v3236_v62, %v2869_v54  ;;  %v2651_v40 = vpop.f32.mrb[10].mxu1  ;;  %v3095_v13 = vpop.f32.mrb[10].mxu0 }
 0x2fb   : > { %v2793_v46 = vrot.slane %v2651_v40, 4  ;;  %v3237_v39 = vrot.slane %v3095_v13, 4  ;;  %v6040_v33 = vpop.f32.mrb[11].mxu0  ;;  %v5918_v23 = vpop.f32.mrb[11].mxu1 }
 0x2fd   : > { %v2794_v50 = vsel %vm2735_vm5, %v2791_v41, %v2793_v46  ;;  %v3238_v35 = vsel %vm2735_vm5, %v3235_v47, %v3237_v39 }
 0x2fe   : > { %v2873_v6 = vadd.f32 %v2794_v50, %v8198_v58  ;;  %v8625_v9 = vadd.f32 %v3238_v35, %v2870_v31  ;;  %v2656_v42 = vpop.f32.mrb[12].mxu1  ;;  %v3100_v63 = vpop.f32.mrb[12].mxu0 }
 0x2ff   : > { %v2795_v4 = vrot.slane %v2656_v42, 4  ;;  %v3239_v24 = vrot.slane %v3100_v63, 4  ;;  %v6043_v54 = vpop.f32.mrb[13].mxu0  ;;  %v5921_v2 = vpop.f32.mrb[13].mxu1 }
 0x301   : > { %v2796_v18 = vsel %vm2735_vm5, %v2793_v46, %v2795_v4  ;;  %v3240_v57 = vsel %vm2735_vm5, %v3237_v39, %v3239_v24 }
 0x302   : > { %v2874_v48 = vadd.f32 %v2796_v18, %v8210_v25  ;;  %v8630_v1 = vadd.f32 %v3240_v57, %v2871_v32  ;;  %v2661_v11 = vpop.f32.mrb[14].mxu1  ;;  %v3105_v5 = vpop.f32.mrb[14].mxu0 }
 0x303   : > { %v2797_v41 = vrot.slane %v2661_v11, 4  ;;  %v3241_v58 = vrot.slane %v3105_v5, 4  ;;  %v6046_v31 = vpop.f32.mrb[15].mxu0  ;;  %v5924_v47 = vpop.f32.mrb[15].mxu1 }
 0x305   : > { %v2798_v14 = vsel %vm2735_vm5, %v2795_v4, %v2797_v41  ;;  %v3242_v43 = vsel %vm2735_vm5, %v3239_v24, %v3241_v58 }
 0x306   : > { %v2875_v28 = vadd.f32 %v2798_v14, %v8222_v51  ;;  %v8635_v62 = vadd.f32 %v3242_v43, %v2872_v52  ;;  %v2666_v40 = vpop.f32.mrb[16].mxu1  ;;  %v3110_v13 = vpop.f32.mrb[16].mxu0 }
 0x307   : > { %v2799_v46 = vrot.slane %v2666_v40, 4  ;;  %v3243_v25 = vrot.slane %v3110_v13, 4  ;;  %v6049_v32 = vpop.f32.mrb[17].mxu0  ;;  %v5927_v39 = vpop.f32.mrb[17].mxu1 }
 0x309   : > { %v2800_v33 = vsel %vm2735_vm5, %v2797_v41, %v2799_v46  ;;  %v3244_v23 = vsel %vm2735_vm5, %v3241_v58, %v3243_v25 }
 0x30a   : > { %v2876_v50 = vadd.f32 %v2800_v33, %v8234_v17  ;;  %v8640_v35 = vadd.f32 %v3244_v23, %v2873_v6  ;;  %v2671_v42 = vpop.f32.mrb[18].mxu1  ;;  %v3115_v63 = vpop.f32.mrb[18].mxu0 }
 0x30b   : > { %v2801_v4 = vrot.slane %v2671_v42, 4  ;;  %v3245_v51 = vrot.slane %v3115_v63, 4  ;;  %v6052_v52 = vpop.f32.mrb[19].mxu0  ;;  %v5930_v24 = vpop.f32.mrb[19].mxu1 }
 0x30d   : > { %v2802_v54 = vsel %vm2735_vm5, %v2799_v46, %v2801_v4  ;;  %v3246_v2 = vsel %vm2735_vm5, %v3243_v25, %v3245_v51 }
 0x30e   : > { %v2877_v18 = vadd.f32 %v2802_v54, %v8246_v34  ;;  %v8645_v57 = vadd.f32 %v3246_v2, %v2874_v48  ;;  %v2676_v11 = vpop.f32.mrb[20].mxu1  ;;  %v3120_v5 = vpop.f32.mrb[20].mxu0 }
 0x30f   : > { %v2803_v41 = vrot.slane %v2676_v11, 4  ;;  %v3247_v17 = vrot.slane %v3120_v5, 4  ;;  %v6055_v6 = vpop.f32.mrb[21].mxu0  ;;  %v5933_v58 = vpop.f32.mrb[21].mxu1 }
 0x311   : > { %v2804_v31 = vsel %vm2735_vm5, %v2801_v4, %v2803_v41  ;;  %v3248_v47 = vsel %vm2735_vm5, %v3245_v51, %v3247_v17 }
 0x312   : > { %v2878_v14 = vadd.f32 %v2804_v31, %v8258_v26  ;;  %v8650_v43 = vadd.f32 %v3248_v47, %v2875_v28  ;;  %v2681_v40 = vpop.f32.mrb[22].mxu1  ;;  %v3125_v13 = vpop.f32.mrb[22].mxu0 }
 0x313   : > { %v2805_v46 = vrot.slane %v2681_v40, 4  ;;  %v3249_v34 = vrot.slane %v3125_v13, 4  ;;  %v6058_v48 = vpop.f32.mrb[23].mxu0  ;;  %v5936_v25 = vpop.f32.mrb[23].mxu1 }
 0x315   : > { %v2806_v32 = vsel %vm2735_vm5, %v2803_v41, %v2805_v46  ;;  %v3250_v39 = vsel %vm2735_vm5, %v3247_v17, %v3249_v34 }
 0x316   : > { %v2879_v33 = vadd.f32 %v2806_v32, %v8270_v3  ;;  %v8655_v23 = vadd.f32 %v3250_v39, %v2876_v50  ;;  %v2686_v42 = vpop.f32.mrb[24].mxu1  ;;  %v3130_v63 = vpop.f32.mrb[24].mxu0 }
 0x317   : > { %v2807_v4 = vrot.slane %v2686_v42, 4  ;;  %v3251_v26 = vrot.slane %v3130_v63, 4  ;;  %v6061_v28 = vpop.f32.mrb[25].mxu0  ;;  %v5939_v51 = vpop.f32.mrb[25].mxu1 }
 0x319   : > { %v2808_v52 = vsel %vm2735_vm5, %v2805_v46, %v2807_v4  ;;  %v3252_v24 = vsel %vm2735_vm5, %v3249_v34, %v3251_v26 }
 0x31a   : > { %v2880_v54 = vadd.f32 %v2808_v52, %v8280_v20  ;;  %v8660_v2 = vadd.f32 %v3252_v24, %v2877_v18  ;;  %v3135_v11 = vpop.f32.mrb[26].mxu0  ;;  %v2691_v5 = vpop.f32.mrb[26].mxu1 }
 0x31b   : > { %v3253_v41 = vrot.slane %v3135_v11, 4  ;;  %v6064_v3 = vpop.f32.mrb[27].mxu0  ;;  %v5942_v50 = vpop.f32.mrb[27].mxu1 }
 0x31d   : > { %v3254_v17 = vsel %vm2735_vm5, %v3251_v26, %v3253_v41 }
 0x31e   : > { %v8663_v6 = vadd.f32 %v3254_v17, %v2878_v14  ;;  %v3140_v58 = vpop.f32.mrb[28].mxu0  ;;  %v2695_v31 = vpop.f32.mrb[28].mxu1 }
 0x31f   : > { %v3255_v47 = vrot.slane %v3140_v58, 4  ;;  %v6067_v40 = vpop.f32.mrb[29].mxu0  ;;  %v5945_v13 = vpop.f32.mrb[29].mxu1 }
 0x321   : > { %v3256_v46 = vsel %vm2735_vm5, %v3253_v41, %v3255_v47 }
 0x322   : > { %v8666_v34 = vadd.f32 %v3256_v46, %v2879_v33  ;;  %v3145_v20 = vpop.f32.mrb[30].mxu0  ;;  %v3399_v18 = vpop.f32.mrb[30].mxu1 }
 0x323   : > { %v3257_v48 = vrot.slane %v3145_v20, 4  ;;  %v6070_v25 = vpop.f32.mrb[31].mxu0  ;;  %v6075_v32 = vpop.f32.mrb[31].mxu1 }
 0x325   : > { %v3258_v39 = vsel %vm2735_vm5, %v3255_v47, %v3257_v48 }
 0x326   : > { %v8669_v42 = vadd.f32 %v3258_v39, %v2880_v54  ;;  %v3850_v14 = vpop.f32.mrb[32].mxu0  ;;  %v3403_v63 = vpop.f32.mrb[32].mxu1 }
 0x327   : > { %v6200_v4 = vpop.f32.mrb[33].mxu0  ;;  %v6078_v26 = vpop.f32.mrb[33].mxu1 }
 0x32a   : > { %v3854_v28 = vpop.f32.mrb[34].mxu0  ;;  %v3407_v51 = vpop.f32.mrb[34].mxu1 }
 0x32b   : > { %v6203_v52 = vpop.f32.mrb[35].mxu0  ;;  %v6081_v24 = vpop.f32.mrb[35].mxu1  ;;  %v8679_v51 = vld [vmem:[%s8909_s2] ss:$0 sm:$0xff] }
 0x32e   : > { %v3858_v11 = vpop.f32.mrb[36].mxu0  ;;  %v3411_v33 = vpop.f32.mrb[36].mxu1 }
 0x32f   : > { %v6206_v5 = vpop.f32.mrb[37].mxu0  ;;  %v6084_v41 = vpop.f32.mrb[37].mxu1 }
 0x332   : > { %v3862_v3 = vpop.f32.mrb[38].mxu0  ;;  %v3415_v50 = vpop.f32.mrb[38].mxu1 }
 0x333   : > { %v6209_v17 = vpop.f32.mrb[39].mxu0  ;;  %v6087_v58 = vpop.f32.mrb[39].mxu1  ;;  %v3637_v47 = vrot.slane %v3415_v50, 5 }
 0x336   : > { %v3420_v31 = vpop.f32.mrb[40].mxu1  ;;  %v3866_v54 = vpop.f32.mrb[40].mxu0 }
 0x337   : > { %v3638_v40 = vrot.slane %v3420_v31, 5  ;;  %v6212_v13 = vpop.f32.mrb[41].mxu0  ;;  %v6090_v46 = vpop.f32.mrb[41].mxu1  ;;  %v4088_v32 = vrot.slane %v3866_v54, 6 }
 0x339   : > { %v3639_v20 = vsel %vm3636_vm6, %v3637_v47, %v3638_v40 }
 0x33a   : > { %v3746_v18 = vadd.f32 %v3639_v20, %v8347_v38  ;;  %v3425_v48 = vpop.f32.mrb[42].mxu1  ;;  %v3871_v25 = vpop.f32.mrb[42].mxu0 }
 0x33b   : > { %v3640_v39 = vrot.slane %v3425_v48, 5  ;;  %v4089_v14 = vrot.slane %v3871_v25, 6  ;;  %v6215_v63 = vpop.f32.mrb[43].mxu0  ;;  %v6093_v4 = vpop.f32.mrb[43].mxu1 }
 0x33d   : > { %v3641_v26 = vsel %vm3636_vm6, %v3638_v40, %v3640_v39  ;;  %v4090_v28 = vsel %vm4087_vm7, %v4088_v32, %v4089_v14 }
 0x33e   : > { %v3747_v38 = vadd.f32 %v3641_v26, %v8359_v22  ;;  %v4197_v52 = vadd.f32 %v4090_v28, %v3746_v18  ;;  %v3430_v24 = vpop.f32.mrb[44].mxu1  ;;  %v3876_v11 = vpop.f32.mrb[44].mxu0 }
 0x33f   : > { %v3642_v33 = vrot.slane %v3430_v24, 5  ;;  %v4091_v5 = vrot.slane %v3876_v11, 6  ;;  %v6218_v41 = vpop.f32.mrb[45].mxu0  ;;  %v6096_v3 = vpop.f32.mrb[45].mxu1 }
 0x340   : > { %v4240_v50 = vadd.f32 %v8679_v51, %v4197_v52 }
 0x341   : > { %v3643_v17 = vsel %vm3636_vm6, %v3640_v39, %v3642_v33  ;;  %v4092_v58 = vsel %vm4087_vm7, %v4089_v14, %v4091_v5 }
 0x342   : > { %v4276_v22 = vmax.f32 %v4240_v50, 0.0  ;;  %v3748_v31 = vadd.f32 %v3643_v17, %v8371_v49  ;;  %v4198_v54 = vadd.f32 %v4092_v58, %v3747_v38  ;;  %v3435_v47 = vpop.f32.mrb[46].mxu1  ;;  %v3881_v40 = vpop.f32.mrb[46].mxu0 }
 0x343   : > { %v3644_v13 = vrot.slane %v3435_v47, 5  ;;  %v4093_v46 = vrot.slane %v3881_v40, 6  ;;  %v6221_v20 = vpop.f32.mrb[47].mxu0  ;;  %v6099_v18 = vpop.f32.mrb[47].mxu1 }
 0x344   : > { %4312 = vst.msk [vmem:[%s8686_s19] sm:$0xff] %vm238_vm1, %v4276_v22  ;;  %v4241_v48 = vadd.f32 %v8679_v51, %v4198_v54 }
 0x345   : > { %v3645_v25 = vsel %vm3636_vm6, %v3642_v33, %v3644_v13  ;;  %v4094_v32 = vsel %vm4087_vm7, %v4091_v5, %v4093_v46 }
 0x346   : > { %v4277_v39 = vmax.f32 %v4241_v48, 0.0  ;;  %v3749_v14 = vadd.f32 %v3645_v25, %v8383_v59  ;;  %v4199_v49 = vadd.f32 %v4094_v32, %v3748_v31  ;;  %v3440_v63 = vpop.f32.mrb[48].mxu1  ;;  %v3886_v4 = vpop.f32.mrb[48].mxu0 }
 0x347   : > { %v3646_v26 = vrot.slane %v3440_v63, 5  ;;  %v4095_v28 = vrot.slane %v3886_v4, 6  ;;  %v6224_v38 = vpop.f32.mrb[49].mxu0  ;;  %v6102_v52 = vpop.f32.mrb[49].mxu1 }
 0x348   : > { %4313 = vst.msk [vmem:[%s8686_s19 + $0x8] sm:$0xff] %vm238_vm1, %v4277_v39  ;;  %v4242_v24 = vadd.f32 %v8679_v51, %v4199_v49 }
 0x349   : > { %v3647_v11 = vsel %vm3636_vm6, %v3644_v13, %v3646_v26  ;;  %v4096_v33 = vsel %vm4087_vm7, %v4093_v46, %v4095_v28 }
 0x34a   : > { %v4278_v5 = vmax.f32 %v4242_v24, 0.0  ;;  %v3750_v41 = vadd.f32 %v3647_v11, %v8395_v53  ;;  %v4200_v59 = vadd.f32 %v4096_v33, %v3749_v14  ;;  %v3445_v3 = vpop.f32.mrb[50].mxu1  ;;  %v3891_v50 = vpop.f32.mrb[50].mxu0 }
 0x34b   : > { %v3648_v17 = vrot.slane %v3445_v3, 5  ;;  %v4097_v58 = vrot.slane %v3891_v50, 6  ;;  %v6227_v22 = vpop.f32.mrb[51].mxu0  ;;  %v6105_v31 = vpop.f32.mrb[51].mxu1 }
 0x34c   : > { %4314 = vst.msk [vmem:[%s8686_s19 + $0x10] sm:$0xff] %vm238_vm1, %v4278_v5  ;;  %v4243_v54 = vadd.f32 %v8679_v51, %v4200_v59 }
 0x34d   : > { %v3649_v47 = vsel %vm3636_vm6, %v3646_v26, %v3648_v17  ;;  %v4098_v40 = vsel %vm4087_vm7, %v4095_v28, %v4097_v58 }
 0x34e   : > { %v4279_v13 = vmax.f32 %v4243_v54, 0.0  ;;  %v3751_v46 = vadd.f32 %v3649_v47, %v8407_v8  ;;  %v4201_v53 = vadd.f32 %v4098_v40, %v3750_v41  ;;  %v3450_v20 = vpop.f32.mrb[52].mxu1  ;;  %v3896_v18 = vpop.f32.mrb[52].mxu0 }
 0x34f   : > { %v3650_v48 = vrot.slane %v3450_v20, 5  ;;  %v4099_v25 = vrot.slane %v3896_v18, 6  ;;  %v6230_v32 = vpop.f32.mrb[53].mxu0  ;;  %v6108_v39 = vpop.f32.mrb[53].mxu1 }
 0x350   : > { %4315 = vst.msk [vmem:[%s8686_s19 + $0x18] sm:$0xff] %vm238_vm1, %v4279_v13  ;;  %v4244_v14 = vadd.f32 %v8679_v51, %v4201_v53 }
 0x351   : > { %v3651_v49 = vsel %vm3636_vm6, %v3648_v17, %v3650_v48  ;;  %v4100_v63 = vsel %vm4087_vm7, %v4097_v58, %v4099_v25 }
 0x352   : > { %v4280_v4 = vmax.f32 %v4244_v14, 0.0  ;;  %v3752_v26 = vadd.f32 %v3651_v49, %v8419_v37  ;;  %v4202_v8 = vadd.f32 %v4100_v63, %v3751_v46  ;;  %v3455_v28 = vpop.f32.mrb[54].mxu1  ;;  %v3901_v38 = vpop.f32.mrb[54].mxu0 }
 0x353   : > { %v3652_v52 = vrot.slane %v3455_v28, 5  ;;  %v4101_v24 = vrot.slane %v3901_v38, 6  ;;  %v6233_v11 = vpop.f32.mrb[55].mxu0  ;;  %v6111_v33 = vpop.f32.mrb[55].mxu1 }
 0x354   : > { %4316 = vst.msk [vmem:[%s8686_s19 + $0x20] sm:$0xff] %vm238_vm1, %v4280_v4  ;;  %v4245_v5 = vadd.f32 %v8679_v51, %v4202_v8 }
 0x355   : > { %v3653_v41 = vsel %vm3636_vm6, %v3650_v48, %v3652_v52  ;;  %v4102_v59 = vsel %vm4087_vm7, %v4099_v25, %v4101_v24 }
 0x356   : > { %v4281_v3 = vmax.f32 %v4245_v5, 0.0  ;;  %v3753_v50 = vadd.f32 %v3653_v41, %v8431_v12  ;;  %v4203_v37 = vadd.f32 %v4102_v59, %v3752_v26  ;;  %v3460_v17 = vpop.f32.mrb[56].mxu1  ;;  %v3906_v58 = vpop.f32.mrb[56].mxu0 }
 0x357   : > { %v3654_v22 = vrot.slane %v3460_v17, 5  ;;  %v4103_v31 = vrot.slane %v3906_v58, 6  ;;  %v6236_v54 = vpop.f32.mrb[57].mxu0  ;;  %v6114_v47 = vpop.f32.mrb[57].mxu1 }
 0x358   : > { %4317 = vst.msk [vmem:[%s8686_s19 + $0x28] sm:$0xff] %vm238_vm1, %v4281_v3  ;;  %v4246_v40 = vadd.f32 %v8679_v51, %v4203_v37 }
 0x359   : > { %v3655_v13 = vsel %vm3636_vm6, %v3652_v52, %v3654_v22  ;;  %v4104_v46 = vsel %vm4087_vm7, %v4101_v24, %v4103_v31 }
 0x35a   : > { %v4282_v53 = vmax.f32 %v4246_v40, 0.0  ;;  %v3754_v20 = vadd.f32 %v3655_v13, %v8443_v44  ;;  %v4204_v12 = vadd.f32 %v4104_v46, %v3753_v50  ;;  %v3465_v18 = vpop.f32.mrb[58].mxu1  ;;  %v3911_v48 = vpop.f32.mrb[58].mxu0 }
 0x35b   : > { %v3656_v25 = vrot.slane %v3465_v18, 5  ;;  %v4105_v32 = vrot.slane %v3911_v48, 6  ;;  %v6239_v39 = vpop.f32.mrb[59].mxu0  ;;  %v6117_v14 = vpop.f32.mrb[59].mxu1 }
 0x35c   : > { %4318 = vst.msk [vmem:[%s8686_s19 + $0x30] sm:$0xff] %vm238_vm1, %v4282_v53  ;;  %v4247_v49 = vadd.f32 %v8679_v51, %v4204_v12 }
 0x35d   : > { %v3657_v63 = vsel %vm3636_vm6, %v3654_v22, %v3656_v25  ;;  %v4106_v4 = vsel %vm4087_vm7, %v4103_v31, %v4105_v32 }
 0x35e   : > { %v4283_v26 = vmax.f32 %v4247_v49, 0.0  ;;  %v3755_v8 = vadd.f32 %v3657_v63, %v8455_v16  ;;  %v4205_v44 = vadd.f32 %v4106_v4, %v3754_v20  ;;  %v3470_v28 = vpop.f32.mrb[60].mxu1  ;;  %v3916_v38 = vpop.f32.mrb[60].mxu0 }
 0x35f   : > { %v3658_v52 = vrot.slane %v3470_v28, 5  ;;  %v4107_v24 = vrot.slane %v3916_v38, 6  ;;  %v6242_v11 = vpop.f32.mrb[61].mxu0  ;;  %v6120_v33 = vpop.f32.mrb[61].mxu1 }
 0x360   : > { %4319 = vst.msk [vmem:[%s8686_s19 + $0x38] sm:$0xff] %vm238_vm1, %v4283_v26  ;;  %v4248_v5 = vadd.f32 %v8679_v51, %v4205_v44 }
 0x361   : > { %v3659_v41 = vsel %vm3636_vm6, %v3656_v25, %v3658_v52  ;;  %v4108_v59 = vsel %vm4087_vm7, %v4105_v32, %v4107_v24 }
 0x362   : > { %v4284_v3 = vmax.f32 %v4248_v5, 0.0  ;;  %v3756_v50 = vadd.f32 %v3659_v41, %v8467_v21  ;;  %v4206_v16 = vadd.f32 %v4108_v59, %v3755_v8  ;;  %v3475_v37 = vpop.f32.mrb[62].mxu1  ;;  %v3921_v17 = vpop.f32.mrb[62].mxu0 }
 0x363   : > { %v3660_v58 = vrot.slane %v3475_v37, 5  ;;  %v4109_v22 = vrot.slane %v3921_v17, 6  ;;  %v6245_v31 = vpop.f32.mrb[63].mxu0  ;;  %v6123_v54 = vpop.f32.mrb[63].mxu1 }
 0x364   : > { %4320 = vst.msk [vmem:[%s8686_s19 + $0x40] sm:$0xff] %vm238_vm1, %v4284_v3  ;;  %v4249_v47 = vadd.f32 %v8679_v51, %v4206_v16 }
 0x365   : > { %v3661_v40 = vsel %vm3636_vm6, %v3658_v52, %v3660_v58  ;;  %v4110_v13 = vsel %vm4087_vm7, %v4107_v24, %v4109_v22 }
 0x366   : > { %v4285_v46 = vmax.f32 %v4249_v47, 0.0  ;;  %v3757_v53 = vadd.f32 %v3661_v40, %v8479_v56  ;;  %v4207_v21 = vadd.f32 %v4110_v13, %v3756_v50  ;;  %v3480_v20 = vpop.f32.mrb[64].mxu1  ;;  %v3926_v12 = vpop.f32.mrb[64].mxu0 }
 0x367   : > { %v3662_v18 = vrot.slane %v3480_v20, 5  ;;  %v4111_v48 = vrot.slane %v3926_v12, 6  ;;  %v6248_v25 = vpop.f32.mrb[65].mxu0  ;;  %v6126_v32 = vpop.f32.mrb[65].mxu1 }
 0x368   : > { %4321 = vst.msk [vmem:[%s8686_s19 + $0x48] sm:$0xff] %vm238_vm1, %v4285_v46  ;;  %v4250_v39 = vadd.f32 %v8679_v51, %v4207_v21 }
 0x369   : > { %v3663_v14 = vsel %vm3636_vm6, %v3660_v58, %v3662_v18  ;;  %v4112_v49 = vsel %vm4087_vm7, %v4109_v22, %v4111_v48 }
 0x36a   : > { %v4286_v63 = vmax.f32 %v4250_v39, 0.0  ;;  %v3758_v4 = vadd.f32 %v3663_v14, %v8491_v60  ;;  %v4208_v56 = vadd.f32 %v4112_v49, %v3757_v53  ;;  %v3485_v26 = vpop.f32.mrb[66].mxu1  ;;  %v3931_v8 = vpop.f32.mrb[66].mxu0 }
 0x36b   : > { %v3664_v44 = vrot.slane %v3485_v26, 5  ;;  %v4113_v28 = vrot.slane %v3931_v8, 6  ;;  %v6251_v38 = vpop.f32.mrb[67].mxu0  ;;  %v6129_v52 = vpop.f32.mrb[67].mxu1 }
 0x36c   : > { %4322 = vst.msk [vmem:[%s8686_s19 + $0x50] sm:$0xff] %vm238_vm1, %v4286_v63  ;;  %v4251_v24 = vadd.f32 %v8679_v51, %v4208_v56 }
 0x36d   : > { %v3665_v11 = vsel %vm3636_vm6, %v3662_v18, %v3664_v44  ;;  %v4114_v33 = vsel %vm4087_vm7, %v4111_v48, %v4113_v28 }
 0x36e   : > { %v4287_v5 = vmax.f32 %v4251_v24, 0.0  ;;  %v3759_v41 = vadd.f32 %v3665_v11, %v8503_v0  ;;  %v4209_v60 = vadd.f32 %v4114_v33, %v3758_v4  ;;  %v3490_v59 = vpop.f32.mrb[68].mxu1  ;;  %v3936_v3 = vpop.f32.mrb[68].mxu0 }
 0x36f   : > { %v3666_v50 = vrot.slane %v3490_v59, 5  ;;  %v4115_v16 = vrot.slane %v3936_v3, 6  ;;  %v6254_v37 = vpop.f32.mrb[69].mxu0  ;;  %v6132_v17 = vpop.f32.mrb[69].mxu1 }
 0x370   : > { %4323 = vst.msk [vmem:[%s8686_s19 + $0x58] sm:$0xff] %vm238_vm1, %v4287_v5  ;;  %v4252_v58 = vadd.f32 %v8679_v51, %v4209_v60 }
 0x371   : > { %v3667_v22 = vsel %vm3636_vm6, %v3664_v44, %v3666_v50  ;;  %v4116_v31 = vsel %vm4087_vm7, %v4113_v28, %v4115_v16 }
 0x372   : > { %v4288_v54 = vmax.f32 %v4252_v58, 0.0  ;;  %v3760_v47 = vadd.f32 %v3667_v22, %v8515_v7  ;;  %v4210_v0 = vadd.f32 %v4116_v31, %v3759_v41  ;;  %v3495_v40 = vpop.f32.mrb[70].mxu1  ;;  %v3941_v13 = vpop.f32.mrb[70].mxu0 }
 0x373   : > { %v3668_v46 = vrot.slane %v3495_v40, 5  ;;  %v4117_v53 = vrot.slane %v3941_v13, 6  ;;  %v6257_v21 = vpop.f32.mrb[71].mxu0  ;;  %v6135_v20 = vpop.f32.mrb[71].mxu1 }
 0x374   : > { %4324 = vst.msk [vmem:[%s8686_s19 + $0x60] sm:$0xff] %vm238_vm1, %v4288_v54  ;;  %v4253_v12 = vadd.f32 %v8679_v51, %v4210_v0 }
 0x375   : > { %v3669_v18 = vsel %vm3636_vm6, %v3666_v50, %v3668_v46  ;;  %v4118_v48 = vsel %vm4087_vm7, %v4115_v16, %v4117_v53 }
 0x376   : > { %v4289_v25 = vmax.f32 %v4253_v12, 0.0  ;;  %v3761_v32 = vadd.f32 %v3669_v18, %v8527_v15  ;;  %v4211_v7 = vadd.f32 %v4118_v48, %v3760_v47  ;;  %v3500_v39 = vpop.f32.mrb[72].mxu1  ;;  %v3946_v14 = vpop.f32.mrb[72].mxu0 }
 0x377   : > { %v3670_v49 = vrot.slane %v3500_v39, 5  ;;  %v4119_v63 = vrot.slane %v3946_v14, 6  ;;  %v6260_v4 = vpop.f32.mrb[73].mxu0  ;;  %v6138_v56 = vpop.f32.mrb[73].mxu1 }
 0x378   : > { %4325 = vst.msk [vmem:[%s8686_s19 + $0x68] sm:$0xff] %vm238_vm1, %v4289_v25  ;;  %v4254_v26 = vadd.f32 %v8679_v51, %v4211_v7 }
 0x379   : > { %v3671_v8 = vsel %vm3636_vm6, %v3668_v46, %v3670_v49  ;;  %v4120_v44 = vsel %vm4087_vm7, %v4117_v53, %v4119_v63 }
 0x37a   : > { %v4290_v28 = vmax.f32 %v4254_v26, 0.0  ;;  %v3762_v38 = vadd.f32 %v3671_v8, %v8539_v30  ;;  %v4212_v15 = vadd.f32 %v4120_v44, %v3761_v32  ;;  %v3505_v52 = vpop.f32.mrb[74].mxu1  ;;  %v3951_v24 = vpop.f32.mrb[74].mxu0 }
 0x37b   : > { %v3672_v11 = vrot.slane %v3505_v52, 5  ;;  %v4121_v33 = vrot.slane %v3951_v24, 6  ;;  %v6263_v5 = vpop.f32.mrb[75].mxu0  ;;  %v6141_v41 = vpop.f32.mrb[75].mxu1 }
 0x37c   : > { %4326 = vst.msk [vmem:[%s8686_s19 + $0x70] sm:$0xff] %vm238_vm1, %v4290_v28  ;;  %v4255_v60 = vadd.f32 %v8679_v51, %v4212_v15 }
 0x37d   : > { %v3673_v59 = vsel %vm3636_vm6, %v3670_v49, %v3672_v11  ;;  %v4122_v3 = vsel %vm4087_vm7, %v4119_v63, %v4121_v33 }
 0x37e   : > { %v4291_v50 = vmax.f32 %v4255_v60, 0.0  ;;  %v3763_v16 = vadd.f32 %v3673_v59, %v8551_v61  ;;  %v4213_v30 = vadd.f32 %v4122_v3, %v3762_v38  ;;  %v3510_v37 = vpop.f32.mrb[76].mxu1  ;;  %v3956_v17 = vpop.f32.mrb[76].mxu0 }
 0x37f   : > { %v3674_v58 = vrot.slane %v3510_v37, 5  ;;  %v4123_v22 = vrot.slane %v3956_v17, 6  ;;  %v6266_v31 = vpop.f32.mrb[77].mxu0  ;;  %v6144_v54 = vpop.f32.mrb[77].mxu1 }
 0x380   : > { %4327 = vst.msk [vmem:[%s8686_s19 + $0x78] sm:$0xff] %vm238_vm1, %v4291_v50  ;;  %v4256_v47 = vadd.f32 %v8679_v51, %v4213_v30 }
 0x381   : > { %v3675_v0 = vsel %vm3636_vm6, %v3672_v11, %v3674_v58  ;;  %v4124_v40 = vsel %vm4087_vm7, %v4121_v33, %v4123_v22 }
 0x382   : > { %v4292_v13 = vmax.f32 %v4256_v47, 0.0  ;;  %v3764_v46 = vadd.f32 %v3675_v0, %v8563_v27  ;;  %v4214_v61 = vadd.f32 %v4124_v40, %v3763_v16  ;;  %v3515_v53 = vpop.f32.mrb[78].mxu1  ;;  %v3961_v21 = vpop.f32.mrb[78].mxu0 }
 0x383   : > { %v3676_v20 = vrot.slane %v3515_v53, 5  ;;  %v4125_v12 = vrot.slane %v3961_v21, 6  ;;  %v6269_v18 = vpop.f32.mrb[79].mxu0  ;;  %v6147_v48 = vpop.f32.mrb[79].mxu1 }
 0x384   : > { %4328 = vst.msk [vmem:[%s8686_s19 + $0x80] sm:$0xff] %vm238_vm1, %v4292_v13  ;;  %v4257_v25 = vadd.f32 %v8679_v51, %v4214_v61 }
 0x385   : > { %v3677_v32 = vsel %vm3636_vm6, %v3674_v58, %v3676_v20  ;;  %v4126_v7 = vsel %vm4087_vm7, %v4123_v22, %v4125_v12 }
 0x386   : > { %v4293_v39 = vmax.f32 %v4257_v25, 0.0  ;;  %v3765_v14 = vadd.f32 %v3677_v32, %v8575_v45  ;;  %v4215_v27 = vadd.f32 %v4126_v7, %v3764_v46  ;;  %v3520_v49 = vpop.f32.mrb[80].mxu1  ;;  %v3966_v63 = vpop.f32.mrb[80].mxu0 }
 0x387   : > { %v3678_v4 = vrot.slane %v3520_v49, 5  ;;  %v4127_v56 = vrot.slane %v3966_v63, 6  ;;  %v6272_v26 = vpop.f32.mrb[81].mxu0  ;;  %v6150_v8 = vpop.f32.mrb[81].mxu1 }
 0x388   : > { %4329 = vst.msk [vmem:[%s8686_s19 + $0x88] sm:$0xff] %vm238_vm1, %v4293_v39  ;;  %v4258_v44 = vadd.f32 %v8679_v51, %v4215_v27 }
 0x389   : > { %v3679_v28 = vsel %vm3636_vm6, %v3676_v20, %v3678_v4  ;;  %v4128_v38 = vsel %vm4087_vm7, %v4125_v12, %v4127_v56 }
 0x38a   : > { %v4294_v15 = vmax.f32 %v4258_v44, 0.0  ;;  %v3766_v52 = vadd.f32 %v3679_v28, %v8587_v55  ;;  %v4216_v45 = vadd.f32 %v4128_v38, %v3765_v14  ;;  %v3525_v24 = vpop.f32.mrb[82].mxu1  ;;  %v3971_v11 = vpop.f32.mrb[82].mxu0 }
 0x38b   : > { %v3680_v33 = vrot.slane %v3525_v24, 5  ;;  %v4129_v5 = vrot.slane %v3971_v11, 6  ;;  %v6275_v41 = vpop.f32.mrb[83].mxu0  ;;  %v6153_v60 = vpop.f32.mrb[83].mxu1 }
 0x38c   : > { %4330 = vst.msk [vmem:[%s8686_s19 + $0x90] sm:$0xff] %vm238_vm1, %v4294_v15  ;;  %v4259_v59 = vadd.f32 %v8679_v51, %v4216_v45 }
 0x38d   : > { %v3681_v3 = vsel %vm3636_vm6, %v3678_v4, %v3680_v33  ;;  %v4130_v50 = vsel %vm4087_vm7, %v4127_v56, %v4129_v5 }
 0x38e   : > { %v4295_v16 = vmax.f32 %v4259_v59, 0.0  ;;  %v3767_v30 = vadd.f32 %v3681_v3, %v8599_v29  ;;  %v4217_v55 = vadd.f32 %v4130_v50, %v3766_v52  ;;  %v3530_v37 = vpop.f32.mrb[84].mxu1  ;;  %v3976_v17 = vpop.f32.mrb[84].mxu0 }
 0x38f   : > { %v3682_v58 = vrot.slane %v3530_v37, 5  ;;  %v4131_v22 = vrot.slane %v3976_v17, 6  ;;  %v6278_v31 = vpop.f32.mrb[85].mxu0  ;;  %v6156_v54 = vpop.f32.mrb[85].mxu1 }
 0x390   : > { %4331 = vst.msk [vmem:[%s8686_s19 + $0x98] sm:$0xff] %vm238_vm1, %v4295_v16  ;;  %v4260_v47 = vadd.f32 %v8679_v51, %v4217_v55 }
 0x391   : > { %v3683_v0 = vsel %vm3636_vm6, %v3680_v33, %v3682_v58  ;;  %v4132_v40 = vsel %vm4087_vm7, %v4129_v5, %v4131_v22 }
 0x392   : > { %v4296_v13 = vmax.f32 %v4260_v47, 0.0  ;;  %v3768_v46 = vadd.f32 %v3683_v0, %v8609_v36  ;;  %v4218_v29 = vadd.f32 %v4132_v40, %v3767_v30  ;;  %v3535_v61 = vpop.f32.mrb[86].mxu1  ;;  %v3981_v53 = vpop.f32.mrb[86].mxu0 }
 0x393   : > { %v3684_v21 = vrot.slane %v3535_v61, 5  ;;  %v4133_v20 = vrot.slane %v3981_v53, 6  ;;  %v6281_v12 = vpop.f32.mrb[87].mxu0  ;;  %v6159_v18 = vpop.f32.mrb[87].mxu1 }
 0x394   : > { %4332 = vst.msk [vmem:[%s8686_s19 + $0xa0] sm:$0xff] %vm238_vm1, %v4296_v13  ;;  %v4261_v48 = vadd.f32 %v8679_v51, %v4218_v29 }
 0x395   : > { %v3685_v25 = vsel %vm3636_vm6, %v3682_v58, %v3684_v21  ;;  %v4134_v32 = vsel %vm4087_vm7, %v4131_v22, %v4133_v20 }
 0x396   : > { %v4297_v7 = vmax.f32 %v4261_v48, 0.0  ;;  %v3769_v39 = vadd.f32 %v3685_v25, %v8615_v19  ;;  %v4219_v36 = vadd.f32 %v4134_v32, %v3768_v46  ;;  %v3540_v14 = vpop.f32.mrb[88].mxu1  ;;  %v3986_v27 = vpop.f32.mrb[88].mxu0 }
 0x397   : > { %v3686_v49 = vrot.slane %v3540_v14, 5  ;;  %v4135_v63 = vrot.slane %v3986_v27, 6  ;;  %v6284_v4 = vpop.f32.mrb[89].mxu0  ;;  %v6162_v56 = vpop.f32.mrb[89].mxu1 }
 0x398   : > { %4333 = vst.msk [vmem:[%s8686_s19 + $0xa8] sm:$0xff] %vm238_vm1, %v4297_v7  ;;  %v4262_v26 = vadd.f32 %v8679_v51, %v4219_v36 }
 0x399   : > { %v3687_v8 = vsel %vm3636_vm6, %v3684_v21, %v3686_v49  ;;  %v4136_v44 = vsel %vm4087_vm7, %v4133_v20, %v4135_v63 }
 0x39a   : > { %v4298_v28 = vmax.f32 %v4262_v26, 0.0  ;;  %v3770_v38 = vadd.f32 %v3687_v8, %v8620_v10  ;;  %v4220_v19 = vadd.f32 %v4136_v44, %v3769_v39  ;;  %v3545_v15 = vpop.f32.mrb[90].mxu1  ;;  %v3991_v52 = vpop.f32.mrb[90].mxu0 }
 0x39b   : > { %v3688_v45 = vrot.slane %v3545_v15, 5  ;;  %v4137_v24 = vrot.slane %v3991_v52, 6  ;;  %v6287_v11 = vpop.f32.mrb[91].mxu0  ;;  %v6165_v33 = vpop.f32.mrb[91].mxu1 }
 0x39c   : > { %4334 = vst.msk [vmem:[%s8686_s19 + $0xb0] sm:$0xff] %vm238_vm1, %v4298_v28  ;;  %v4263_v5 = vadd.f32 %v8679_v51, %v4220_v19 }
 0x39d   : > { %v3689_v41 = vsel %vm3636_vm6, %v3686_v49, %v3688_v45  ;;  %v4138_v60 = vsel %vm4087_vm7, %v4135_v63, %v4137_v24 }
 0x39e   : > { %v4299_v59 = vmax.f32 %v4263_v5, 0.0  ;;  %v3771_v3 = vadd.f32 %v3689_v41, %v8625_v9  ;;  %v4221_v10 = vadd.f32 %v4138_v60, %v3770_v38  ;;  %v3550_v50 = vpop.f32.mrb[92].mxu1  ;;  %v3996_v16 = vpop.f32.mrb[92].mxu0 }
 0x39f   : > { %v3690_v30 = vrot.slane %v3550_v50, 5  ;;  %v4139_v55 = vrot.slane %v3996_v16, 6  ;;  %v6290_v37 = vpop.f32.mrb[93].mxu0  ;;  %v6168_v17 = vpop.f32.mrb[93].mxu1 }
 0x3a0   : > { %4335 = vst.msk [vmem:[%s8686_s19 + $0xb8] sm:$0xff] %vm238_vm1, %v4299_v59  ;;  %v4264_v58 = vadd.f32 %v8679_v51, %v4221_v10 }
 0x3a1   : > { %v3691_v22 = vsel %vm3636_vm6, %v3688_v45, %v3690_v30  ;;  %v4140_v31 = vsel %vm4087_vm7, %v4137_v24, %v4139_v55 }
 0x3a2   : > { %v4300_v54 = vmax.f32 %v4264_v58, 0.0  ;;  %v3772_v47 = vadd.f32 %v3691_v22, %v8630_v1  ;;  %v4222_v9 = vadd.f32 %v4140_v31, %v3771_v3  ;;  %v3555_v0 = vpop.f32.mrb[94].mxu1  ;;  %v4001_v40 = vpop.f32.mrb[94].mxu0 }
 0x3a3   : > { %v3692_v13 = vrot.slane %v3555_v0, 5  ;;  %v4141_v46 = vrot.slane %v4001_v40, 6  ;;  %v6293_v29 = vpop.f32.mrb[95].mxu0  ;;  %v6171_v61 = vpop.f32.mrb[95].mxu1 }
 0x3a4   : > { %4336 = vst.msk [vmem:[%s8686_s19 + $0xc0] sm:$0xff] %vm238_vm1, %v4300_v54  ;;  %v4265_v53 = vadd.f32 %v8679_v51, %v4222_v9 }
 0x3a5   : > { %v3693_v21 = vsel %vm3636_vm6, %v3690_v30, %v3692_v13  ;;  %v4142_v20 = vsel %vm4087_vm7, %v4139_v55, %v4141_v46 }
 0x3a6   : > { %v4301_v12 = vmax.f32 %v4265_v53, 0.0  ;;  %v3773_v18 = vadd.f32 %v3693_v21, %v8635_v62  ;;  %v4223_v1 = vadd.f32 %v4142_v20, %v3772_v47  ;;  %v3560_v48 = vpop.f32.mrb[96].mxu1  ;;  %v4006_v25 = vpop.f32.mrb[96].mxu0 }
 0x3a7   : > { %v3694_v32 = vrot.slane %v3560_v48, 5  ;;  %v4143_v7 = vrot.slane %v4006_v25, 6  ;;  %v6296_v39 = vpop.f32.mrb[97].mxu0  ;;  %v6174_v36 = vpop.f32.mrb[97].mxu1 }
 0x3a8   : > { %4337 = vst.msk [vmem:[%s8686_s19 + $0xc8] sm:$0xff] %vm238_vm1, %v4301_v12  ;;  %v4266_v14 = vadd.f32 %v8679_v51, %v4223_v1 }
 0x3a9   : > { %v3695_v27 = vsel %vm3636_vm6, %v3692_v13, %v3694_v32  ;;  %v4144_v49 = vsel %vm4087_vm7, %v4141_v46, %v4143_v7 }
 0x3aa   : > { %v4302_v63 = vmax.f32 %v4266_v14, 0.0  ;;  %v3774_v4 = vadd.f32 %v3695_v27, %v8640_v35  ;;  %v4224_v62 = vadd.f32 %v4144_v49, %v3773_v18  ;;  %v3565_v56 = vpop.f32.mrb[98].mxu1  ;;  %v4011_v26 = vpop.f32.mrb[98].mxu0 }
 0x3ab   : > { %v3696_v8 = vrot.slane %v3565_v56, 5  ;;  %v4145_v44 = vrot.slane %v4011_v26, 6  ;;  %v6299_v28 = vpop.f32.mrb[99].mxu0  ;;  %v6177_v38 = vpop.f32.mrb[99].mxu1 }
 0x3ac   : > { %4338 = vst.msk [vmem:[%s8686_s19 + $0xd0] sm:$0xff] %vm238_vm1, %v4302_v63  ;;  %v4267_v19 = vadd.f32 %v8679_v51, %v4224_v62 }
 0x3ad   : > { %v3697_v15 = vsel %vm3636_vm6, %v3694_v32, %v3696_v8  ;;  %v4146_v52 = vsel %vm4087_vm7, %v4143_v7, %v4145_v44 }
 0x3ae   : > { %v4303_v45 = vmax.f32 %v4267_v19, 0.0  ;;  %v3775_v24 = vadd.f32 %v3697_v15, %v8645_v57  ;;  %v4225_v35 = vadd.f32 %v4146_v52, %v3774_v4  ;;  %v3570_v11 = vpop.f32.mrb[100].mxu1  ;;  %v4016_v33 = vpop.f32.mrb[100].mxu0 }
 0x3af   : > { %v3698_v5 = vrot.slane %v3570_v11, 5  ;;  %v4147_v41 = vrot.slane %v4016_v33, 6  ;;  %v6302_v60 = vpop.f32.mrb[101].mxu0  ;;  %v6180_v59 = vpop.f32.mrb[101].mxu1 }
 0x3b0   : > { %4339 = vst.msk [vmem:[%s8686_s19 + $0xd8] sm:$0xff] %vm238_vm1, %v4303_v45  ;;  %v4268_v3 = vadd.f32 %v8679_v51, %v4225_v35 }
 0x3b1   : > { %v3699_v10 = vsel %vm3636_vm6, %v3696_v8, %v3698_v5  ;;  %v4148_v50 = vsel %vm4087_vm7, %v4145_v44, %v4147_v41 }
 0x3b2   : > { %v4304_v16 = vmax.f32 %v4268_v3, 0.0  ;;  %v3776_v30 = vadd.f32 %v3699_v10, %v8650_v43  ;;  %v4226_v57 = vadd.f32 %v4148_v50, %v3775_v24  ;;  %v3575_v55 = vpop.f32.mrb[102].mxu1  ;;  %v4021_v37 = vpop.f32.mrb[102].mxu0 }
 0x3b3   : > { %v3700_v17 = vrot.slane %v3575_v55, 5  ;;  %v4149_v58 = vrot.slane %v4021_v37, 6  ;;  %v6305_v22 = vpop.f32.mrb[103].mxu0  ;;  %v6183_v31 = vpop.f32.mrb[103].mxu1 }
 0x3b4   : > { %4340 = vst.msk [vmem:[%s8686_s19 + $0xe0] sm:$0xff] %vm238_vm1, %v4304_v16  ;;  %v4269_v54 = vadd.f32 %v8679_v51, %v4226_v57 }
 0x3b5   : > { %v3701_v47 = vsel %vm3636_vm6, %v3698_v5, %v3700_v17  ;;  %v4150_v9 = vsel %vm4087_vm7, %v4147_v41, %v4149_v58 }
 0x3b6   : > { %v4305_v0 = vmax.f32 %v4269_v54, 0.0  ;;  %v3777_v40 = vadd.f32 %v3701_v47, %v8655_v23  ;;  %v4227_v43 = vadd.f32 %v4150_v9, %v3776_v30  ;;  %v3580_v13 = vpop.f32.mrb[104].mxu1  ;;  %v4026_v46 = vpop.f32.mrb[104].mxu0 }
 0x3b7   : > { %v3702_v29 = vrot.slane %v3580_v13, 5  ;;  %v4151_v61 = vrot.slane %v4026_v46, 6  ;;  %v6308_v53 = vpop.f32.mrb[105].mxu0  ;;  %v6186_v21 = vpop.f32.mrb[105].mxu1 }
 0x3b8   : > { %4341 = vst.msk [vmem:[%s8686_s19 + $0xe8] sm:$0xff] %vm238_vm1, %v4305_v0  ;;  %v4270_v20 = vadd.f32 %v8679_v51, %v4227_v43 }
 0x3b9   : > { %v3703_v12 = vsel %vm3636_vm6, %v3700_v17, %v3702_v29  ;;  %v4152_v18 = vsel %vm4087_vm7, %v4149_v58, %v4151_v61 }
 0x3ba   : > { %v4306_v1 = vmax.f32 %v4270_v20, 0.0  ;;  %v3778_v48 = vadd.f32 %v3703_v12, %v8660_v2  ;;  %v4228_v23 = vadd.f32 %v4152_v18, %v3777_v40  ;;  %v3585_v25 = vpop.f32.mrb[106].mxu1  ;;  %v4031_v32 = vpop.f32.mrb[106].mxu0 }
 0x3bb   : > { %v3704_v7 = vrot.slane %v3585_v25, 5  ;;  %v4153_v39 = vrot.slane %v4031_v32, 6  ;;  %v6311_v36 = vpop.f32.mrb[107].mxu0  ;;  %v6189_v14 = vpop.f32.mrb[107].mxu1 }
 0x3bc   : > { %4342 = vst.msk [vmem:[%s8686_s19 + $0xf0] sm:$0xff] %vm238_vm1, %v4306_v1  ;;  %v4271_v27 = vadd.f32 %v8679_v51, %v4228_v23 }
 0x3bd   : > { %v3705_v49 = vsel %vm3636_vm6, %v3702_v29, %v3704_v7  ;;  %v4154_v63 = vsel %vm4087_vm7, %v4151_v61, %v4153_v39 }
 0x3be   : > { %v4307_v4 = vmax.f32 %v4271_v27, 0.0  ;;  %v3779_v62 = vadd.f32 %v3705_v49, %v8663_v6  ;;  %v4229_v2 = vadd.f32 %v4154_v63, %v3778_v48  ;;  %v3590_v56 = vpop.f32.mrb[108].mxu1  ;;  %v4036_v26 = vpop.f32.mrb[108].mxu0 }
 0x3bf   : > { %v3706_v8 = vrot.slane %v3590_v56, 5  ;;  %v4155_v44 = vrot.slane %v4036_v26, 6  ;;  %v6314_v28 = vpop.f32.mrb[109].mxu0  ;;  %v6192_v38 = vpop.f32.mrb[109].mxu1 }
 0x3c0   : > { %4343 = vst.msk [vmem:[%s8686_s19 + $0xf8] sm:$0xff] %vm238_vm1, %v4307_v4  ;;  %v4272_v19 = vadd.f32 %v8679_v51, %v4229_v2 }
 0x3c1   : > { %v3707_v15 = vsel %vm3636_vm6, %v3704_v7, %v3706_v8  ;;  %v4156_v52 = vsel %vm4087_vm7, %v4153_v39, %v4155_v44 }
 0x3c2   : > { %v4308_v45 = vmax.f32 %v4272_v19, 0.0  ;;  %v3780_v24 = vadd.f32 %v3707_v15, %v8666_v34  ;;  %v4230_v6 = vadd.f32 %v4156_v52, %v3779_v62  ;;  %v3595_v35 = vpop.f32.mrb[110].mxu1  ;;  %v4041_v11 = vpop.f32.mrb[110].mxu0 }
 0x3c3   : > { %v3708_v33 = vrot.slane %v3595_v35, 5  ;;  %v4157_v5 = vrot.slane %v4041_v11, 6  ;;  %v6317_v41 = vpop.f32.mrb[111].mxu0  ;;  %v6195_v60 = vpop.f32.mrb[111].mxu1 }
 0x3c4   : > { %4344 = vst.msk [vmem:[%s8686_s19 + $0x100] sm:$0xff] %vm238_vm1, %v4308_v45  ;;  %v4273_v59 = vadd.f32 %v8679_v51, %v4230_v6 }
 0x3c5   : > { %v3709_v3 = vsel %vm3636_vm6, %v3706_v8, %v3708_v33  ;;  %v4158_v10 = vsel %vm4087_vm7, %v4155_v44, %v4157_v5 }
 0x3c6   : > { %v4309_v50 = vmax.f32 %v4273_v59, 0.0  ;;  %v3781_v34 = vadd.f32 %v3709_v3, %v8669_v42  ;;  %v4231_v16 = vadd.f32 %v4158_v10, %v3780_v24  ;;  %v4046_v30 = vpop.f32.mrb[112].mxu0 }
 0x3c7   : > { %v4159_v57 = vrot.slane %v4046_v30, 6  ;;  %v6320_v55 = vpop.f32.mrb[113].mxu0 }
 0x3c8   : > { %4345 = vst.msk [vmem:[%s8686_s19 + $0x108] sm:$0xff] %vm238_vm1, %v4309_v50  ;;  %v4274_v37 = vadd.f32 %v8679_v51, %v4231_v16 }
 0x3c9   : > { %v4160_v17 = vsel %vm4087_vm7, %v4157_v5, %v4159_v57 }
 0x3ca   : > { %v4310_v58 = vmax.f32 %v4274_v37, 0.0  ;;  %v4232_v22 = vadd.f32 %v4160_v17, %v3781_v34 }
 0x3cc   : > { %4346 = vst.msk [vmem:[%s8686_s19 + $0x110] sm:$0xff] %vm238_vm1, %v4310_v58  ;;  %v4275_v31 = vadd.f32 %v8679_v51, %v4232_v22 }
 0x3ce   : > { %v4311_v54 = vmax.f32 %v4275_v31, 0.0 }
 0x3d0   : > { %4347 = vst.msk [vmem:[%s8686_s19 + $0x118] sm:$0xff] %vm238_vm1, %v4311_v54 }
 0x3d1 PF: > { %s13_s14 = sadd.s32 1, %s6475_s14   ;;  %s8911_s12 = smov %s6471_s13 }
 0x3d2   : > { %p10_p5 = scmp.ge.s32.totalorder %s13_s14, 4   ;;  %s8912_s13 = smov %s8914_s15 }
 0x3d4   :  { %12 = sbr.rel (!%p10_p5) target bundleno = 2 (0x2), region = 71 }

</bundles_post_ra>
